<compile_context>
chip_gen: v6e
topology: v6e:2x2x1
jax: 0.10.0
libtpu: 0.0.40
codegen_flags: <defaults>
</compile_context>

<pallas_src>
import math
from functools import partial

import jax
import jax.numpy as jnp
from jax import lax
from jax.experimental import pallas as pl
from jax.experimental.pallas import tpu as pltpu

EPS = 1e-5


# ---------------------------------------------------------------------------
# Pallas kernels: fused  relu? -> matmul(bf16, f32 acc) -> +bias -> relu? /
#                                                           +residual
# ---------------------------------------------------------------------------
def _mm_bias_kernel(a_ref, b_ref, c_ref, o_ref, *, relu_in, relu_out):
    a = a_ref[...]
    if relu_in:
        a = jnp.maximum(a, 0)                               # ReLU on bf16 input tile
    y = jnp.dot(a, b_ref[...], preferred_element_type=jnp.float32) + c_ref[...]
    if relu_out:
        y = jnp.maximum(y, 0.0)
    o_ref[...] = y.astype(o_ref.dtype)


def _mm_bias_res_kernel(a_ref, b_ref, c_ref, r_ref, o_ref, *, relu_in):
    # conv2 of both branches with eval-mode shake (alpha = 0.5) folded into the
    # K-stacked weight; epilogue adds folded-BN bias and the residual.
    a = a_ref[...]
    if relu_in:
        a = jnp.maximum(a, 0)
    acc = jnp.dot(a, b_ref[...], preferred_element_type=jnp.float32)
    o_ref[...] = (acc + c_ref[...] + r_ref[...]).astype(o_ref.dtype)


def fused_matmul(a, w, bias, *, relu_in=False, relu_out=False, residual=None,
                 out_dtype=jnp.float32):
    """out = [relu]( relu_in?(a) @ w + bias [+ residual] )   (bf16 MXU, f32 acc)"""
    M, K = a.shape
    Kw, N = w.shape
    assert K == Kw

    a = a.astype(jnp.bfloat16)                  # bf16 MXU operands
    w = w.astype(jnp.bfloat16)
    bias = bias.reshape(1, N).astype(jnp.float32)

    TM = 256 if M >= 256 else M                 # M-row tiles (M is a mult. of 8 here)
    Mp = pl.cdiv(M, TM) * TM
    if Mp != M:
        a = jnp.pad(a, ((0, Mp - M), (0, 0)))
        if residual is not None:
            residual = jnp.pad(residual, ((0, Mp - M), (0, 0)))

    in_specs = [pl.BlockSpec((TM, K), lambda i: (i, 0)),
                pl.BlockSpec((K, N), lambda i: (0, 0)),
                pl.BlockSpec((1, N), lambda i: (0, 0))]
    args = [a, w, bias]
    if residual is not None:
        kernel = partial(_mm_bias_res_kernel, relu_in=relu_in)
        in_specs.append(pl.BlockSpec((TM, N), lambda i: (i, 0)))
        args.append(residual.astype(jnp.float32))
    else:
        kernel = partial(_mm_bias_kernel, relu_in=relu_in, relu_out=relu_out)

    out = pl.pallas_call(
        kernel,
        out_shape=jax.ShapeDtypeStruct((Mp, N), out_dtype),
        grid=(Mp // TM,),
        in_specs=in_specs,
        out_specs=pl.BlockSpec((TM, N), lambda i: (i, 0)),
        compiler_params=pltpu.CompilerParams(
            dimension_semantics=("parallel",)),
    )(*args)
    return out[:M] if Mp != M else out


# ---------------------------------------------------------------------------
# Conv glue (im2col in plain JAX, everything else inside the fused matmul)
# ---------------------------------------------------------------------------
def _im2col3x3(x, stride):
    """3x3, pad=1 im2col: [N,H,W,C] -> ([N*Ho*Wo, 9*C] bf16, (N,Ho,Wo))."""
    n, h, w, c = x.shape
    ho = (h + 2 - 3) // stride + 1
    wo = (w + 2 - 3) // stride + 1
    xp = jnp.pad(x, ((0, 0), (1, 1), (1, 1), (0, 0)))
    taps = [xp[:, kh:kh + (ho - 1) * stride + 1:stride,
               kw:kw + (wo - 1) * stride + 1:stride, :]
            for kh in range(3) for kw in range(3)]
    patches = jnp.stack(taps, axis=3)                       # [n, ho, wo, 9, c]
    return patches.reshape(n * ho * wo, 9 * c).astype(jnp.bfloat16), (n, ho, wo)


def _shortcut(x, p, stride):
    # ReLU is fused in the kernel (it commutes with the zero pad / subsample);
    # the two 1x1 convs run as a single block-diagonal matmul.
    n, h, w, cin = x.shape
    x1 = x[:, ::stride, ::stride, :]
    xs = jnp.pad(x[:, 1:, 1:, :], ((0, 0), (0, 1), (0, 1), (0, 0)))
    x2 = xs[:, ::stride, ::stride, :]
    a = jnp.concatenate([x1, x2], axis=-1).reshape(-1, 2 * cin)
    return fused_matmul(a, p['sc_w'], p['sc_bias'], relu_in=True)


def _shake_block(x, p):
    stride, cout = p['stride'], p['cout']
    # conv1 of both branches: shared im2col of x, ReLU(x) fused as prologue,
    # BN + ReLU as epilogue -> [M, 2*cout] intermediate, stored bf16 (it is only
    # ever consumed as an MXU operand).
    a1, (n, ho, wo) = _im2col3x3(x, stride)
    t = fused_matmul(a1, p['w1'], p['bias1'], relu_in=True, relu_out=True,
                     out_dtype=jnp.bfloat16)
    # Residual path.
    if p['equal']:
        res = x.reshape(-1, cout)
    else:
        res = _shortcut(x, p, stride)
    # conv2 of both branches + eval-mode shake (alpha=0.5) as a single K-stacked
    # matmul of width cout; BN bias + residual add in the epilogue.
    a2, _ = _im2col3x3(t.reshape(n, ho, wo, 2 * cout), 1)
    out = fused_matmul(a2, p['w2'], p['bias2'], residual=res)
    return out.reshape(n, ho, wo, cout)


def shake_resnet_fwd(x_nchw, pp):
    x = jnp.transpose(x_nchw, (0, 2, 3, 1)).astype(jnp.float32)   # NCHW -> NHWC
    a, (n, ho, wo) = _im2col3x3(x, 1)
    h = fused_matmul(a, pp['c_in_w'], pp['c_in_bias'])
    h = h.reshape(n, ho, wo, -1)
    for blk in pp['blocks']:
        h = _shake_block(h, blk)
    # Head: relu + global average pool + FC, left to XLA (tiny shapes).
    pooled = jnp.mean(jnp.maximum(h, 0.0), axis=(1, 2))
    return jnp.dot(pooled, pp['fc_w'],
                   precision=lax.Precision.HIGHEST) + pp['fc_b']


# ---------------------------------------------------------------------------
# Deterministic parameter init (mirrors ShakeResNet.__init__ shapes)
# ---------------------------------------------------------------------------
def fold_bn(gamma, beta, mean, var):
    s = gamma / jnp.sqrt(var + EPS)
    return s, beta - mean * s


def init_params(key, depth=8, w_base=16, label=10):
    n_units = int((depth - 2) / 6)
    in_chs = [16, w_base, w_base * 2, w_base * 4]
    kiter = iter(jax.random.split(key, 512))

    def conv_w(kh, kw, cin, cout):
        n = kh * kw * cout
        return (jax.random.normal(next(kiter), (kh, kw, cin, cout), jnp.float32)
                * math.sqrt(2.0 / n))

    def bn(c):
        # BatchNorm2d eval-mode with freshly initialized params/stats.
        return fold_bn(jnp.ones(c, jnp.float32), jnp.zeros(c, jnp.float32),
                       jnp.zeros(c, jnp.float32), jnp.ones(c, jnp.float32))

    def make_block(cin, cout, stride):
        def branch():
            s1, b1 = bn(cout)
            s2, b2 = bn(cout)
            return dict(w1=conv_w(3, 3, cin, cout), bn1_s=s1, bn1_b=b1,
                        w2=conv_w(3, 3, cout, cout), bn2_s=s2, bn2_b=b2)
        p = dict(b1=branch(), b2=branch(), stride=stride, equal=(cin == cout))
        if cin != cout:
            s, b = bn(cout)
            p['sc'] = dict(
                w1=conv_w(1, 1, cin, cout // 2).reshape(cin, cout // 2),
                w2=conv_w(1, 1, cin, cout // 2).reshape(cin, cout // 2),
                bn_s=s, bn_b=b)
        return p

    def make_layer(n, cin, cout, stride):
        blocks = []
        for _ in range(n):
            blocks.append(make_block(cin, cout, stride))
            cin, stride = cout, 1
        return blocks

    return dict(
        c_in_w=conv_w(3, 3, 3, in_chs[0]),
        c_in_s=jnp.ones(in_chs[0], jnp.float32),
        c_in_b=0.01 * jax.random.normal(next(kiter), (in_chs[0],), jnp.float32),
        layer1=make_layer(n_units, in_chs[0], in_chs[1], 1),
        layer2=make_layer(n_units, in_chs[1], in_chs[2], 2),
        layer3=make_layer(n_units, in_chs[2], in_chs[3], 2),
        fc_w=(jax.random.normal(next(kiter), (in_chs[3], label), jnp.float32)
              / math.sqrt(in_chs[3])),
        fc_b=jnp.zeros(label, jnp.float32),
    )


def pack_params(params):
    """Fuse branch weights, fold BN scale (and the eval-mode 0.5) into them,
    cast to bf16."""
    bf16 = jnp.bfloat16

    def pack_block(p):
        b1, b2 = p['b1'], p['b2']
        cin, cout = b1['w1'].shape[2], b1['w1'].shape[3]
        # conv1 of both branches: concat along output channels; BN scale folded.
        # K order of the reshape is (tap, cin), matching the im2col layout.
        w1 = jnp.concatenate([b1['w1'], b2['w1']], axis=3).reshape(9 * cin, 2 * cout)
        s1 = jnp.concatenate([b1['bn1_s'], b2['bn1_s']])
        c1 = jnp.concatenate([b1['bn1_b'], b2['bn1_b']])
        w1 = w1 * s1[None, :]
        # conv2 of both branches + eval-mode shake (alpha = 0.5): the two branch
        # outputs are immediately averaged, so stack the (0.5 * BN-scale)-folded
        # branch weights along K; a single matmul then yields 0.5*(y1 + y2).
        w2b1 = b1['w2'].reshape(9, cout, cout) * (0.5 * b1['bn2_s'])[None, None, :]
        w2b2 = b2['w2'].reshape(9, cout, cout) * (0.5 * b2['bn2_s'])[None, None, :]
        w2 = jnp.concatenate([w2b1, w2b2], axis=1).reshape(9 * 2 * cout, cout)
        c2 = 0.5 * (b1['bn2_b'] + b2['bn2_b'])
        out = dict(w1=w1.astype(bf16), bias1=c1,
                   w2=w2.astype(bf16), bias2=c2,
                   stride=p['stride'], equal=p['equal'], cout=cout)
        if not p['equal']:
            sc, half = p['sc'], cout // 2
            wsc = jnp.zeros((2 * cin, cout), jnp.float32)
            wsc = wsc.at[:cin, :half].set(sc['w1'])
            wsc = wsc.at[cin:, half:].set(sc['w2'])
            wsc = wsc * sc['bn_s'][None, :]
            out.update(sc_w=wsc.astype(bf16), sc_bias=sc['bn_b'])
        return out

    blocks = [pack_block(p)
              for layer in (params['layer1'], params['layer2'], params['layer3'])
              for p in layer]
    c_in_w = params['c_in_w'].reshape(27, -1) * params['c_in_s'][None, :]
    return dict(
        c_in_w=c_in_w.astype(bf16), c_in_bias=params['c_in_b'],
        blocks=blocks,
        fc_w=params['fc_w'], fc_b=params['fc_b'])


# ---------------------------------------------------------------------------
# Pure-JAX f32 reference (numerical sanity check of the Pallas path)
# ---------------------------------------------------------------------------
def _conv3x3_ref(x, w, stride, scale, bias):
    y = lax.conv_general_dilated(x, w, (stride, stride), ((1, 1), (1, 1)),
                                 dimension_numbers=('NHWC', 'HWIO', 'NHWC'),
                                 precision=lax.Precision.HIGHEST)
    return y * scale + bias


def _ref_forward(x_nchw, params):
    relu = lambda t: jnp.maximum(t, 0.0)
    x = jnp.transpose(x_nchw, (0, 2, 3, 1)).astype(jnp.float32)
    h = _conv3x3_ref(x, params['c_in_w'], 1, params['c_in_s'], params['c_in_b'])
    for layer in (params['layer1'], params['layer2'], params['layer3']):
        for p in layer:
            stride = p['stride']

            def branch(bp, inp):
                t = relu(inp)
                t = _conv3x3_ref(t, bp['w1'], stride, bp['bn1_s'], bp['bn1_b'])
                t = relu(t)
                t = _conv3x3_ref(t, bp['w2'], 1, bp['bn2_s'], bp['bn2_b'])
                return t

            h1 = branch(p['b1'], h)
            h2 = branch(p['b2'], h)
            if p['equal']:
                h0 = h
            else:
                sc = p['sc']
                half = sc['w1'].shape[1]
                t = relu(h)
                t1 = t[:, ::stride, ::stride, :]
                tp = jnp.pad(t[:, 1:, 1:, :], ((0, 0), (0, 1), (0, 1), (0, 0)))
                t2 = tp[:, ::stride, ::stride, :]
                c1 = (jnp.einsum('nhwc,cd->nhwd', t1, sc['w1'],
                                 precision=lax.Precision.HIGHEST)
                      * sc['bn_s'][:half] + sc['bn_b'][:half])
                c2 = (jnp.einsum('nhwc,cd->nhwd', t2, sc['w2'],
                                 precision=lax.Precision.HIGHEST)
                      * sc['bn_s'][half:] + sc['bn_b'][half:])
                h0 = jnp.concatenate([c1, c2], axis=-1)
            h = 0.5 * h1 + 0.5 * h2 + h0
    h = relu(h)
    pooled = jnp.mean(h, axis=(1, 2))
    return jnp.dot(pooled, params['fc_w'],
                   precision=lax.Precision.HIGHEST) + params['fc_b']


if __name__ == "__main__":
    key = jax.random.PRNGKey(0)
    pkey, xkey = jax.random.split(key)
    # depth=8 -> 1 ShakeBlock per stage; w_base=16; 10 classes.
    params = init_params(pkey, depth=8, w_base=16, label=10)
    packed = pack_params(params)
    # CIFAR-style NCHW input; 32x32 spatial required by the final avg_pool2d(h, 8).
    x = jax.random.normal(xkey, (2, 3, 32, 32), jnp.float32)

    fwd = jax.jit(lambda inp: shake_resnet_fwd(inp, packed))
    logits = jax.block_until_ready(fwd(x))

    ref = _ref_forward(x, params)
    err = float(jnp.max(jnp.abs(logits - ref)))
    assert logits.shape == (2, 10), logits.shape
    assert bool(jnp.all(jnp.isfinite(logits)))
    # bf16 MXU operands (f32 accumulation) vs an f32-HIGHEST reference.
    assert err < 8e-2, f"max abs err vs reference: {err}"
    print("KERNEL_OK")
</pallas_src>

<mosaic_0001>
module attributes {stable_mosaic.version = 11 : i64} {
  func.func @_mm_bias_kernel(%arg0: i32, %arg1: memref<256x27xbf16, #tpu.memory_space<vmem>>, %arg2: memref<27x16xbf16, #tpu.memory_space<vmem>>, %arg3: memref<1x16xf32, #tpu.memory_space<vmem>>, %arg4: memref<256x16xf32, #tpu.memory_space<vmem>>) attributes {dimension_semantics = [#tpu.dimension_semantics<parallel>], iteration_bounds = array<i64: 8>, scalar_prefetch = 0 : i64, scratch_operands = 0 : i64, tpu.core_type = #tpu.core_type<tc>, window_params = [{transform_indices = @transform_0, window_bounds = array<i64: 256, 27>}, {pipeline_mode = #tpu.pipeline_mode<synchronous>, transform_indices = @transform_1, window_bounds = array<i64: 27, 16>}, {pipeline_mode = #tpu.pipeline_mode<synchronous>, transform_indices = @transform_2, window_bounds = array<i64: 1, 16>}, {transform_indices = @transform_3, window_bounds = array<i64: 256, 16>}]} {
    %c0 = arith.constant 0 : index
    %c0_0 = arith.constant 0 : index
    %0 = vector.load %arg1[%c0, %c0_0] : memref<256x27xbf16, #tpu.memory_space<vmem>>, vector<256x27xbf16>
    %c0_1 = arith.constant 0 : index
    %c0_2 = arith.constant 0 : index
    %1 = vector.load %arg2[%c0_1, %c0_2] : memref<27x16xbf16, #tpu.memory_space<vmem>>, vector<27x16xbf16>
    %cst = arith.constant dense<0.000000e+00> : vector<256x16xf32>
    %2 = tpu.matmul %0, %1, %cst {dimension_numbers = #tpu.dot_dimension_numbers<[1], [0], [0], [1], [0, 0, 1, 1], [], []>} : vector<256x27xbf16>, vector<27x16xbf16>, vector<256x16xf32> -> vector<256x16xf32>
    %c0_3 = arith.constant 0 : index
    %c0_4 = arith.constant 0 : index
    %3 = vector.load %arg3[%c0_3, %c0_4] : memref<1x16xf32, #tpu.memory_space<vmem>>, vector<1x16xf32>
    %4 = vector.broadcast %3 : vector<1x16xf32> to vector<256x16xf32>
    %5 = arith.addf %2, %4 : vector<256x16xf32>
    %c0_5 = arith.constant 0 : index
    %c0_6 = arith.constant 0 : index
    %6 = vector.load %arg4[%c0_5, %c0_6] : memref<256x16xf32, #tpu.memory_space<vmem>>, vector<256x16xf32>
    tpu.vector_store %arg4[%c0_5, %c0_6], %5 {strides = array<i32>} : memref<256x16xf32, #tpu.memory_space<vmem>>, vector<256x16xf32>,
    return
  }
  func.func @transform_0(%arg0: i32) -> (i32, i32) {
    %c0_i32 = arith.constant 0 : i32
    %c0_i32_0 = arith.constant 0 : i32
    return %arg0, %c0_i32 : i32, i32
  }
  func.func @transform_1(%arg0: i32) -> (i32, i32) {
    %c0_i32 = arith.constant 0 : i32
    %c0_i32_0 = arith.constant 0 : i32
    %c0_i32_1 = arith.constant 0 : i32
    return %c0_i32, %c0_i32_0 : i32, i32
  }
  func.func @transform_2(%arg0: i32) -> (i32, i32) {
    %c0_i32 = arith.constant 0 : i32
    %c0_i32_0 = arith.constant 0 : i32
    %c0_i32_1 = arith.constant 0 : i32
    return %c0_i32, %c0_i32_0 : i32, i32
  }
  func.func @transform_3(%arg0: i32) -> (i32, i32) {
    %c0_i32 = arith.constant 0 : i32
    %c0_i32_0 = arith.constant 0 : i32
    return %arg0, %c0_i32 : i32, i32
  }
}

module attributes {stable_mosaic.version = 11 : i64} {
  func.func @_mm_bias_kernel(%arg0: i32, %arg1: memref<256x144xbf16, #tpu.memory_space<vmem>>, %arg2: memref<144x32xbf16, #tpu.memory_space<vmem>>, %arg3: memref<1x32xf32, #tpu.memory_space<vmem>>, %arg4: memref<256x32xbf16, #tpu.memory_space<vmem>>) attributes {dimension_semantics = [#tpu.dimension_semantics<parallel>], iteration_bounds = array<i64: 8>, scalar_prefetch = 0 : i64, scratch_operands = 0 : i64, tpu.core_type = #tpu.core_type<tc>, window_params = [{transform_indices = @transform_0, window_bounds = array<i64: 256, 144>}, {pipeline_mode = #tpu.pipeline_mode<synchronous>, transform_indices = @transform_1, window_bounds = array<i64: 144, 32>}, {pipeline_mode = #tpu.pipeline_mode<synchronous>, transform_indices = @transform_2, window_bounds = array<i64: 1, 32>}, {transform_indices = @transform_3, window_bounds = array<i64: 256, 32>}]} {
    %c0 = arith.constant 0 : index
    %c0_0 = arith.constant 0 : index
    %0 = vector.load %arg1[%c0, %c0_0] : memref<256x144xbf16, #tpu.memory_space<vmem>>, vector<256x144xbf16>
    %cst = arith.constant 0.000000e+00 : bf16
    %1 = vector.broadcast %cst : bf16 to vector<256x144xbf16>
    %2 = arith.maximumf %0, %1 : vector<256x144xbf16>
    %c0_1 = arith.constant 0 : index
    %c0_2 = arith.constant 0 : index
    %3 = vector.load %arg2[%c0_1, %c0_2] : memref<144x32xbf16, #tpu.memory_space<vmem>>, vector<144x32xbf16>
    %cst_3 = arith.constant dense<0.000000e+00> : vector<256x32xf32>
    %4 = tpu.matmul %2, %3, %cst_3 {dimension_numbers = #tpu.dot_dimension_numbers<[1], [0], [0], [1], [0, 0, 1, 1], [], []>} : vector<256x144xbf16>, vector<144x32xbf16>, vector<256x32xf32> -> vector<256x32xf32>
    %c0_4 = arith.constant 0 : index
    %c0_5 = arith.constant 0 : index
    %5 = vector.load %arg3[%c0_4, %c0_5] : memref<1x32xf32, #tpu.memory_space<vmem>>, vector<1x32xf32>
    %6 = vector.broadcast %5 : vector<1x32xf32> to vector<256x32xf32>
    %7 = arith.addf %4, %6 : vector<256x32xf32>
    %cst_6 = arith.constant 0.000000e+00 : f32
    %8 = vector.broadcast %cst_6 : f32 to vector<256x32xf32>
    %9 = arith.maximumf %7, %8 : vector<256x32xf32>
    %10 = arith.truncf %9 : vector<256x32xf32> to vector<256x32xbf16>
    %c0_7 = arith.constant 0 : index
    %c0_8 = arith.constant 0 : index
    %11 = vector.load %arg4[%c0_7, %c0_8] : memref<256x32xbf16, #tpu.memory_space<vmem>>, vector<256x32xbf16>
    tpu.vector_store %arg4[%c0_7, %c0_8], %10 {strides = array<i32>} : memref<256x32xbf16, #tpu.memory_space<vmem>>, vector<256x32xbf16>,
    return
  }
  func.func @transform_0(%arg0: i32) -> (i32, i32) {
    %c0_i32 = arith.constant 0 : i32
    %c0_i32_0 = arith.constant 0 : i32
    return %arg0, %c0_i32 : i32, i32
  }
  func.func @transform_1(%arg0: i32) -> (i32, i32) {
    %c0_i32 = arith.constant 0 : i32
    %c0_i32_0 = arith.constant 0 : i32
    %c0_i32_1 = arith.constant 0 : i32
    return %c0_i32, %c0_i32_0 : i32, i32
  }
  func.func @transform_2(%arg0: i32) -> (i32, i32) {
    %c0_i32 = arith.constant 0 : i32
    %c0_i32_0 = arith.constant 0 : i32
    %c0_i32_1 = arith.constant 0 : i32
    return %c0_i32, %c0_i32_0 : i32, i32
  }
  func.func @transform_3(%arg0: i32) -> (i32, i32) {
    %c0_i32 = arith.constant 0 : i32
    %c0_i32_0 = arith.constant 0 : i32
    return %arg0, %c0_i32 : i32, i32
  }
}

module attributes {stable_mosaic.version = 11 : i64} {
  func.func @_mm_bias_res_kernel(%arg0: i32, %arg1: memref<256x288xbf16, #tpu.memory_space<vmem>>, %arg2: memref<288x16xbf16, #tpu.memory_space<vmem>>, %arg3: memref<1x16xf32, #tpu.memory_space<vmem>>, %arg4: memref<256x16xf32, #tpu.memory_space<vmem>>, %arg5: memref<256x16xf32, #tpu.memory_space<vmem>>) attributes {dimension_semantics = [#tpu.dimension_semantics<parallel>], iteration_bounds = array<i64: 8>, scalar_prefetch = 0 : i64, scratch_operands = 0 : i64, tpu.core_type = #tpu.core_type<tc>, window_params = [{transform_indices = @transform_0, window_bounds = array<i64: 256, 288>}, {pipeline_mode = #tpu.pipeline_mode<synchronous>, transform_indices = @transform_1, window_bounds = array<i64: 288, 16>}, {pipeline_mode = #tpu.pipeline_mode<synchronous>, transform_indices = @transform_2, window_bounds = array<i64: 1, 16>}, {transform_indices = @transform_3, window_bounds = array<i64: 256, 16>}, {transform_indices = @transform_4, window_bounds = array<i64: 256, 16>}]} {
    %c0 = arith.constant 0 : index
    %c0_0 = arith.constant 0 : index
    %0 = vector.load %arg1[%c0, %c0_0] : memref<256x288xbf16, #tpu.memory_space<vmem>>, vector<256x288xbf16>
    %c0_1 = arith.constant 0 : index
    %c0_2 = arith.constant 0 : index
    %1 = vector.load %arg2[%c0_1, %c0_2] : memref<288x16xbf16, #tpu.memory_space<vmem>>, vector<288x16xbf16>
    %cst = arith.constant dense<0.000000e+00> : vector<256x16xf32>
    %2 = tpu.matmul %0, %1, %cst {dimension_numbers = #tpu.dot_dimension_numbers<[1], [0], [0], [1], [0, 0, 1, 1], [], []>} : vector<256x288xbf16>, vector<288x16xbf16>, vector<256x16xf32> -> vector<256x16xf32>
    %c0_3 = arith.constant 0 : index
    %c0_4 = arith.constant 0 : index
    %3 = vector.load %arg3[%c0_3, %c0_4] : memref<1x16xf32, #tpu.memory_space<vmem>>, vector<1x16xf32>
    %4 = vector.broadcast %3 : vector<1x16xf32> to vector<256x16xf32>
    %5 = arith.addf %2, %4 : vector<256x16xf32>
    %c0_5 = arith.constant 0 : index
    %c0_6 = arith.constant 0 : index
    %6 = vector.load %arg4[%c0_5, %c0_6] : memref<256x16xf32, #tpu.memory_space<vmem>>, vector<256x16xf32>
    %7 = arith.addf %5, %6 : vector<256x16xf32>
    %c0_7 = arith.constant 0 : index
    %c0_8 = arith.constant 0 : index
    %8 = vector.load %arg5[%c0_7, %c0_8] : memref<256x16xf32, #tpu.memory_space<vmem>>, vector<256x16xf32>
    tpu.vector_store %arg5[%c0_7, %c0_8], %7 {strides = array<i32>} : memref<256x16xf32, #tpu.memory_space<vmem>>, vector<256x16xf32>,
    return
  }
  func.func @transform_0(%arg0: i32) -> (i32, i32) {
    %c0_i32 = arith.constant 0 : i32
    %c0_i32_0 = arith.constant 0 : i32
    return %arg0, %c0_i32 : i32, i32
  }
  func.func @transform_1(%arg0: i32) -> (i32, i32) {
    %c0_i32 = arith.constant 0 : i32
    %c0_i32_0 = arith.constant 0 : i32
    %c0_i32_1 = arith.constant 0 : i32
    return %c0_i32, %c0_i32_0 : i32, i32
  }
  func.func @transform_2(%arg0: i32) -> (i32, i32) {
    %c0_i32 = arith.constant 0 : i32
    %c0_i32_0 = arith.constant 0 : i32
    %c0_i32_1 = arith.constant 0 : i32
    return %c0_i32, %c0_i32_0 : i32, i32
  }
  func.func @transform_3(%arg0: i32) -> (i32, i32) {
    %c0_i32 = arith.constant 0 : i32
    %c0_i32_0 = arith.constant 0 : i32
    return %arg0, %c0_i32 : i32, i32
  }
  func.func @transform_4(%arg0: i32) -> (i32, i32) {
    %c0_i32 = arith.constant 0 : i32
    %c0_i32_0 = arith.constant 0 : i32
    return %arg0, %c0_i32 : i32, i32
  }
}

module attributes {stable_mosaic.version = 11 : i64} {
  func.func @_mm_bias_kernel(%arg0: i32, %arg1: memref<256x32xbf16, #tpu.memory_space<vmem>>, %arg2: memref<32x32xbf16, #tpu.memory_space<vmem>>, %arg3: memref<1x32xf32, #tpu.memory_space<vmem>>, %arg4: memref<256x32xf32, #tpu.memory_space<vmem>>) attributes {dimension_semantics = [#tpu.dimension_semantics<parallel>], iteration_bounds = array<i64: 2>, scalar_prefetch = 0 : i64, scratch_operands = 0 : i64, tpu.core_type = #tpu.core_type<tc>, window_params = [{transform_indices = @transform_0, window_bounds = array<i64: 256, 32>}, {pipeline_mode = #tpu.pipeline_mode<synchronous>, transform_indices = @transform_1, window_bounds = array<i64: 32, 32>}, {pipeline_mode = #tpu.pipeline_mode<synchronous>, transform_indices = @transform_2, window_bounds = array<i64: 1, 32>}, {transform_indices = @transform_3, window_bounds = array<i64: 256, 32>}]} {
    %c0 = arith.constant 0 : index
    %c0_0 = arith.constant 0 : index
    %0 = vector.load %arg1[%c0, %c0_0] : memref<256x32xbf16, #tpu.memory_space<vmem>>, vector<256x32xbf16>
    %cst = arith.constant 0.000000e+00 : bf16
    %1 = vector.broadcast %cst : bf16 to vector<256x32xbf16>
    %2 = arith.maximumf %0, %1 : vector<256x32xbf16>
    %c0_1 = arith.constant 0 : index
    %c0_2 = arith.constant 0 : index
    %3 = vector.load %arg2[%c0_1, %c0_2] : memref<32x32xbf16, #tpu.memory_space<vmem>>, vector<32x32xbf16>
    %cst_3 = arith.constant dense<0.000000e+00> : vector<256x32xf32>
    %4 = tpu.matmul %2, %3, %cst_3 {dimension_numbers = #tpu.dot_dimension_numbers<[1], [0], [0], [1], [0, 0, 1, 1], [], []>} : vector<256x32xbf16>, vector<32x32xbf16>, vector<256x32xf32> -> vector<256x32xf32>
    %c0_4 = arith.constant 0 : index
    %c0_5 = arith.constant 0 : index
    %5 = vector.load %arg3[%c0_4, %c0_5] : memref<1x32xf32, #tpu.memory_space<vmem>>, vector<1x32xf32>
    %6 = vector.broadcast %5 : vector<1x32xf32> to vector<256x32xf32>
    %7 = arith.addf %4, %6 : vector<256x32xf32>
    %c0_6 = arith.constant 0 : index
    %c0_7 = arith.constant 0 : index
    %8 = vector.load %arg4[%c0_6, %c0_7] : memref<256x32xf32, #tpu.memory_space<vmem>>, vector<256x32xf32>
    tpu.vector_store %arg4[%c0_6, %c0_7], %7 {strides = array<i32>} : memref<256x32xf32, #tpu.memory_space<vmem>>, vector<256x32xf32>,
    return
  }
  func.func @transform_0(%arg0: i32) -> (i32, i32) {
    %c0_i32 = arith.constant 0 : i32
    %c0_i32_0 = arith.constant 0 : i32
    return %arg0, %c0_i32 : i32, i32
  }
  func.func @transform_1(%arg0: i32) -> (i32, i32) {
    %c0_i32 = arith.constant 0 : i32
    %c0_i32_0 = arith.constant 0 : i32
    %c0_i32_1 = arith.constant 0 : i32
    return %c0_i32, %c0_i32_0 : i32, i32
  }
  func.func @transform_2(%arg0: i32) -> (i32, i32) {
    %c0_i32 = arith.constant 0 : i32
    %c0_i32_0 = arith.constant 0 : i32
    %c0_i32_1 = arith.constant 0 : i32
    return %c0_i32, %c0_i32_0 : i32, i32
  }
  func.func @transform_3(%arg0: i32) -> (i32, i32) {
    %c0_i32 = arith.constant 0 : i32
    %c0_i32_0 = arith.constant 0 : i32
    return %arg0, %c0_i32 : i32, i32
  }
}

module attributes {stable_mosaic.version = 11 : i64} {
  func.func @_mm_bias_kernel(%arg0: i32, %arg1: memref<256x144xbf16, #tpu.memory_space<vmem>>, %arg2: memref<144x64xbf16, #tpu.memory_space<vmem>>, %arg3: memref<1x64xf32, #tpu.memory_space<vmem>>, %arg4: memref<256x64xbf16, #tpu.memory_space<vmem>>) attributes {dimension_semantics = [#tpu.dimension_semantics<parallel>], iteration_bounds = array<i64: 2>, scalar_prefetch = 0 : i64, scratch_operands = 0 : i64, tpu.core_type = #tpu.core_type<tc>, window_params = [{transform_indices = @transform_0, window_bounds = array<i64: 256, 144>}, {pipeline_mode = #tpu.pipeline_mode<synchronous>, transform_indices = @transform_1, window_bounds = array<i64: 144, 64>}, {pipeline_mode = #tpu.pipeline_mode<synchronous>, transform_indices = @transform_2, window_bounds = array<i64: 1, 64>}, {transform_indices = @transform_3, window_bounds = array<i64: 256, 64>}]} {
    %c0 = arith.constant 0 : index
    %c0_0 = arith.constant 0 : index
    %0 = vector.load %arg1[%c0, %c0_0] : memref<256x144xbf16, #tpu.memory_space<vmem>>, vector<256x144xbf16>
    %cst = arith.constant 0.000000e+00 : bf16
    %1 = vector.broadcast %cst : bf16 to vector<256x144xbf16>
    %2 = arith.maximumf %0, %1 : vector<256x144xbf16>
    %c0_1 = arith.constant 0 : index
    %c0_2 = arith.constant 0 : index
    %3 = vector.load %arg2[%c0_1, %c0_2] : memref<144x64xbf16, #tpu.memory_space<vmem>>, vector<144x64xbf16>
    %cst_3 = arith.constant dense<0.000000e+00> : vector<256x64xf32>
    %4 = tpu.matmul %2, %3, %cst_3 {dimension_numbers = #tpu.dot_dimension_numbers<[1], [0], [0], [1], [0, 0, 1, 1], [], []>} : vector<256x144xbf16>, vector<144x64xbf16>, vector<256x64xf32> -> vector<256x64xf32>
    %c0_4 = arith.constant 0 : index
    %c0_5 = arith.constant 0 : index
    %5 = vector.load %arg3[%c0_4, %c0_5] : memref<1x64xf32, #tpu.memory_space<vmem>>, vector<1x64xf32>
    %6 = vector.broadcast %5 : vector<1x64xf32> to vector<256x64xf32>
    %7 = arith.addf %4, %6 : vector<256x64xf32>
    %cst_6 = arith.constant 0.000000e+00 : f32
    %8 = vector.broadcast %cst_6 : f32 to vector<256x64xf32>
    %9 = arith.maximumf %7, %8 : vector<256x64xf32>
    %10 = arith.truncf %9 : vector<256x64xf32> to vector<256x64xbf16>
    %c0_7 = arith.constant 0 : index
    %c0_8 = arith.constant 0 : index
    %11 = vector.load %arg4[%c0_7, %c0_8] : memref<256x64xbf16, #tpu.memory_space<vmem>>, vector<256x64xbf16>
    tpu.vector_store %arg4[%c0_7, %c0_8], %10 {strides = array<i32>} : memref<256x64xbf16, #tpu.memory_space<vmem>>, vector<256x64xbf16>,
    return
  }
  func.func @transform_0(%arg0: i32) -> (i32, i32) {
    %c0_i32 = arith.constant 0 : i32
    %c0_i32_0 = arith.constant 0 : i32
    return %arg0, %c0_i32 : i32, i32
  }
  func.func @transform_1(%arg0: i32) -> (i32, i32) {
    %c0_i32 = arith.constant 0 : i32
    %c0_i32_0 = arith.constant 0 : i32
    %c0_i32_1 = arith.constant 0 : i32
    return %c0_i32, %c0_i32_0 : i32, i32
  }
  func.func @transform_2(%arg0: i32) -> (i32, i32) {
    %c0_i32 = arith.constant 0 : i32
    %c0_i32_0 = arith.constant 0 : i32
    %c0_i32_1 = arith.constant 0 : i32
    return %c0_i32, %c0_i32_0 : i32, i32
  }
  func.func @transform_3(%arg0: i32) -> (i32, i32) {
    %c0_i32 = arith.constant 0 : i32
    %c0_i32_0 = arith.constant 0 : i32
    return %arg0, %c0_i32 : i32, i32
  }
}

module attributes {stable_mosaic.version = 11 : i64} {
  func.func @_mm_bias_res_kernel(%arg0: i32, %arg1: memref<256x576xbf16, #tpu.memory_space<vmem>>, %arg2: memref<576x32xbf16, #tpu.memory_space<vmem>>, %arg3: memref<1x32xf32, #tpu.memory_space<vmem>>, %arg4: memref<256x32xf32, #tpu.memory_space<vmem>>, %arg5: memref<256x32xf32, #tpu.memory_space<vmem>>) attributes {dimension_semantics = [#tpu.dimension_semantics<parallel>], iteration_bounds = array<i64: 2>, scalar_prefetch = 0 : i64, scratch_operands = 0 : i64, tpu.core_type = #tpu.core_type<tc>, window_params = [{transform_indices = @transform_0, window_bounds = array<i64: 256, 576>}, {pipeline_mode = #tpu.pipeline_mode<synchronous>, transform_indices = @transform_1, window_bounds = array<i64: 576, 32>}, {pipeline_mode = #tpu.pipeline_mode<synchronous>, transform_indices = @transform_2, window_bounds = array<i64: 1, 32>}, {transform_indices = @transform_3, window_bounds = array<i64: 256, 32>}, {transform_indices = @transform_4, window_bounds = array<i64: 256, 32>}]} {
    %c0 = arith.constant 0 : index
    %c0_0 = arith.constant 0 : index
    %0 = vector.load %arg1[%c0, %c0_0] : memref<256x576xbf16, #tpu.memory_space<vmem>>, vector<256x576xbf16>
    %c0_1 = arith.constant 0 : index
    %c0_2 = arith.constant 0 : index
    %1 = vector.load %arg2[%c0_1, %c0_2] : memref<576x32xbf16, #tpu.memory_space<vmem>>, vector<576x32xbf16>
    %cst = arith.constant dense<0.000000e+00> : vector<256x32xf32>
    %2 = tpu.matmul %0, %1, %cst {dimension_numbers = #tpu.dot_dimension_numbers<[1], [0], [0], [1], [0, 0, 1, 1], [], []>} : vector<256x576xbf16>, vector<576x32xbf16>, vector<256x32xf32> -> vector<256x32xf32>
    %c0_3 = arith.constant 0 : index
    %c0_4 = arith.constant 0 : index
    %3 = vector.load %arg3[%c0_3, %c0_4] : memref<1x32xf32, #tpu.memory_space<vmem>>, vector<1x32xf32>
    %4 = vector.broadcast %3 : vector<1x32xf32> to vector<256x32xf32>
    %5 = arith.addf %2, %4 : vector<256x32xf32>
    %c0_5 = arith.constant 0 : index
    %c0_6 = arith.constant 0 : index
    %6 = vector.load %arg4[%c0_5, %c0_6] : memref<256x32xf32, #tpu.memory_space<vmem>>, vector<256x32xf32>
    %7 = arith.addf %5, %6 : vector<256x32xf32>
    %c0_7 = arith.constant 0 : index
    %c0_8 = arith.constant 0 : index
    %8 = vector.load %arg5[%c0_7, %c0_8] : memref<256x32xf32, #tpu.memory_space<vmem>>, vector<256x32xf32>
    tpu.vector_store %arg5[%c0_7, %c0_8], %7 {strides = array<i32>} : memref<256x32xf32, #tpu.memory_space<vmem>>, vector<256x32xf32>,
    return
  }
  func.func @transform_0(%arg0: i32) -> (i32, i32) {
    %c0_i32 = arith.constant 0 : i32
    %c0_i32_0 = arith.constant 0 : i32
    return %arg0, %c0_i32 : i32, i32
  }
  func.func @transform_1(%arg0: i32) -> (i32, i32) {
    %c0_i32 = arith.constant 0 : i32
    %c0_i32_0 = arith.constant 0 : i32
    %c0_i32_1 = arith.constant 0 : i32
    return %c0_i32, %c0_i32_0 : i32, i32
  }
  func.func @transform_2(%arg0: i32) -> (i32, i32) {
    %c0_i32 = arith.constant 0 : i32
    %c0_i32_0 = arith.constant 0 : i32
    %c0_i32_1 = arith.constant 0 : i32
    return %c0_i32, %c0_i32_0 : i32, i32
  }
  func.func @transform_3(%arg0: i32) -> (i32, i32) {
    %c0_i32 = arith.constant 0 : i32
    %c0_i32_0 = arith.constant 0 : i32
    return %arg0, %c0_i32 : i32, i32
  }
  func.func @transform_4(%arg0: i32) -> (i32, i32) {
    %c0_i32 = arith.constant 0 : i32
    %c0_i32_0 = arith.constant 0 : i32
    return %arg0, %c0_i32 : i32, i32
  }
}

module attributes {stable_mosaic.version = 11 : i64} {
  func.func @_mm_bias_kernel(%arg0: i32, %arg1: memref<128x64xbf16, #tpu.memory_space<vmem>>, %arg2: memref<64x64xbf16, #tpu.memory_space<vmem>>, %arg3: memref<1x64xf32, #tpu.memory_space<vmem>>, %arg4: memref<128x64xf32, #tpu.memory_space<vmem>>) attributes {dimension_semantics = [#tpu.dimension_semantics<parallel>], iteration_bounds = array<i64: 1>, scalar_prefetch = 0 : i64, scratch_operands = 0 : i64, tpu.core_type = #tpu.core_type<tc>, window_params = [{transform_indices = @transform_0, window_bounds = array<i64: 128, 64>}, {pipeline_mode = #tpu.pipeline_mode<synchronous>, transform_indices = @transform_1, window_bounds = array<i64: 64, 64>}, {pipeline_mode = #tpu.pipeline_mode<synchronous>, transform_indices = @transform_2, window_bounds = array<i64: 1, 64>}, {transform_indices = @transform_3, window_bounds = array<i64: 128, 64>}]} {
    %c0 = arith.constant 0 : index
    %c0_0 = arith.constant 0 : index
    %0 = vector.load %arg1[%c0, %c0_0] : memref<128x64xbf16, #tpu.memory_space<vmem>>, vector<128x64xbf16>
    %cst = arith.constant 0.000000e+00 : bf16
    %1 = vector.broadcast %cst : bf16 to vector<128x64xbf16>
    %2 = arith.maximumf %0, %1 : vector<128x64xbf16>
    %c0_1 = arith.constant 0 : index
    %c0_2 = arith.constant 0 : index
    %3 = vector.load %arg2[%c0_1, %c0_2] : memref<64x64xbf16, #tpu.memory_space<vmem>>, vector<64x64xbf16>
    %cst_3 = arith.constant dense<0.000000e+00> : vector<128x64xf32>
    %4 = tpu.matmul %2, %3, %cst_3 {dimension_numbers = #tpu.dot_dimension_numbers<[1], [0], [0], [1], [0, 0, 1, 1], [], []>} : vector<128x64xbf16>, vector<64x64xbf16>, vector<128x64xf32> -> vector<128x64xf32>
    %c0_4 = arith.constant 0 : index
    %c0_5 = arith.constant 0 : index
    %5 = vector.load %arg3[%c0_4, %c0_5] : memref<1x64xf32, #tpu.memory_space<vmem>>, vector<1x64xf32>
    %6 = vector.broadcast %5 : vector<1x64xf32> to vector<128x64xf32>
    %7 = arith.addf %4, %6 : vector<128x64xf32>
    %c0_6 = arith.constant 0 : index
    %c0_7 = arith.constant 0 : index
    %8 = vector.load %arg4[%c0_6, %c0_7] : memref<128x64xf32, #tpu.memory_space<vmem>>, vector<128x64xf32>
    tpu.vector_store %arg4[%c0_6, %c0_7], %7 {strides = array<i32>} : memref<128x64xf32, #tpu.memory_space<vmem>>, vector<128x64xf32>,
    return
  }
  func.func @transform_0(%arg0: i32) -> (i32, i32) {
    %c0_i32 = arith.constant 0 : i32
    %c0_i32_0 = arith.constant 0 : i32
    return %arg0, %c0_i32 : i32, i32
  }
  func.func @transform_1(%arg0: i32) -> (i32, i32) {
    %c0_i32 = arith.constant 0 : i32
    %c0_i32_0 = arith.constant 0 : i32
    %c0_i32_1 = arith.constant 0 : i32
    return %c0_i32, %c0_i32_0 : i32, i32
  }
  func.func @transform_2(%arg0: i32) -> (i32, i32) {
    %c0_i32 = arith.constant 0 : i32
    %c0_i32_0 = arith.constant 0 : i32
    %c0_i32_1 = arith.constant 0 : i32
    return %c0_i32, %c0_i32_0 : i32, i32
  }
  func.func @transform_3(%arg0: i32) -> (i32, i32) {
    %c0_i32 = arith.constant 0 : i32
    %c0_i32_0 = arith.constant 0 : i32
    return %arg0, %c0_i32 : i32, i32
  }
}

module attributes {stable_mosaic.version = 11 : i64} {
  func.func @_mm_bias_kernel(%arg0: i32, %arg1: memref<128x288xbf16, #tpu.memory_space<vmem>>, %arg2: memref<288x128xbf16, #tpu.memory_space<vmem>>, %arg3: memref<1x128xf32, #tpu.memory_space<vmem>>, %arg4: memref<128x128xbf16, #tpu.memory_space<vmem>>) attributes {dimension_semantics = [#tpu.dimension_semantics<parallel>], iteration_bounds = array<i64: 1>, scalar_prefetch = 0 : i64, scratch_operands = 0 : i64, tpu.core_type = #tpu.core_type<tc>, window_params = [{transform_indices = @transform_0, window_bounds = array<i64: 128, 288>}, {pipeline_mode = #tpu.pipeline_mode<synchronous>, transform_indices = @transform_1, window_bounds = array<i64: 288, 128>}, {pipeline_mode = #tpu.pipeline_mode<synchronous>, transform_indices = @transform_2, window_bounds = array<i64: 1, 128>}, {transform_indices = @transform_3, window_bounds = array<i64: 128, 128>}]} {
    %c0 = arith.constant 0 : index
    %c0_0 = arith.constant 0 : index
    %0 = vector.load %arg1[%c0, %c0_0] : memref<128x288xbf16, #tpu.memory_space<vmem>>, vector<128x288xbf16>
    %cst = arith.constant 0.000000e+00 : bf16
    %1 = vector.broadcast %cst : bf16 to vector<128x288xbf16>
    %2 = arith.maximumf %0, %1 : vector<128x288xbf16>
    %c0_1 = arith.constant 0 : index
    %c0_2 = arith.constant 0 : index
    %3 = vector.load %arg2[%c0_1, %c0_2] : memref<288x128xbf16, #tpu.memory_space<vmem>>, vector<288x128xbf16>
    %cst_3 = arith.constant dense<0.000000e+00> : vector<128x128xf32>
    %4 = tpu.matmul %2, %3, %cst_3 {dimension_numbers = #tpu.dot_dimension_numbers<[1], [0], [0], [1], [0, 0, 1, 1], [], []>} : vector<128x288xbf16>, vector<288x128xbf16>, vector<128x128xf32> -> vector<128x128xf32>
    %c0_4 = arith.constant 0 : index
    %c0_5 = arith.constant 0 : index
    %5 = vector.load %arg3[%c0_4, %c0_5] : memref<1x128xf32, #tpu.memory_space<vmem>>, vector<1x128xf32>
    %6 = vector.broadcast %5 : vector<1x128xf32> to vector<128x128xf32>
    %7 = arith.addf %4, %6 : vector<128x128xf32>
    %cst_6 = arith.constant 0.000000e+00 : f32
    %8 = vector.broadcast %cst_6 : f32 to vector<128x128xf32>
    %9 = arith.maximumf %7, %8 : vector<128x128xf32>
    %10 = arith.truncf %9 : vector<128x128xf32> to vector<128x128xbf16>
    %c0_7 = arith.constant 0 : index
    %c0_8 = arith.constant 0 : index
    %11 = vector.load %arg4[%c0_7, %c0_8] : memref<128x128xbf16, #tpu.memory_space<vmem>>, vector<128x128xbf16>
    tpu.vector_store %arg4[%c0_7, %c0_8], %10 {strides = array<i32>} : memref<128x128xbf16, #tpu.memory_space<vmem>>, vector<128x128xbf16>,
    return
  }
  func.func @transform_0(%arg0: i32) -> (i32, i32) {
    %c0_i32 = arith.constant 0 : i32
    %c0_i32_0 = arith.constant 0 : i32
    return %arg0, %c0_i32 : i32, i32
  }
  func.func @transform_1(%arg0: i32) -> (i32, i32) {
    %c0_i32 = arith.constant 0 : i32
    %c0_i32_0 = arith.constant 0 : i32
    %c0_i32_1 = arith.constant 0 : i32
    return %c0_i32, %c0_i32_0 : i32, i32
  }
  func.func @transform_2(%arg0: i32) -> (i32, i32) {
    %c0_i32 = arith.constant 0 : i32
    %c0_i32_0 = arith.constant 0 : i32
    %c0_i32_1 = arith.constant 0 : i32
    return %c0_i32, %c0_i32_0 : i32, i32
  }
  func.func @transform_3(%arg0: i32) -> (i32, i32) {
    %c0_i32 = arith.constant 0 : i32
    %c0_i32_0 = arith.constant 0 : i32
    return %arg0, %c0_i32 : i32, i32
  }
}

module attributes {stable_mosaic.version = 11 : i64} {
  func.func @_mm_bias_res_kernel(%arg0: i32, %arg1: memref<128x1152xbf16, #tpu.memory_space<vmem>>, %arg2: memref<1152x64xbf16, #tpu.memory_space<vmem>>, %arg3: memref<1x64xf32, #tpu.memory_space<vmem>>, %arg4: memref<128x64xf32, #tpu.memory_space<vmem>>, %arg5: memref<128x64xf32, #tpu.memory_space<vmem>>) attributes {dimension_semantics = [#tpu.dimension_semantics<parallel>], iteration_bounds = array<i64: 1>, scalar_prefetch = 0 : i64, scratch_operands = 0 : i64, tpu.core_type = #tpu.core_type<tc>, window_params = [{transform_indices = @transform_0, window_bounds = array<i64: 128, 1152>}, {pipeline_mode = #tpu.pipeline_mode<synchronous>, transform_indices = @transform_1, window_bounds = array<i64: 1152, 64>}, {pipeline_mode = #tpu.pipeline_mode<synchronous>, transform_indices = @transform_2, window_bounds = array<i64: 1, 64>}, {transform_indices = @transform_3, window_bounds = array<i64: 128, 64>}, {transform_indices = @transform_4, window_bounds = array<i64: 128, 64>}]} {
    %c0 = arith.constant 0 : index
    %c0_0 = arith.constant 0 : index
    %0 = vector.load %arg1[%c0, %c0_0] : memref<128x1152xbf16, #tpu.memory_space<vmem>>, vector<128x1152xbf16>
    %c0_1 = arith.constant 0 : index
    %c0_2 = arith.constant 0 : index
    %1 = vector.load %arg2[%c0_1, %c0_2] : memref<1152x64xbf16, #tpu.memory_space<vmem>>, vector<1152x64xbf16>
    %cst = arith.constant dense<0.000000e+00> : vector<128x64xf32>
    %2 = tpu.matmul %0, %1, %cst {dimension_numbers = #tpu.dot_dimension_numbers<[1], [0], [0], [1], [0, 0, 1, 1], [], []>} : vector<128x1152xbf16>, vector<1152x64xbf16>, vector<128x64xf32> -> vector<128x64xf32>
    %c0_3 = arith.constant 0 : index
    %c0_4 = arith.constant 0 : index
    %3 = vector.load %arg3[%c0_3, %c0_4] : memref<1x64xf32, #tpu.memory_space<vmem>>, vector<1x64xf32>
    %4 = vector.broadcast %3 : vector<1x64xf32> to vector<128x64xf32>
    %5 = arith.addf %2, %4 : vector<128x64xf32>
    %c0_5 = arith.constant 0 : index
    %c0_6 = arith.constant 0 : index
    %6 = vector.load %arg4[%c0_5, %c0_6] : memref<128x64xf32, #tpu.memory_space<vmem>>, vector<128x64xf32>
    %7 = arith.addf %5, %6 : vector<128x64xf32>
    %c0_7 = arith.constant 0 : index
    %c0_8 = arith.constant 0 : index
    %8 = vector.load %arg5[%c0_7, %c0_8] : memref<128x64xf32, #tpu.memory_space<vmem>>, vector<128x64xf32>
    tpu.vector_store %arg5[%c0_7, %c0_8], %7 {strides = array<i32>} : memref<128x64xf32, #tpu.memory_space<vmem>>, vector<128x64xf32>,
    return
  }
  func.func @transform_0(%arg0: i32) -> (i32, i32) {
    %c0_i32 = arith.constant 0 : i32
    %c0_i32_0 = arith.constant 0 : i32
    return %arg0, %c0_i32 : i32, i32
  }
  func.func @transform_1(%arg0: i32) -> (i32, i32) {
    %c0_i32 = arith.constant 0 : i32
    %c0_i32_0 = arith.constant 0 : i32
    %c0_i32_1 = arith.constant 0 : i32
    return %c0_i32, %c0_i32_0 : i32, i32
  }
  func.func @transform_2(%arg0: i32) -> (i32, i32) {
    %c0_i32 = arith.constant 0 : i32
    %c0_i32_0 = arith.constant 0 : i32
    %c0_i32_1 = arith.constant 0 : i32
    return %c0_i32, %c0_i32_0 : i32, i32
  }
  func.func @transform_3(%arg0: i32) -> (i32, i32) {
    %c0_i32 = arith.constant 0 : i32
    %c0_i32_0 = arith.constant 0 : i32
    return %arg0, %c0_i32 : i32, i32
  }
  func.func @transform_4(%arg0: i32) -> (i32, i32) {
    %c0_i32 = arith.constant 0 : i32
    %c0_i32_0 = arith.constant 0 : i32
    return %arg0, %c0_i32 : i32, i32
  }
}

</mosaic_0001>

<bundles_post_ra>
// kernel: _lambda_.9
= control target key start
LH: loop header
LB: loop body
LE: loop exit
PB: predicated region body
PF: predicated region fallthrough
CT: control target
= control target key end

     0   :  { %s775_s12 = smov 0   ;;  %s939_s0 = inlined_call_operand.vmem [shape: bf16[2048,27], index: 0, kind: input, shape index: {}]   ;;  %s940_s1 = inlined_call_operand.vmem [shape: bf16[27,16], index: 1, kind: input, shape index: {}]   ;;  %s941_s2 = inlined_call_operand.vmem [shape: f32[1,16], index: 2, kind: input, shape index: {}]   ;;  %s942_s3 = inlined_call_operand.vmem [shape: f32[2048,16], index: 3, kind: output, shape index: {}]  }
   0x1 LB: > { %s615_s13 = sadd.s32 4294967295, %s752_s12   ;;  %p619_p0 = scmp.ge.s32.totalorder %s752_s12, 1  ;;  %s752_s12 = sphi %s775_s12, %s13_s12  }
   0x2   : > { %p138_p1 = scmp.lt.s32.totalorder %s752_s12, 9 }
   0x4   : > { %p139_p2 = pnand %p619_p0, %p138_p1 }
   0x5   : > { %s620_s16 = sshll.u32 (!%p139_p2), %s615_s13, 5 }
   0x6   : > { %142 = sbr.rel (%p139_p2) target bundleno = 250 (0xfa), region = 32  ;;  %p163_p3 = scmp.lt.s32.totalorder (!%p139_p2), %s620_s16, 255 }
   0xb   : > { %v728_v0 = vld [vmem:[%s940_s1 + $0x8] sm:$0x3f]   ;;  %vm358_vm0 = vcmask 1044480   ;;  %vm359_vm1 = vcmask 1045504   ;;  %v754_v1 = vmov 65535   ;;  %v729_v5 = vld [vmem:[%s940_s1] sm:$0xff]  }
   0xc   : > { %v360_v2 = vsel %vm358_vm0, 4294967295, %v754_v1  ;;  %s944_s16 = smov (!%p163_p3, %s620_s16), 255  ;;  %vm309_vm2 = vcmask 220160   ;;  %v833_v22 = vld [vmem:[%s941_s2] ss:$0 sm:$0xff]  ;;  %vm526_vm3 = vcmask 130048  }
   0xd   : > { %v361_v3 = vsel %vm359_vm1, %v360_v2, 0  ;;  %s621_s19 = sshll.u32 %s944_s16, 2  ;;  %s623_s23 = sshll.u32 %s944_s16, 3 }
   0xe   : > { %v363_v4 = vand.u32 %v728_v0, %v361_v3  ;;  %s795_s22 = scalar_lea.vmem %s939_s0, %s621_s19  ;;  %s838_s28 = scalar_lea.vmem %s942_s3, %s623_s23 }
   0xf   : > { %v730_v6 = vld [vmem:[%s795_s22] sm:$0xff]   ;;  %v732_v8 = vld [vmem:[%s795_s22 + $0x8] sm:$0xff]   ;;  %v734_v10 = vld [vmem:[%s795_s22 + $0x10] sm:$0xff]  }
  0x10   : > { %679 = vmatprep.subr.bf16.mxu0 %v363_v4  ;;  %715 = vmatprep.subr.bf16.mxu1 %v363_v4  ;;  %v731_v7 = vld [vmem:[%s795_s22 + $0x40] sm:$0xff]   ;;  %v733_v9 = vld [vmem:[%s795_s22 + $0x48] sm:$0xff]   ;;  %v735_v11 = vld [vmem:[%s795_s22 + $0x50] sm:$0xff]  }
  0x11   : > { %680 = vmatpush3.bf16.msra.mxu0 %v363_v4  ;;  %717 = vmatpush3.bf16.msra.mxu1 %v363_v4  ;;  %v736_v12 = vld [vmem:[%s795_s22 + $0x18] sm:$0xff]   ;;  %v738_v14 = vld [vmem:[%s795_s22 + $0x20] sm:$0xff]   ;;  %v740_v16 = vld [vmem:[%s795_s22 + $0x28] sm:$0xff]  }
  0x12   : > { %681 = vmatprep.subr.bf16.mxu0 %v729_v5  ;;  %716 = vmatprep.subr.bf16.mxu1 %v729_v5  ;;  %v737_v13 = vld [vmem:[%s795_s22 + $0x58] sm:$0xff]   ;;  %v739_v15 = vld [vmem:[%s795_s22 + $0x60] sm:$0xff]   ;;  %v741_v17 = vld [vmem:[%s795_s22 + $0x68] sm:$0xff]  }
  0x13   : > { %683 = vmatprep.mubr.msk.bf16.mxu0 %vm309_vm2, %v730_v6  ;;  %699 = vmatprep.mubr.msk.bf16.mxu1 %vm309_vm2, %v731_v7  ;;  %v742_v18 = vld [vmem:[%s795_s22 + $0x30] sm:$0xff]   ;;  %v744_v20 = vld [vmem:[%s795_s22 + $0x38] sm:$0xff]  }
  0x14   : > { %v743_v19 = vld [vmem:[%s795_s22 + $0x70] sm:$0xff]   ;;  %v745_v21 = vld [vmem:[%s795_s22 + $0x78] sm:$0xff]  }
  0x15   : > { %682 = vmatpush3.bf16.msra.mxu0 %v729_v5  ;;  %718 = vmatpush3.bf16.msra.mxu1 %v729_v5 }
  0x18   : > { %684 = vmatmul.mubr.msk.bf16.vlgmr.msra.gmra.mxu0 %vm309_vm2, %v732_v8  ;;  %700 = vmatmul.mubr.msk.bf16.vlgmr.msra.gmra.mxu1 %vm309_vm2, %v733_v9 }
  0x19   : > { %687 = vmatprep.mubr.msk.bf16.mxu0 %vm309_vm2, %v734_v10  ;;  %703 = vmatprep.mubr.msk.bf16.mxu1 %vm309_vm2, %v735_v11 }
  0x20   : > { %688 = vmatmul.mubr.msk.bf16.gmra.mxu0 %vm309_vm2, %v736_v12  ;;  %704 = vmatmul.mubr.msk.bf16.gmra.mxu1 %vm309_vm2, %v737_v13 }
  0x21   : > { %691 = vmatprep.mubr.msk.bf16.mxu0 %vm309_vm2, %v738_v14  ;;  %707 = vmatprep.mubr.msk.bf16.mxu1 %vm309_vm2, %v739_v15 }
  0x28   : > { %692 = vmatmul.mubr.msk.bf16.gmra.mxu0 %vm309_vm2, %v740_v16  ;;  %708 = vmatmul.mubr.msk.bf16.gmra.mxu1 %vm309_vm2, %v741_v17 }
  0x29   : > { %695 = vmatprep.mubr.msk.bf16.mxu0 %vm309_vm2, %v742_v18  ;;  %711 = vmatprep.mubr.msk.bf16.mxu1 %vm309_vm2, %v743_v19 }
  0x30   : > { %696 = vmatmul.mubr.msk.bf16.gmra.mxu0 %vm309_vm2, %v744_v20  ;;  %712 = vmatmul.mubr.msk.bf16.gmra.mxu1 %vm309_vm2, %v745_v21 }
  0xd8   : > { %v685_v23 = vpop.f32.mrf.mxu0  ;;  %v701_v24 = vpop.f32.mrf.mxu1 }
  0xd9   : > { %v408_v25 = vadd.f32 %v685_v23, %v833_v22  ;;  %v472_v26 = vadd.f32 %v701_v24, %v833_v22 }
  0xda   : > { %v399_v27 = vpop.f32.mrf.mxu0  ;;  %v463_v28 = vpop.f32.mrf.mxu1 }
  0xdb   : > { %529 = vst.msk [vmem:[%s838_s28 + $0x10] sm:$0xff] %vm526_vm3, %v408_v25  ;;  %545 = vst.msk [vmem:[%s838_s28 + $0x90] sm:$0xff] %vm526_vm3, %v472_v26  ;;  %v400_v29 = vadd.f32 %v833_v22, %v399_v27  ;;  %v464_v30 = vadd.f32 %v833_v22, %v463_v28 }
  0xdc   : > { %v686_v31 = vpop.f32.mrf.mxu0  ;;  %v702_v32 = vpop.f32.mrf.mxu1 }
  0xdd   : > { %527 = vst.msk [vmem:[%s838_s28] sm:$0xff] %vm526_vm3, %v400_v29  ;;  %543 = vst.msk [vmem:[%s838_s28 + $0x80] sm:$0xff] %vm526_vm3, %v464_v30  ;;  %v411_v33 = vadd.f32 %v686_v31, %v833_v22  ;;  %v475_v34 = vadd.f32 %v702_v32, %v833_v22 }
  0xde   : > { %v402_v35 = vpop.f32.mrf.mxu0  ;;  %v466_v36 = vpop.f32.mrf.mxu1 }
  0xdf   : > { %530 = vst.msk [vmem:[%s838_s28 + $0x18] sm:$0xff] %vm526_vm3, %v411_v33  ;;  %546 = vst.msk [vmem:[%s838_s28 + $0x98] sm:$0xff] %vm526_vm3, %v475_v34  ;;  %v403_v37 = vadd.f32 %v833_v22, %v402_v35  ;;  %v467_v38 = vadd.f32 %v833_v22, %v466_v36 }
  0xe0   : > { %v689_v39 = vpop.f32.mrf.mxu0  ;;  %v705_v40 = vpop.f32.mrf.mxu1 }
  0xe1   : > { %528 = vst.msk [vmem:[%s838_s28 + $0x8] sm:$0xff] %vm526_vm3, %v403_v37  ;;  %544 = vst.msk [vmem:[%s838_s28 + $0x88] sm:$0xff] %vm526_vm3, %v467_v38  ;;  %v424_v41 = vadd.f32 %v689_v39, %v833_v22  ;;  %v488_v42 = vadd.f32 %v705_v40, %v833_v22 }
  0xe2   : > { %v415_v43 = vpop.f32.mrf.mxu0  ;;  %v479_v44 = vpop.f32.mrf.mxu1 }
  0xe3   : > { %533 = vst.msk [vmem:[%s838_s28 + $0x30] sm:$0xff] %vm526_vm3, %v424_v41  ;;  %549 = vst.msk [vmem:[%s838_s28 + $0xb0] sm:$0xff] %vm526_vm3, %v488_v42  ;;  %v416_v45 = vadd.f32 %v833_v22, %v415_v43  ;;  %v480_v46 = vadd.f32 %v833_v22, %v479_v44 }
  0xe4   : > { %v690_v47 = vpop.f32.mrf.mxu0  ;;  %v706_v48 = vpop.f32.mrf.mxu1 }
  0xe5   : > { %531 = vst.msk [vmem:[%s838_s28 + $0x20] sm:$0xff] %vm526_vm3, %v416_v45  ;;  %547 = vst.msk [vmem:[%s838_s28 + $0xa0] sm:$0xff] %vm526_vm3, %v480_v46  ;;  %v427_v49 = vadd.f32 %v690_v47, %v833_v22  ;;  %v491_v50 = vadd.f32 %v706_v48, %v833_v22 }
  0xe6   : > { %v418_v51 = vpop.f32.mrf.mxu0  ;;  %v482_v52 = vpop.f32.mrf.mxu1 }
  0xe7   : > { %534 = vst.msk [vmem:[%s838_s28 + $0x38] sm:$0xff] %vm526_vm3, %v427_v49  ;;  %550 = vst.msk [vmem:[%s838_s28 + $0xb8] sm:$0xff] %vm526_vm3, %v491_v50  ;;  %v419_v53 = vadd.f32 %v833_v22, %v418_v51  ;;  %v483_v54 = vadd.f32 %v833_v22, %v482_v52 }
  0xe8   : > { %v693_v55 = vpop.f32.mrf.mxu0  ;;  %v709_v56 = vpop.f32.mrf.mxu1 }
  0xe9   : > { %532 = vst.msk [vmem:[%s838_s28 + $0x28] sm:$0xff] %vm526_vm3, %v419_v53  ;;  %548 = vst.msk [vmem:[%s838_s28 + $0xa8] sm:$0xff] %vm526_vm3, %v483_v54  ;;  %v440_v57 = vadd.f32 %v693_v55, %v833_v22  ;;  %v504_v58 = vadd.f32 %v709_v56, %v833_v22 }
  0xea   : > { %v431_v59 = vpop.f32.mrf.mxu0  ;;  %v495_v60 = vpop.f32.mrf.mxu1 }
  0xeb   : > { %537 = vst.msk [vmem:[%s838_s28 + $0x50] sm:$0xff] %vm526_vm3, %v440_v57  ;;  %553 = vst.msk [vmem:[%s838_s28 + $0xd0] sm:$0xff] %vm526_vm3, %v504_v58  ;;  %v432_v61 = vadd.f32 %v833_v22, %v431_v59  ;;  %v496_v62 = vadd.f32 %v833_v22, %v495_v60 }
  0xec   : > { %v694_v63 = vpop.f32.mrf.mxu0  ;;  %v710_v0 = vpop.f32.mrf.mxu1 }
  0xed   : > { %535 = vst.msk [vmem:[%s838_s28 + $0x40] sm:$0xff] %vm526_vm3, %v432_v61  ;;  %551 = vst.msk [vmem:[%s838_s28 + $0xc0] sm:$0xff] %vm526_vm3, %v496_v62  ;;  %v443_v1 = vadd.f32 %v694_v63, %v833_v22  ;;  %v507_v2 = vadd.f32 %v710_v0, %v833_v22 }
  0xee   : > { %v434_v3 = vpop.f32.mrf.mxu0  ;;  %v498_v4 = vpop.f32.mrf.mxu1 }
  0xef   : > { %538 = vst.msk [vmem:[%s838_s28 + $0x58] sm:$0xff] %vm526_vm3, %v443_v1  ;;  %554 = vst.msk [vmem:[%s838_s28 + $0xd8] sm:$0xff] %vm526_vm3, %v507_v2  ;;  %v435_v5 = vadd.f32 %v833_v22, %v434_v3  ;;  %v499_v6 = vadd.f32 %v833_v22, %v498_v4 }
  0xf0   : > { %v697_v7 = vpop.f32.mrf.mxu0  ;;  %v713_v8 = vpop.f32.mrf.mxu1 }
  0xf1   : > { %536 = vst.msk [vmem:[%s838_s28 + $0x48] sm:$0xff] %vm526_vm3, %v435_v5  ;;  %552 = vst.msk [vmem:[%s838_s28 + $0xc8] sm:$0xff] %vm526_vm3, %v499_v6  ;;  %v456_v9 = vadd.f32 %v697_v7, %v833_v22  ;;  %v520_v10 = vadd.f32 %v713_v8, %v833_v22 }
  0xf2   : > { %v447_v11 = vpop.f32.mrf.mxu0  ;;  %v511_v12 = vpop.f32.mrf.mxu1 }
  0xf3   : > { %541 = vst.msk [vmem:[%s838_s28 + $0x70] sm:$0xff] %vm526_vm3, %v456_v9  ;;  %557 = vst.msk [vmem:[%s838_s28 + $0xf0] sm:$0xff] %vm526_vm3, %v520_v10  ;;  %v448_v13 = vadd.f32 %v833_v22, %v447_v11  ;;  %v512_v14 = vadd.f32 %v833_v22, %v511_v12 }
  0xf4   : > { %v698_v15 = vpop.f32.mrf.mxu0  ;;  %v714_v16 = vpop.f32.mrf.mxu1 }
  0xf5   : > { %539 = vst.msk [vmem:[%s838_s28 + $0x60] sm:$0xff] %vm526_vm3, %v448_v13  ;;  %555 = vst.msk [vmem:[%s838_s28 + $0xe0] sm:$0xff] %vm526_vm3, %v512_v14  ;;  %v459_v17 = vadd.f32 %v698_v15, %v833_v22  ;;  %v523_v18 = vadd.f32 %v714_v16, %v833_v22 }
  0xf6   : > { %v450_v19 = vpop.f32.mrf.mxu0  ;;  %v514_v20 = vpop.f32.mrf.mxu1 }
  0xf7   : > { %542 = vst.msk [vmem:[%s838_s28 + $0x78] sm:$0xff] %vm526_vm3, %v459_v17  ;;  %558 = vst.msk [vmem:[%s838_s28 + $0xf8] sm:$0xff] %vm526_vm3, %v523_v18  ;;  %v451_v21 = vadd.f32 %v833_v22, %v450_v19  ;;  %v515_v23 = vadd.f32 %v833_v22, %v514_v20 }
  0xf9   : > { %540 = vst.msk [vmem:[%s838_s28 + $0x68] sm:$0xff] %vm526_vm3, %v451_v21  ;;  %556 = vst.msk [vmem:[%s838_s28 + $0xe8] sm:$0xff] %vm526_vm3, %v515_v23 }
  0xfa PF: > { %s13_s12 = sadd.s32 1, %s752_s12  }
  0xfb   : > { %p10_p4 = scmp.ge.s32.totalorder %s13_s12, 10  }
  0xfd   :  { %12 = sbr.rel (!%p10_p4) target bundleno = 1 (0x1), region = 62 }

// kernel: _lambda_.10
= control target key start
LH: loop header
LB: loop body
LE: loop exit
PB: predicated region body
PF: predicated region fallthrough
CT: control target
= control target key end

     0   :  { %s1124_s12 = smov 0   ;;  %s1415_s0 = inlined_call_operand.vmem [shape: bf16[2048,144], index: 0, kind: input, shape index: {}]   ;;  %s1416_s1 = inlined_call_operand.vmem [shape: bf16[144,32], index: 1, kind: input, shape index: {}]   ;;  %s1417_s2 = inlined_call_operand.vmem [shape: f32[1,32], index: 2, kind: input, shape index: {}]   ;;  %s1418_s3 = inlined_call_operand.vmem [shape: bf16[2048,32], index: 3, kind: output, shape index: {}]  }
   0x1 LB: > { %s924_s13 = sadd.s32 4294967295, %s1101_s12   ;;  %p928_p0 = scmp.ge.s32.totalorder %s1101_s12, 1  ;;  %s1101_s12 = sphi %s1124_s12, %s13_s12  }
   0x2   : > { %p139_p1 = scmp.lt.s32.totalorder %s1101_s12, 9 }
   0x4   : > { %p140_p2 = pnand %p928_p0, %p139_p1 }
   0x5   : > { %s929_s16 = sshll.u32 (!%p140_p2), %s924_s13, 5 }
   0x6   : > { %143 = sbr.rel (%p140_p2) target bundleno = 308 (0x134), region = 32  ;;  %p165_p3 = scmp.lt.s32.totalorder (!%p140_p2), %s929_s16, 255 }
   0xb   : > { %v1086_v0 = vld [vmem:[%s1416_s1 + $0x38] sm:$0xff]   ;;  %v1103_v1 = vmov 0   ;;  %v1087_v2 = vld [vmem:[%s1416_s1 + $0x30] sm:$0xff]   ;;  %s1420_s16 = smov (!%p165_p3, %s929_s16), 255  ;;  %v1088_v3 = vld [vmem:[%s1416_s1 + $0x28] sm:$0xff]   ;;  %vm465_vm0 = vcmask 130048  }
   0xc   : > { %514 = vmatprep.subr.bf16.mxu0 %v1103_v1  ;;  %1059 = vmatprep.subr.bf16.mxu1 %v1103_v1  ;;  %s1026_s21 = sshll.u32 %s1420_s16, 3  ;;  %v1089_v7 = vld [vmem:[%s1416_s1 + $0x20] sm:$0xff]   ;;  %v1090_v15 = vld [vmem:[%s1416_s1 + $0x18] sm:$0xff]   ;;  %v1091_v16 = vld [vmem:[%s1416_s1 + $0x10] sm:$0xff]   ;;  %s933_s13 = sshll.u32 %s1420_s16, 2  ;;  %vm835_vm1 = vcmask 257024  }
   0xd   : > { %515 = vmatpush1.bf16.msra.mxu0 %v1086_v0  ;;  %1068 = vmatpush1.bf16.msra.mxu1 %v1086_v0  ;;  %s1153_s24 = scalar_lea.vmem %s1415_s0, %s1026_s21  ;;  %v1092_v17 = vld [vmem:[%s1416_s1 + $0x8] sm:$0xff]   ;;  %v1093_v25 = vld [vmem:[%s1416_s1] sm:$0xff]   ;;  %s1316_s17 = scalar_lea.vmem %s1418_s3, %s933_s13 }
   0xe   : > { %516 = vmatprep.subr.bf16.mxu0 %v1103_v1  ;;  %1060 = vmatprep.subr.bf16.mxu1 %v1103_v1  ;;  %v178_v4 = vld [vmem:[%s1153_s24] sm:$0xff]  ;;  %v179_v5 = vld [vmem:[%s1153_s24 + $0x8] sm:$0xff]  ;;  %v192_v18 = vld [vmem:[%s1153_s24 + $0x70] sm:$0xff] }
   0xf   : > { %v194_v6 = vld [vmem:[%s1153_s24 + $0x80] sm:$0xff]  ;;  %v1162_v8 = vmax.bf16 %v1103_v1, %v178_v4  ;;  %v1165_v9 = vmax.bf16 %v1103_v1, %v179_v5  ;;  %v195_v10 = vld [vmem:[%s1153_s24 + $0x88] sm:$0xff]  ;;  %v193_v19 = vld [vmem:[%s1153_s24 + $0x78] sm:$0xff]  ;;  %v1199_v22 = vmax.bf16 %v1103_v1, %v192_v18 }
  0x10   : > { %v1169_v11 = vmax.bf16 %v1103_v1, %v194_v6  ;;  %v227_v12 = vmax.bf16 %v1103_v1, %v195_v10  ;;  %v208_v20 = vld [vmem:[%s1153_s24 + $0xf0] sm:$0xff]  ;;  %v209_v21 = vld [vmem:[%s1153_s24 + $0xf8] sm:$0xff]  ;;  %v1202_v23 = vmax.bf16 %v1103_v1, %v193_v19  ;;  %v1094_v36 = vld [vmem:[%s1416_s1 + $0x40] sm:$0xff]  }
  0x11   : > { %517 = vmatpush1.bf16.msra.mxu0 %v1087_v2  ;;  %1069 = vmatpush1.bf16.msra.mxu1 %v1087_v2  ;;  %v936_v13 = vcombine.high %v1162_v8, %v1165_v9  ;;  %v1205_v24 = vmax.bf16 %v1103_v1, %v208_v20  ;;  %v180_v26 = vld [vmem:[%s1153_s24 + $0x10] sm:$0xff]  ;;  %v1212_v27 = vmax.bf16 %v1103_v1, %v209_v21  ;;  %v181_v28 = vld [vmem:[%s1153_s24 + $0x18] sm:$0xff]  ;;  %v182_v44 = vld [vmem:[%s1153_s24 + $0x20] sm:$0xff] }
  0x12   : > { %518 = vmatprep.subr.bf16.mxu0 %v1103_v1  ;;  %1061 = vmatprep.subr.bf16.mxu1 %v1103_v1  ;;  %v952_v14 = vcombine.high %v1169_v11, %v227_v12  ;;  %v196_v29 = vld [vmem:[%s1153_s24 + $0x90] sm:$0xff]  ;;  %v197_v30 = vld [vmem:[%s1153_s24 + $0x98] sm:$0xff]  ;;  %v950_v31 = vcombine.high %v1199_v22, %v1202_v23  ;;  %v949_v33 = vcombine.low %v1199_v22, %v1202_v23  ;;  %v183_v45 = vld [vmem:[%s1153_s24 + $0x28] sm:$0xff] }
  0x13   : > { %976 = vmatprep.mubr.msk.bf16.mxu0 %vm465_vm0, %v936_v13  ;;  %v966_v32 = vcombine.high %v1205_v24, %v1212_v27  ;;  %v965_v34 = vcombine.low %v1205_v24, %v1212_v27  ;;  %v212_v35 = vmax.bf16 %v1103_v1, %v180_v26  ;;  %v213_v37 = vmax.bf16 %v1103_v1, %v181_v28  ;;  %v198_v46 = vld [vmem:[%s1153_s24 + $0xa0] sm:$0xff]  ;;  %v199_v47 = vld [vmem:[%s1153_s24 + $0xa8] sm:$0xff]  ;;  %v184_v56 = vld [vmem:[%s1153_s24 + $0x30] sm:$0xff] }
  0x14   : > { %984 = vmatprep.mubr.msk.bf16.mxu1 %vm465_vm0, %v952_v14  ;;  %v228_v38 = vmax.bf16 %v1103_v1, %v196_v29  ;;  %v229_v39 = vmax.bf16 %v1103_v1, %v197_v30  ;;  %v935_v40 = vcombine.low %v1162_v8, %v1165_v9  ;;  %v951_v41 = vcombine.low %v1169_v11, %v227_v12  ;;  %v185_v57 = vld [vmem:[%s1153_s24 + $0x38] sm:$0xff]  ;;  %v200_v58 = vld [vmem:[%s1153_s24 + $0xb0] sm:$0xff]  ;;  %v186_v5 = vld [vmem:[%s1153_s24 + $0x40] sm:$0xff] }
  0x15   : > { %519 = vmatpush1.bf16.msra.mxu0 %v1088_v3  ;;  %1070 = vmatpush1.bf16.msra.mxu1 %v1088_v3  ;;  %v938_v42 = vcombine.high %v212_v35, %v213_v37  ;;  %v214_v48 = vmax.bf16 %v1103_v1, %v182_v44  ;;  %v215_v49 = vmax.bf16 %v1103_v1, %v183_v45  ;;  %v201_v59 = vld [vmem:[%s1153_s24 + $0xb8] sm:$0xff]  ;;  %v187_v6 = vld [vmem:[%s1153_s24 + $0x48] sm:$0xff]  ;;  %v204_v19 = vld [vmem:[%s1153_s24 + $0xd0] sm:$0xff] }
  0x16   : > { %520 = vmatprep.subr.bf16.mxu0 %v1103_v1  ;;  %1062 = vmatprep.subr.bf16.mxu1 %v1103_v1  ;;  %v954_v43 = vcombine.high %v228_v38, %v229_v39  ;;  %v230_v50 = vmax.bf16 %v1103_v1, %v198_v46  ;;  %v231_v51 = vmax.bf16 %v1103_v1, %v199_v47  ;;  %v203_v8 = vld [vmem:[%s1153_s24 + $0xc8] sm:$0xff]  ;;  %v189_v18 = vld [vmem:[%s1153_s24 + $0x58] sm:$0xff] }
  0x17   : > { %v937_v52 = vcombine.low %v212_v35, %v213_v37  ;;  %v953_v53 = vcombine.low %v228_v38, %v229_v39  ;;  %v940_v54 = vcombine.high %v214_v48, %v215_v49  ;;  %v216_v60 = vmax.bf16 %v1103_v1, %v184_v56  ;;  %v205_v20 = vld [vmem:[%s1153_s24 + $0xd8] sm:$0xff]  ;;  %v190_v37 = vld [vmem:[%s1153_s24 + $0x60] sm:$0xff]  ;;  %v191_v38 = vld [vmem:[%s1153_s24 + $0x68] sm:$0xff] }
  0x18   : > { %v956_v55 = vcombine.high %v230_v50, %v231_v51  ;;  %v217_v61 = vmax.bf16 %v1103_v1, %v185_v57  ;;  %v232_v62 = vmax.bf16 %v1103_v1, %v200_v58  ;;  %v233_v63 = vmax.bf16 %v1103_v1, %v201_v59  ;;  %v206_v39 = vld [vmem:[%s1153_s24 + $0xe0] sm:$0xff] }
  0x19   : > { %521 = vmatpush1.bf16.msra.mxu0 %v1089_v7  ;;  %1071 = vmatpush1.bf16.msra.mxu1 %v1089_v7  ;;  %v939_v0 = vcombine.low %v214_v48, %v215_v49  ;;  %v955_v2 = vcombine.low %v230_v50, %v231_v51  ;;  %v202_v7 = vld [vmem:[%s1153_s24 + $0xc0] sm:$0xff]  ;;  %v218_v9 = vmax.bf16 %v1103_v1, %v186_v5 }
  0x1a   : > { %522 = vmatprep.subr.bf16.mxu0 %v1103_v1  ;;  %1063 = vmatprep.subr.bf16.mxu1 %v1103_v1  ;;  %v942_v3 = vcombine.high %v216_v60, %v217_v61  ;;  %v958_v4 = vcombine.high %v232_v62, %v233_v63  ;;  %v219_v10 = vmax.bf16 %v1103_v1, %v187_v6 }
  0x1b   : > { %v234_v11 = vmax.bf16 %v1103_v1, %v202_v7  ;;  %v235_v12 = vmax.bf16 %v1103_v1, %v203_v8  ;;  %v941_v13 = vcombine.low %v216_v60, %v217_v61  ;;  %v957_v14 = vcombine.low %v232_v62, %v233_v63 }
  0x1c   : > { %v236_v26 = vmax.bf16 %v1103_v1, %v204_v19  ;;  %v237_v28 = vmax.bf16 %v1103_v1, %v205_v20  ;;  %v943_v29 = vcombine.low %v218_v9, %v219_v10 }
  0x1d   : > { %523 = vmatpush1.bf16.msra.mxu0 %v1090_v15  ;;  %1072 = vmatpush1.bf16.msra.mxu1 %v1090_v15  ;;  %v944_v15 = vcombine.high %v218_v9, %v219_v10  ;;  %v959_v30 = vcombine.low %v234_v11, %v235_v12 }
  0x1e   : > { %524 = vmatprep.subr.bf16.mxu0 %v1103_v1  ;;  %1064 = vmatprep.subr.bf16.mxu1 %v1103_v1  ;;  %v961_v46 = vcombine.low %v236_v26, %v237_v28 }
  0x21   : > { %525 = vmatpush1.bf16.msra.mxu0 %v1091_v16  ;;  %1073 = vmatpush1.bf16.msra.mxu1 %v1091_v16  ;;  %v960_v16 = vcombine.high %v234_v11, %v235_v12 }
  0x22   : > { %526 = vmatprep.subr.bf16.mxu0 %v1103_v1  ;;  %1065 = vmatprep.subr.bf16.mxu1 %v1103_v1 }
  0x25   : > { %527 = vmatpush1.bf16.msra.mxu0 %v1092_v17  ;;  %1074 = vmatpush1.bf16.msra.mxu1 %v1092_v17  ;;  %v188_v17 = vld [vmem:[%s1153_s24 + $0x50] sm:$0xff] }
  0x26   : > { %528 = vmatprep.subr.bf16.mxu0 %v1103_v1  ;;  %1066 = vmatprep.subr.bf16.mxu1 %v1103_v1  ;;  %v220_v21 = vmax.bf16 %v1103_v1, %v188_v17 }
  0x29   : > { %529 = vmatpush1.bf16.msra.mxu0 %v1093_v25  ;;  %1075 = vmatpush1.bf16.msra.mxu1 %v1093_v25  ;;  %v221_v25 = vmax.bf16 %v1103_v1, %v189_v18 }
  0x2a   : > { %544 = vmatprep.subr.bf16.mxu0 %v1103_v1  ;;  %1067 = vmatprep.subr.bf16.mxu1 %v1103_v1 }
  0x2b   : > { %v946_v35 = vcombine.high %v220_v21, %v221_v25  ;;  %v945_v45 = vcombine.low %v220_v21, %v221_v25 }
  0x2d   : > { %545 = vmatpush2.bf16.msra.mxu0 %v1094_v36  ;;  %1076 = vmatpush2.bf16.msra.mxu1 %v1094_v36  ;;  %v962_v36 = vcombine.high %v236_v26, %v237_v28 }
  0x30   : > { %547 = vmatmul.mubr.bf16.vlgmr.msra.gmra.mxu0 %v935_v40  ;;  %611 = vmatmul.mubr.bf16.vlgmr.msra.gmra.mxu1 %v951_v41  ;;  %v207_v40 = vld [vmem:[%s1153_s24 + $0xe8] sm:$0xff]  ;;  %v222_v41 = vmax.bf16 %v1103_v1, %v190_v37 }
  0x31   : > { %977 = vmatprep.mubr.msk.bf16.mxu0 %vm465_vm0, %v938_v42  ;;  %985 = vmatprep.mubr.msk.bf16.mxu1 %vm465_vm0, %v954_v43  ;;  %v223_v42 = vmax.bf16 %v1103_v1, %v191_v38  ;;  %v238_v43 = vmax.bf16 %v1103_v1, %v206_v39  ;;  %v239_v44 = vmax.bf16 %v1103_v1, %v207_v40  ;;  %v1308_v1 = vld [vmem:[%s1417_s2] ss:$0 sm:$0xff] }
  0x33   : > { %v948_v47 = vcombine.high %v222_v41, %v223_v42  ;;  %v964_v48 = vcombine.high %v238_v43, %v239_v44  ;;  %v947_v49 = vcombine.low %v222_v41, %v223_v42  ;;  %v963_v50 = vcombine.low %v238_v43, %v239_v44 }
  0x38   : > { %555 = vmatmul.mubr.bf16.gmra.mxu0 %v937_v52  ;;  %619 = vmatmul.mubr.bf16.gmra.mxu1 %v953_v53 }
  0x39   : > { %978 = vmatprep.mubr.msk.bf16.mxu0 %vm465_vm0, %v940_v54  ;;  %986 = vmatprep.mubr.msk.bf16.mxu1 %vm465_vm0, %v956_v55 }
  0x40   : > { %563 = vmatmul.mubr.bf16.gmra.mxu0 %v939_v0  ;;  %627 = vmatmul.mubr.bf16.gmra.mxu1 %v955_v2 }
  0x41   : > { %979 = vmatprep.mubr.msk.bf16.mxu0 %vm465_vm0, %v942_v3  ;;  %987 = vmatprep.mubr.msk.bf16.mxu1 %vm465_vm0, %v958_v4 }
  0x48   : > { %571 = vmatmul.mubr.bf16.gmra.mxu0 %v941_v13  ;;  %635 = vmatmul.mubr.bf16.gmra.mxu1 %v957_v14 }
  0x49   : > { %980 = vmatprep.mubr.msk.bf16.mxu0 %vm465_vm0, %v944_v15  ;;  %988 = vmatprep.mubr.msk.bf16.mxu1 %vm465_vm0, %v960_v16 }
  0x50   : > { %579 = vmatmul.mubr.bf16.gmra.mxu0 %v943_v29  ;;  %643 = vmatmul.mubr.bf16.gmra.mxu1 %v959_v30 }
  0x51   : > { %981 = vmatprep.mubr.msk.bf16.mxu0 %vm465_vm0, %v946_v35  ;;  %989 = vmatprep.mubr.msk.bf16.mxu1 %vm465_vm0, %v962_v36 }
  0x58   : > { %587 = vmatmul.mubr.bf16.gmra.mxu0 %v945_v45  ;;  %651 = vmatmul.mubr.bf16.gmra.mxu1 %v961_v46 }
  0x59   : > { %982 = vmatprep.mubr.msk.bf16.mxu0 %vm465_vm0, %v948_v47  ;;  %990 = vmatprep.mubr.msk.bf16.mxu1 %vm465_vm0, %v964_v48 }
  0x60   : > { %595 = vmatmul.mubr.bf16.gmra.mxu0 %v947_v49  ;;  %659 = vmatmul.mubr.bf16.gmra.mxu1 %v963_v50 }
  0x61   : > { %983 = vmatprep.mubr.msk.bf16.mxu0 %vm465_vm0, %v950_v31  ;;  %991 = vmatprep.mubr.msk.bf16.mxu1 %vm465_vm0, %v966_v32 }
  0x68   : > { %603 = vmatmul.mubr.bf16.gmra.mxu0 %v949_v33  ;;  %667 = vmatmul.mubr.bf16.gmra.mxu1 %v965_v34 }
  0xf0   : > { %v548_v51 = vpop.f32.mrf.mxu0  ;;  %v612_v31 = vpop.f32.mrf.mxu1 }
  0xf1   : > { %v549_v52 = vadd.f32 %v1308_v1, %v548_v51  ;;  %v613_v32 = vadd.f32 %v1308_v1, %v612_v31 }
  0xf2   : > { %v550_v53 = vpop.f32.mrf.mxu0  ;;  %v614_v54 = vpop.f32.mrf.mxu1 }
  0xf3   : > { %v675_v22 = vmax.f32 %v549_v52, 0.0  ;;  %v691_v23 = vmax.f32 %v613_v32, 0.0 }
  0xf4   : > { %v551_v24 = vpop.f32.mrf.mxu0  ;;  %v615_v27 = vpop.f32.mrf.mxu1 }
  0xf5   : > { %v1027_v33 = vpack.c.bf16 %v675_v22, %v675_v22  ;;  %v1043_v34 = vpack.c.bf16 %v691_v23, %v691_v23  ;;  %v552_v55 = vadd.f32 %v1308_v1, %v551_v24  ;;  %v616_v56 = vadd.f32 %v1308_v1, %v615_v27 }
  0xf6   : > { %v553_v57 = vpop.f32.mrf.mxu0  ;;  %v617_v58 = vpop.f32.mrf.mxu1 }
  0xf7   : > { %836 = vst.msk [vmem:[%s1316_s17] sm:$0xf] %vm835_vm1, %v1027_v33  ;;  %852 = vst.msk [vmem:[%s1316_s17 + $0x40] sm:$0xf] %vm835_vm1, %v1043_v34  ;;  %v676_v59 = vmax.f32 %v552_v55, 0.0  ;;  %v692_v60 = vmax.f32 %v616_v56, 0.0 }
  0xf8   : > { %v556_v61 = vpop.f32.mrf.mxu0  ;;  %v620_v62 = vpop.f32.mrf.mxu1 }
  0xf9   : > { %v1028_v63 = vpack.c.bf16 %v676_v59, %v676_v59  ;;  %v1044_v0 = vpack.c.bf16 %v692_v60, %v692_v60  ;;  %v557_v2 = vadd.f32 %v1308_v1, %v556_v61  ;;  %v621_v3 = vadd.f32 %v1308_v1, %v620_v62 }
  0xfa   : > { %v558_v4 = vpop.f32.mrf.mxu0  ;;  %v622_v5 = vpop.f32.mrf.mxu1 }
  0xfb   : > { %837 = vst.msk [vmem:[%s1316_s17 + $0x4] sm:$0xf] %vm835_vm1, %v1028_v63  ;;  %853 = vst.msk [vmem:[%s1316_s17 + $0x44] sm:$0xf] %vm835_vm1, %v1044_v0  ;;  %v677_v6 = vmax.f32 %v557_v2, 0.0  ;;  %v693_v7 = vmax.f32 %v621_v3, 0.0 }
  0xfc   : > { %v559_v8 = vpop.f32.mrf.mxu0  ;;  %v623_v9 = vpop.f32.mrf.mxu1 }
  0xfd   : > { %v1029_v10 = vpack.c.bf16 %v677_v6, %v677_v6  ;;  %v1045_v11 = vpack.c.bf16 %v693_v7, %v693_v7  ;;  %v560_v12 = vadd.f32 %v1308_v1, %v559_v8  ;;  %v624_v13 = vadd.f32 %v1308_v1, %v623_v9 }
  0xfe   : > { %v561_v14 = vpop.f32.mrf.mxu0  ;;  %v625_v15 = vpop.f32.mrf.mxu1 }
  0xff   : > { %838 = vst.msk [vmem:[%s1316_s17 + $0x8] sm:$0xf] %vm835_vm1, %v1029_v10  ;;  %854 = vst.msk [vmem:[%s1316_s17 + $0x48] sm:$0xf] %vm835_vm1, %v1045_v11  ;;  %v678_v16 = vmax.f32 %v560_v12, 0.0  ;;  %v694_v17 = vmax.f32 %v624_v13, 0.0 }
 0x100   : > { %v564_v18 = vpop.f32.mrf.mxu0  ;;  %v628_v19 = vpop.f32.mrf.mxu1 }
 0x101   : > { %v1030_v20 = vpack.c.bf16 %v678_v16, %v678_v16  ;;  %v1046_v21 = vpack.c.bf16 %v694_v17, %v694_v17  ;;  %v565_v25 = vadd.f32 %v1308_v1, %v564_v18  ;;  %v629_v26 = vadd.f32 %v1308_v1, %v628_v19 }
 0x102   : > { %v566_v28 = vpop.f32.mrf.mxu0  ;;  %v630_v29 = vpop.f32.mrf.mxu1 }
 0x103   : > { %839 = vst.msk [vmem:[%s1316_s17 + $0xc] sm:$0xf] %vm835_vm1, %v1030_v20  ;;  %855 = vst.msk [vmem:[%s1316_s17 + $0x4c] sm:$0xf] %vm835_vm1, %v1046_v21  ;;  %v679_v30 = vmax.f32 %v565_v25, 0.0  ;;  %v695_v35 = vmax.f32 %v629_v26, 0.0 }
 0x104   : > { %v567_v36 = vpop.f32.mrf.mxu0  ;;  %v631_v37 = vpop.f32.mrf.mxu1 }
 0x105   : > { %v1031_v38 = vpack.c.bf16 %v679_v30, %v679_v30  ;;  %v1047_v39 = vpack.c.bf16 %v695_v35, %v695_v35  ;;  %v568_v40 = vadd.f32 %v1308_v1, %v567_v36  ;;  %v632_v41 = vadd.f32 %v1308_v1, %v631_v37 }
 0x106   : > { %v569_v42 = vpop.f32.mrf.mxu0  ;;  %v633_v43 = vpop.f32.mrf.mxu1 }
 0x107   : > { %840 = vst.msk [vmem:[%s1316_s17 + $0x10] sm:$0xf] %vm835_vm1, %v1031_v38  ;;  %856 = vst.msk [vmem:[%s1316_s17 + $0x50] sm:$0xf] %vm835_vm1, %v1047_v39  ;;  %v680_v44 = vmax.f32 %v568_v40, 0.0  ;;  %v696_v45 = vmax.f32 %v632_v41, 0.0 }
 0x108   : > { %v572_v46 = vpop.f32.mrf.mxu0  ;;  %v636_v47 = vpop.f32.mrf.mxu1 }
 0x109   : > { %v1032_v48 = vpack.c.bf16 %v680_v44, %v680_v44  ;;  %v1048_v49 = vpack.c.bf16 %v696_v45, %v696_v45  ;;  %v573_v50 = vadd.f32 %v1308_v1, %v572_v46  ;;  %v637_v51 = vadd.f32 %v1308_v1, %v636_v47 }
 0x10a   : > { %v574_v31 = vpop.f32.mrf.mxu0  ;;  %v638_v52 = vpop.f32.mrf.mxu1 }
 0x10b   : > { %841 = vst.msk [vmem:[%s1316_s17 + $0x14] sm:$0xf] %vm835_vm1, %v1032_v48  ;;  %857 = vst.msk [vmem:[%s1316_s17 + $0x54] sm:$0xf] %vm835_vm1, %v1048_v49  ;;  %v681_v32 = vmax.f32 %v573_v50, 0.0  ;;  %v697_v53 = vmax.f32 %v637_v51, 0.0 }
 0x10c   : > { %v575_v54 = vpop.f32.mrf.mxu0  ;;  %v639_v22 = vpop.f32.mrf.mxu1 }
 0x10d   : > { %v1033_v23 = vpack.c.bf16 %v681_v32, %v681_v32  ;;  %v1049_v24 = vpack.c.bf16 %v697_v53, %v697_v53  ;;  %v576_v27 = vadd.f32 %v1308_v1, %v575_v54  ;;  %v640_v33 = vadd.f32 %v1308_v1, %v639_v22 }
 0x10e   : > { %v577_v34 = vpop.f32.mrf.mxu0  ;;  %v641_v55 = vpop.f32.mrf.mxu1 }
 0x10f   : > { %842 = vst.msk [vmem:[%s1316_s17 + $0x18] sm:$0xf] %vm835_vm1, %v1033_v23  ;;  %858 = vst.msk [vmem:[%s1316_s17 + $0x58] sm:$0xf] %vm835_vm1, %v1049_v24  ;;  %v682_v56 = vmax.f32 %v576_v27, 0.0  ;;  %v698_v57 = vmax.f32 %v640_v33, 0.0 }
 0x110   : > { %v580_v58 = vpop.f32.mrf.mxu0  ;;  %v644_v59 = vpop.f32.mrf.mxu1 }
 0x111   : > { %v1034_v60 = vpack.c.bf16 %v682_v56, %v682_v56  ;;  %v1050_v61 = vpack.c.bf16 %v698_v57, %v698_v57  ;;  %v581_v62 = vadd.f32 %v1308_v1, %v580_v58  ;;  %v645_v63 = vadd.f32 %v1308_v1, %v644_v59 }
 0x112   : > { %v582_v0 = vpop.f32.mrf.mxu0  ;;  %v646_v2 = vpop.f32.mrf.mxu1 }
 0x113   : > { %843 = vst.msk [vmem:[%s1316_s17 + $0x1c] sm:$0xf] %vm835_vm1, %v1034_v60  ;;  %859 = vst.msk [vmem:[%s1316_s17 + $0x5c] sm:$0xf] %vm835_vm1, %v1050_v61  ;;  %v683_v3 = vmax.f32 %v581_v62, 0.0  ;;  %v699_v4 = vmax.f32 %v645_v63, 0.0 }
 0x114   : > { %v583_v5 = vpop.f32.mrf.mxu0  ;;  %v647_v6 = vpop.f32.mrf.mxu1 }
 0x115   : > { %v1035_v7 = vpack.c.bf16 %v683_v3, %v683_v3  ;;  %v1051_v8 = vpack.c.bf16 %v699_v4, %v699_v4  ;;  %v584_v9 = vadd.f32 %v1308_v1, %v583_v5  ;;  %v648_v10 = vadd.f32 %v1308_v1, %v647_v6 }
 0x116   : > { %v585_v11 = vpop.f32.mrf.mxu0  ;;  %v649_v12 = vpop.f32.mrf.mxu1 }
 0x117   : > { %844 = vst.msk [vmem:[%s1316_s17 + $0x20] sm:$0xf] %vm835_vm1, %v1035_v7  ;;  %860 = vst.msk [vmem:[%s1316_s17 + $0x60] sm:$0xf] %vm835_vm1, %v1051_v8  ;;  %v684_v13 = vmax.f32 %v584_v9, 0.0  ;;  %v700_v14 = vmax.f32 %v648_v10, 0.0 }
 0x118   : > { %v588_v15 = vpop.f32.mrf.mxu0  ;;  %v652_v16 = vpop.f32.mrf.mxu1 }
 0x119   : > { %v1036_v17 = vpack.c.bf16 %v684_v13, %v684_v13  ;;  %v1052_v18 = vpack.c.bf16 %v700_v14, %v700_v14  ;;  %v589_v19 = vadd.f32 %v1308_v1, %v588_v15  ;;  %v653_v20 = vadd.f32 %v1308_v1, %v652_v16 }
 0x11a   : > { %v590_v21 = vpop.f32.mrf.mxu0  ;;  %v654_v25 = vpop.f32.mrf.mxu1 }
 0x11b   : > { %845 = vst.msk [vmem:[%s1316_s17 + $0x24] sm:$0xf] %vm835_vm1, %v1036_v17  ;;  %861 = vst.msk [vmem:[%s1316_s17 + $0x64] sm:$0xf] %vm835_vm1, %v1052_v18  ;;  %v685_v26 = vmax.f32 %v589_v19, 0.0  ;;  %v701_v28 = vmax.f32 %v653_v20, 0.0 }
 0x11c   : > { %v591_v29 = vpop.f32.mrf.mxu0  ;;  %v655_v30 = vpop.f32.mrf.mxu1 }
 0x11d   : > { %v1037_v35 = vpack.c.bf16 %v685_v26, %v685_v26  ;;  %v1053_v36 = vpack.c.bf16 %v701_v28, %v701_v28  ;;  %v592_v37 = vadd.f32 %v1308_v1, %v591_v29  ;;  %v656_v38 = vadd.f32 %v1308_v1, %v655_v30 }
 0x11e   : > { %v593_v39 = vpop.f32.mrf.mxu0  ;;  %v657_v40 = vpop.f32.mrf.mxu1 }
 0x11f   : > { %846 = vst.msk [vmem:[%s1316_s17 + $0x28] sm:$0xf] %vm835_vm1, %v1037_v35  ;;  %862 = vst.msk [vmem:[%s1316_s17 + $0x68] sm:$0xf] %vm835_vm1, %v1053_v36  ;;  %v686_v41 = vmax.f32 %v592_v37, 0.0  ;;  %v702_v42 = vmax.f32 %v656_v38, 0.0 }
 0x120   : > { %v596_v43 = vpop.f32.mrf.mxu0  ;;  %v660_v44 = vpop.f32.mrf.mxu1 }
 0x121   : > { %v1038_v45 = vpack.c.bf16 %v686_v41, %v686_v41  ;;  %v1054_v46 = vpack.c.bf16 %v702_v42, %v702_v42  ;;  %v597_v47 = vadd.f32 %v1308_v1, %v596_v43  ;;  %v661_v48 = vadd.f32 %v1308_v1, %v660_v44 }
 0x122   : > { %v598_v49 = vpop.f32.mrf.mxu0  ;;  %v662_v50 = vpop.f32.mrf.mxu1 }
 0x123   : > { %847 = vst.msk [vmem:[%s1316_s17 + $0x2c] sm:$0xf] %vm835_vm1, %v1038_v45  ;;  %863 = vst.msk [vmem:[%s1316_s17 + $0x6c] sm:$0xf] %vm835_vm1, %v1054_v46  ;;  %v687_v51 = vmax.f32 %v597_v47, 0.0  ;;  %v703_v31 = vmax.f32 %v661_v48, 0.0 }
 0x124   : > { %v599_v52 = vpop.f32.mrf.mxu0  ;;  %v663_v32 = vpop.f32.mrf.mxu1 }
 0x125   : > { %v1039_v53 = vpack.c.bf16 %v687_v51, %v687_v51  ;;  %v1055_v54 = vpack.c.bf16 %v703_v31, %v703_v31  ;;  %v600_v22 = vadd.f32 %v1308_v1, %v599_v52  ;;  %v664_v23 = vadd.f32 %v1308_v1, %v663_v32 }
 0x126   : > { %v601_v24 = vpop.f32.mrf.mxu0  ;;  %v665_v27 = vpop.f32.mrf.mxu1 }
 0x127   : > { %848 = vst.msk [vmem:[%s1316_s17 + $0x30] sm:$0xf] %vm835_vm1, %v1039_v53  ;;  %864 = vst.msk [vmem:[%s1316_s17 + $0x70] sm:$0xf] %vm835_vm1, %v1055_v54  ;;  %v688_v33 = vmax.f32 %v600_v22, 0.0  ;;  %v704_v34 = vmax.f32 %v664_v23, 0.0 }
 0x128   : > { %v604_v55 = vpop.f32.mrf.mxu0  ;;  %v668_v56 = vpop.f32.mrf.mxu1 }
 0x129   : > { %v1040_v57 = vpack.c.bf16 %v688_v33, %v688_v33  ;;  %v1056_v58 = vpack.c.bf16 %v704_v34, %v704_v34  ;;  %v605_v59 = vadd.f32 %v1308_v1, %v604_v55  ;;  %v669_v60 = vadd.f32 %v1308_v1, %v668_v56 }
 0x12a   : > { %v606_v61 = vpop.f32.mrf.mxu0  ;;  %v670_v62 = vpop.f32.mrf.mxu1 }
 0x12b   : > { %849 = vst.msk [vmem:[%s1316_s17 + $0x34] sm:$0xf] %vm835_vm1, %v1040_v57  ;;  %865 = vst.msk [vmem:[%s1316_s17 + $0x74] sm:$0xf] %vm835_vm1, %v1056_v58  ;;  %v689_v63 = vmax.f32 %v605_v59, 0.0  ;;  %v705_v0 = vmax.f32 %v669_v60, 0.0 }
 0x12c   : > { %v607_v2 = vpop.f32.mrf.mxu0  ;;  %v671_v3 = vpop.f32.mrf.mxu1 }
 0x12d   : > { %v1041_v4 = vpack.c.bf16 %v689_v63, %v689_v63  ;;  %v1057_v5 = vpack.c.bf16 %v705_v0, %v705_v0  ;;  %v608_v6 = vadd.f32 %v1308_v1, %v607_v2  ;;  %v672_v7 = vadd.f32 %v1308_v1, %v671_v3 }
 0x12e   : > { %v609_v8 = vpop.f32.mrf.mxu0  ;;  %v673_v9 = vpop.f32.mrf.mxu1 }
 0x12f   : > { %850 = vst.msk [vmem:[%s1316_s17 + $0x38] sm:$0xf] %vm835_vm1, %v1041_v4  ;;  %866 = vst.msk [vmem:[%s1316_s17 + $0x78] sm:$0xf] %vm835_vm1, %v1057_v5  ;;  %v690_v10 = vmax.f32 %v608_v6, 0.0  ;;  %v706_v11 = vmax.f32 %v672_v7, 0.0 }
 0x131   : > { %v1042_v12 = vpack.c.bf16 %v690_v10, %v690_v10  ;;  %v1058_v13 = vpack.c.bf16 %v706_v11, %v706_v11 }
 0x133   : > { %851 = vst.msk [vmem:[%s1316_s17 + $0x3c] sm:$0xf] %vm835_vm1, %v1042_v12  ;;  %867 = vst.msk [vmem:[%s1316_s17 + $0x7c] sm:$0xf] %vm835_vm1, %v1058_v13 }
 0x134 PF: > { %s13_s12 = sadd.s32 1, %s1101_s12  }
 0x135   : > { %p10_p4 = scmp.ge.s32.totalorder %s13_s12, 10  }
 0x137   :  { %12 = sbr.rel (!%p10_p4) target bundleno = 1 (0x1), region = 62 }

// kernel: _lambda_.11
= control target key start
LH: loop header
LB: loop body
LE: loop exit
PB: predicated region body
PF: predicated region fallthrough
CT: control target
= control target key end

     0   :  { %s1620_s15 = smov 0   ;;  %s1937_s0 = inlined_call_operand.vmem [shape: bf16[2048,288], index: 0, kind: input, shape index: {}]   ;;  %s1938_s1 = inlined_call_operand.vmem [shape: bf16[288,16], index: 1, kind: input, shape index: {}]   ;;  %s1939_s2 = inlined_call_operand.vmem [shape: f32[1,16], index: 2, kind: input, shape index: {}]   ;;  %s1940_s3 = inlined_call_operand.vmem [shape: f32[2048,16], index: 3, kind: input, shape index: {}]   ;;  %s1941_s4 = inlined_call_operand.vmem [shape: f32[2048,16], index: 4, kind: output, shape index: {}]  }
   0x1 LB: > { %s1218_s16 = sadd.s32 4294967295, %s1593_s15   ;;  %p1222_p0 = scmp.ge.s32.totalorder %s1593_s15, 1  ;;  %s1593_s15 = sphi %s1620_s15, %s14_s15  }
   0x2   : > { %p175_p1 = scmp.lt.s32.totalorder %s1593_s15, 9 }
   0x4   : > { %p176_p2 = pnand %p1222_p0, %p175_p1 }
   0x5   : > { %s1223_s19 = sshll.u32 (!%p176_p2), %s1218_s16, 5 }
   0x6   : > { %179 = sbr.rel (%p176_p2) target bundleno = 340 (0x154), region = 36  ;;  %p208_p3 = scmp.lt.s32.totalorder (!%p176_p2), %s1223_s19, 255 }
   0xb   : > { %v1505_v0 = vld [vmem:[%s1938_s1 + $0x78] sm:$0xff]   ;;  %v1507_v2 = vld [vmem:[%s1938_s1 + $0x70] sm:$0xff]   ;;  %v1509_v4 = vld [vmem:[%s1938_s1 + $0x68] sm:$0xff]   ;;  %s1943_s19 = smov (!%p208_p3, %s1223_s19), 255  ;;  %vm682_vm0 = vcmask 261120   ;;  %vm1117_vm1 = vcmask 130048  }
   0xc   : > { %v1506_v1 = vld [vmem:[%s1938_s1 + $0x38] sm:$0xff]   ;;  %1314 = vmatprep.subr.bf16.mxu0 %v1505_v0  ;;  %1480 = vmatprep.subr.bf16.mxu1 %v1505_v0  ;;  %v1508_v3 = vld [vmem:[%s1938_s1 + $0x30] sm:$0xff]   ;;  %v1510_v5 = vld [vmem:[%s1938_s1 + $0x28] sm:$0xff]   ;;  %s1496_s6 = smul.u32 12, %s1943_s19  ;;  %s1226_s8 = sshll.u32 %s1943_s19, 3 }
   0xd   : > { %1315 = vmatpush3.bf16.msra.mxu0 %v1506_v1  ;;  %1488 = vmatpush3.bf16.msra.mxu1 %v1506_v1  ;;  %v1511_v6 = vld [vmem:[%s1938_s1 + $0x60] sm:$0xff]   ;;  %v1513_v8 = vld [vmem:[%s1938_s1 + $0x58] sm:$0xff]   ;;  %v1515_v10 = vld [vmem:[%s1938_s1 + $0x50] sm:$0xff]   ;;  %s1776_s11 = scalar_lea.vmem %s1940_s3, %s1226_s8  ;;  %s1791_s16 = scalar_lea.vmem %s1941_s4, %s1226_s8 }
   0xe   : > { %1316 = vmatprep.subr.bf16.mxu0 %v1507_v2  ;;  %1481 = vmatprep.subr.bf16.mxu1 %v1507_v2  ;;  %v1512_v7 = vld [vmem:[%s1938_s1 + $0x20] sm:$0xff]   ;;  %s1661_s13 = scalar_lea.vmem %s1937_s0, %s1496_s6  ;;  %v1514_v9 = vld [vmem:[%s1938_s1 + $0x18] sm:$0xff]   ;;  %v1516_v13 = vld [vmem:[%s1938_s1 + $0x10] sm:$0xff]  }
   0xf   : > { %v1523_v11 = vld [vmem:[%s1661_s13 + $0x4] ss:$12 sps:$4 sm:$0xff]   ;;  %v1517_v14 = vld [vmem:[%s1938_s1 + $0x48] sm:$0xff]   ;;  %v1534_v26 = vld [vmem:[%s1661_s13 + $0x34] ss:$12 sps:$4 sm:$0xff]  }
  0x10   : > { %v1526_v12 = vld [vmem:[%s1661_s13 + $0x124] ss:$12 sps:$4 sm:$0xff]   ;;  %763 = vmatprep.mubr.bf16.mxu0 %v1523_v11  ;;  %v1518_v15 = vld [vmem:[%s1938_s1 + $0x8] sm:$0xff]   ;;  %v1536_v27 = vld [vmem:[%s1661_s13 + $0x154] ss:$12 sps:$4 sm:$0xff]  }
  0x11   : > { %1317 = vmatpush3.bf16.msra.mxu0 %v1508_v3  ;;  %1489 = vmatpush3.bf16.msra.mxu1 %v1508_v3  ;;  %v1519_v16 = vld [vmem:[%s1938_s1 + $0x40] sm:$0xff]   ;;  %v1527_v18 = vld [vmem:[%s1938_s1 + $0x88] sm:$0xff]   ;;  %v1538_v28 = vld [vmem:[%s1661_s13 + $0x30] ss:$12 sps:$4 sm:$0xff]  }
  0x12   : > { %1318 = vmatprep.subr.bf16.mxu0 %v1509_v4  ;;  %1482 = vmatprep.subr.bf16.mxu1 %v1509_v4  ;;  %v1520_v17 = vld [vmem:[%s1938_s1] sm:$0xff]   ;;  %v1528_v21 = vld [vmem:[%s1661_s13 + $0x1c] ss:$12 sps:$4 sm:$0xff]   ;;  %v1541_v30 = vld [vmem:[%s1661_s13 + $0x4c] ss:$12 sps:$4 sm:$0xff]  }
  0x13   : > { %859 = vmatprep.mubr.bf16.mxu1 %v1526_v12  ;;  %v1521_v19 = vld [vmem:[%s1661_s13] ss:$12 sps:$4 sm:$0xff]   ;;  %v1530_v22 = vld [vmem:[%s1661_s13 + $0x13c] ss:$12 sps:$4 sm:$0xff]   ;;  %v1532_v24 = vld [vmem:[%s1661_s13 + $0x18] ss:$12 sps:$4 sm:$0xff]  }
  0x14   : > { %v1524_v20 = vld [vmem:[%s1661_s13 + $0x120] ss:$12 sps:$4 sm:$0xff]   ;;  %v1533_v25 = vld [vmem:[%s1661_s13 + $0x138] ss:$12 sps:$4 sm:$0xff]   ;;  %v1539_v29 = vld [vmem:[%s1661_s13 + $0x150] ss:$12 sps:$4 sm:$0xff]  }
  0x15   : > { %1319 = vmatpush3.bf16.msra.mxu0 %v1510_v5  ;;  %1490 = vmatpush3.bf16.msra.mxu1 %v1510_v5  ;;  %v1540_v23 = vld [vmem:[%s1938_s1 + $0x80] sm:$0xff]   ;;  %v1543_v31 = vld [vmem:[%s1661_s13 + $0x16c] ss:$12 sps:$4 sm:$0xff]   ;;  %v1545_v32 = vld [vmem:[%s1661_s13 + $0x48] ss:$12 sps:$4 sm:$0xff]  }
  0x16   : > { %1320 = vmatprep.subr.bf16.mxu0 %v1511_v6  ;;  %1483 = vmatprep.subr.bf16.mxu1 %v1511_v6  ;;  %v1546_v33 = vld [vmem:[%s1661_s13 + $0x168] ss:$12 sps:$4 sm:$0xff]   ;;  %v1547_v34 = vld [vmem:[%s1661_s13 + $0x64] ss:$12 sps:$4 sm:$0xff]   ;;  %v1550_v36 = vld [vmem:[%s1661_s13 + $0x60] ss:$12 sps:$4 sm:$0xff]  }
  0x17   : > { %v1549_v35 = vld [vmem:[%s1661_s13 + $0x8] ss:$12 sps:$4 sm:$0xff]   ;;  %v1551_v37 = vld [vmem:[%s1661_s13 + $0x20] ss:$12 sps:$4 sm:$0xff]   ;;  %v1554_v39 = vld [vmem:[%s1661_s13 + $0x38] ss:$12 sps:$4 sm:$0xff]  }
  0x18   : > { %v1552_v38 = vld [vmem:[%s1661_s13 + $0x7c] ss:$12 sps:$4 sm:$0xff]   ;;  %v1555_v40 = vld [vmem:[%s1661_s13 + $0x78] ss:$12 sps:$4 sm:$0xff]   ;;  %v1557_v42 = vld [vmem:[%s1661_s13 + $0x94] ss:$12 sps:$4 sm:$0xff]  }
  0x19   : > { %1321 = vmatpush3.bf16.msra.mxu0 %v1512_v7  ;;  %1491 = vmatpush3.bf16.msra.mxu1 %v1512_v7  ;;  %v1556_v41 = vld [vmem:[%s1661_s13 + $0x50] ss:$12 sps:$4 sm:$0xff]   ;;  %v1559_v43 = vld [vmem:[%s1661_s13 + $0x68] ss:$12 sps:$4 sm:$0xff]   ;;  %v1561_v45 = vld [vmem:[%s1661_s13 + $0x80] ss:$12 sps:$4 sm:$0xff]  }
  0x1a   : > { %1322 = vmatprep.subr.bf16.mxu0 %v1513_v8  ;;  %1484 = vmatprep.subr.bf16.mxu1 %v1513_v8  ;;  %v1560_v44 = vld [vmem:[%s1661_s13 + $0x90] ss:$12 sps:$4 sm:$0xff]   ;;  %v1562_v46 = vld [vmem:[%s1661_s13 + $0xac] ss:$12 sps:$4 sm:$0xff]   ;;  %v1565_v48 = vld [vmem:[%s1661_s13 + $0xa8] ss:$12 sps:$4 sm:$0xff]  }
  0x1b   : > { %v1564_v47 = vld [vmem:[%s1661_s13 + $0x98] ss:$12 sps:$4 sm:$0xff]   ;;  %v1566_v49 = vld [vmem:[%s1661_s13 + $0xb0] ss:$12 sps:$4 sm:$0xff]   ;;  %v1569_v51 = vld [vmem:[%s1661_s13 + $0xc8] ss:$12 sps:$4 sm:$0xff]  }
  0x1c   : > { %v1567_v50 = vld [vmem:[%s1661_s13 + $0xc4] ss:$12 sps:$4 sm:$0xff]   ;;  %v1570_v52 = vld [vmem:[%s1661_s13 + $0xc0] ss:$12 sps:$4 sm:$0xff]   ;;  %v1572_v54 = vld [vmem:[%s1661_s13 + $0xdc] ss:$12 sps:$4 sm:$0xff]  }
  0x1d   : > { %1323 = vmatpush3.bf16.msra.mxu0 %v1514_v9  ;;  %1492 = vmatpush3.bf16.msra.mxu1 %v1514_v9  ;;  %v1571_v53 = vld [vmem:[%s1661_s13 + $0xe0] ss:$12 sps:$4 sm:$0xff]   ;;  %v1574_v55 = vld [vmem:[%s1661_s13 + $0xf8] ss:$12 sps:$4 sm:$0xff]   ;;  %v1576_v57 = vld [vmem:[%s1661_s13 + $0x110] ss:$12 sps:$4 sm:$0xff]  }
  0x1e   : > { %1324 = vmatprep.subr.bf16.mxu0 %v1515_v10  ;;  %1485 = vmatprep.subr.bf16.mxu1 %v1515_v10  ;;  %v1575_v56 = vld [vmem:[%s1661_s13 + $0xd8] ss:$12 sps:$4 sm:$0xff]   ;;  %v1577_v58 = vld [vmem:[%s1661_s13 + $0xf4] ss:$12 sps:$4 sm:$0xff]   ;;  %v1580_v60 = vld [vmem:[%s1661_s13 + $0xf0] ss:$12 sps:$4 sm:$0xff]  }
  0x1f   : > { %v1579_v59 = vld [vmem:[%s1661_s13 + $0x128] ss:$12 sps:$4 sm:$0xff]   ;;  %v1581_v61 = vld [vmem:[%s1661_s13 + $0x140] ss:$12 sps:$4 sm:$0xff]   ;;  %v1584_v63 = vld [vmem:[%s1661_s13 + $0x158] ss:$12 sps:$4 sm:$0xff]  }
  0x20   : > { %v1582_v62 = vld [vmem:[%s1661_s13 + $0x10c] ss:$12 sps:$4 sm:$0xff]   ;;  %v1585_v0 = vld [vmem:[%s1661_s13 + $0x108] ss:$12 sps:$4 sm:$0xff]   ;;  %v1586_v1 = vld [vmem:[%s1661_s13 + $0x170] ss:$12 sps:$4 sm:$0xff]  }
  0x21   : > { %1325 = vmatpush3.bf16.msra.mxu0 %v1516_v13  ;;  %1493 = vmatpush3.bf16.msra.mxu1 %v1516_v13 }
  0x22   : > { %1326 = vmatprep.subr.bf16.mxu0 %v1517_v14  ;;  %1486 = vmatprep.subr.bf16.mxu1 %v1517_v14 }
  0x25   : > { %1327 = vmatpush3.bf16.msra.mxu0 %v1518_v15  ;;  %1494 = vmatpush3.bf16.msra.mxu1 %v1518_v15 }
  0x26   : > { %1328 = vmatprep.subr.bf16.mxu0 %v1519_v16  ;;  %1487 = vmatprep.subr.bf16.mxu1 %v1519_v16 }
  0x29   : > { %1329 = vmatpush3.bf16.msra.mxu0 %v1520_v17  ;;  %1495 = vmatpush3.bf16.msra.mxu1 %v1520_v17 }
  0x2a   : > { %1444 = vmatprep.subr.bf16.mxu1 %v1527_v18 }
  0x2c   : > { %764 = vmatmul.mubr.bf16.vlgmr.msra.gmra.mxu0 %v1521_v19  ;;  %860 = vmatmul.mubr.bf16.vlgmr.msra.gmra.mxu1 %v1524_v20 }
  0x2d   : > { %1445 = vmatpush3.bf16.msra.mxu1 %v1527_v18  ;;  %771 = vmatprep.mubr.bf16.mxu0 %v1528_v21 }
  0x2e   : > { %867 = vmatprep.mubr.bf16.mxu1 %v1530_v22  ;;  %1446 = vmatprep.subr.bf16.mxu1 %v1540_v23 }
  0x31   : > { %1447 = vmatpush3.bf16.msra.mxu1 %v1540_v23 }
  0x34   : > { %772 = vmatmul.mubr.bf16.gmra.mxu0 %v1532_v24  ;;  %868 = vmatmul.mubr.bf16.gmra.mxu1 %v1533_v25 }
  0x35   : > { %779 = vmatprep.mubr.bf16.mxu0 %v1534_v26  ;;  %875 = vmatprep.mubr.bf16.mxu1 %v1536_v27 }
  0x3c   : > { %780 = vmatmul.mubr.bf16.gmra.mxu0 %v1538_v28  ;;  %876 = vmatmul.mubr.bf16.gmra.mxu1 %v1539_v29 }
  0x3d   : > { %787 = vmatprep.mubr.bf16.mxu0 %v1541_v30  ;;  %883 = vmatprep.mubr.bf16.mxu1 %v1543_v31 }
  0x44   : > { %788 = vmatmul.mubr.bf16.gmra.mxu0 %v1545_v32  ;;  %884 = vmatmul.mubr.bf16.gmra.mxu1 %v1546_v33 }
  0x45   : > { %795 = vmatprep.mubr.bf16.mxu0 %v1547_v34  ;;  %1448 = vmatprep.mubr.msk.bf16.mxu1 %vm682_vm0, %v1549_v35 }
  0x4c   : > { %796 = vmatmul.mubr.bf16.gmra.mxu0 %v1550_v36  ;;  %1449 = vmatmul.mubr.msk.bf16.vlgmr.msra.gmra.mxu1 %vm682_vm0, %v1551_v37 }
  0x4d   : > { %803 = vmatprep.mubr.bf16.mxu0 %v1552_v38  ;;  %1452 = vmatprep.mubr.msk.bf16.mxu1 %vm682_vm0, %v1554_v39 }
  0x54   : > { %804 = vmatmul.mubr.bf16.gmra.mxu0 %v1555_v40  ;;  %1453 = vmatmul.mubr.msk.bf16.gmra.mxu1 %vm682_vm0, %v1556_v41 }
  0x55   : > { %811 = vmatprep.mubr.bf16.mxu0 %v1557_v42  ;;  %1456 = vmatprep.mubr.msk.bf16.mxu1 %vm682_vm0, %v1559_v43  ;;  %v1783_v42 = vld [vmem:[%s1939_s2] ss:$0 sm:$0xff] }
  0x5c   : > { %812 = vmatmul.mubr.bf16.gmra.mxu0 %v1560_v44  ;;  %1457 = vmatmul.mubr.msk.bf16.gmra.mxu1 %vm682_vm0, %v1561_v45 }
  0x5d   : > { %819 = vmatprep.mubr.bf16.mxu0 %v1562_v46  ;;  %1460 = vmatprep.mubr.msk.bf16.mxu1 %vm682_vm0, %v1564_v47  ;;  %v1055_v47 = vld [vmem:[%s1776_s11 + $0x10] sm:$0xff] }
  0x64   : > { %820 = vmatmul.mubr.bf16.gmra.mxu0 %v1565_v48  ;;  %1461 = vmatmul.mubr.msk.bf16.gmra.mxu1 %vm682_vm0, %v1566_v49 }
  0x65   : > { %827 = vmatprep.mubr.bf16.mxu0 %v1567_v50  ;;  %1464 = vmatprep.mubr.msk.bf16.mxu1 %vm682_vm0, %v1569_v51 }
  0x6c   : > { %828 = vmatmul.mubr.bf16.gmra.mxu0 %v1570_v52  ;;  %1465 = vmatmul.mubr.msk.bf16.gmra.mxu1 %vm682_vm0, %v1571_v53  ;;  %v1053_v53 = vld [vmem:[%s1776_s11] sm:$0xff] }
  0x6d   : > { %835 = vmatprep.mubr.bf16.mxu0 %v1572_v54  ;;  %1468 = vmatprep.mubr.msk.bf16.mxu1 %vm682_vm0, %v1574_v55 }
  0x74   : > { %836 = vmatmul.mubr.bf16.gmra.mxu0 %v1575_v56  ;;  %1469 = vmatmul.mubr.msk.bf16.gmra.mxu1 %vm682_vm0, %v1576_v57 }
  0x75   : > { %843 = vmatprep.mubr.bf16.mxu0 %v1577_v58  ;;  %1472 = vmatprep.mubr.msk.bf16.mxu1 %vm682_vm0, %v1579_v59 }
  0x7c   : > { %844 = vmatmul.mubr.bf16.gmra.mxu0 %v1580_v60  ;;  %1473 = vmatmul.mubr.msk.bf16.gmra.mxu1 %vm682_vm0, %v1581_v61  ;;  %v1056_v60 = vld [vmem:[%s1776_s11 + $0x18] sm:$0xff] }
  0x7d   : > { %851 = vmatprep.mubr.bf16.mxu0 %v1582_v62  ;;  %1476 = vmatprep.mubr.msk.bf16.mxu1 %vm682_vm0, %v1584_v63 }
  0x84   : > { %852 = vmatmul.mubr.bf16.gmra.mxu0 %v1585_v0  ;;  %1477 = vmatmul.mubr.msk.bf16.gmra.mxu1 %vm682_vm0, %v1586_v1 }
  0xec   : > { %v1330_v2 = vpop.f32.mrf.mxu0  ;;  %v1402_v3 = vpop.f32.mrf.mxu1 }
  0xee   : > { %v1331_v4 = vpop.f32.mrf.mxu0  ;;  %v1403_v5 = vpop.f32.mrf.mxu1 }
  0xef   : > { %v1754_v6 = vadd.f32 %v1403_v5, %v1402_v3  ;;  %v1332_v39 = vadd.f32 %v1331_v4, %v1330_v2  ;;  %v1054_v3 = vld [vmem:[%s1776_s11 + $0x8] sm:$0xff] }
  0xf0   : > { %v1333_v7 = vpop.f32.mrf.mxu0  ;;  %v1405_v8 = vpop.f32.mrf.mxu1 }
  0xf1   : > { %v766_v50 = vadd.f32 %v1332_v39, %v1783_v42 }
  0xf2   : > { %v1334_v9 = vpop.f32.mrf.mxu0  ;;  %v1406_v10 = vpop.f32.mrf.mxu1 }
  0xf3   : > { %v1756_v11 = vadd.f32 %v1406_v10, %v1405_v8  ;;  %v1335_v48 = vadd.f32 %v1334_v9, %v1333_v7 }
  0xf4   : > { %v1336_v12 = vpop.f32.mrf.mxu0  ;;  %v1408_v13 = vpop.f32.mrf.mxu1 }
  0xf5   : > { %v769_v0 = vadd.f32 %v1335_v48, %v1783_v42 }
  0xf6   : > { %v1337_v14 = vpop.f32.mrf.mxu0  ;;  %v1409_v15 = vpop.f32.mrf.mxu1 }
  0xf7   : > { %v1758_v16 = vadd.f32 %v1409_v15, %v1408_v13  ;;  %v1338_v36 = vadd.f32 %v1337_v14, %v1336_v12  ;;  %v1059_v12 = vld [vmem:[%s1776_s11 + $0x30] sm:$0xff] }
  0xf8   : > { %v1339_v17 = vpop.f32.mrf.mxu0  ;;  %v1411_v18 = vpop.f32.mrf.mxu1 }
  0xf9   : > { %v774_v44 = vadd.f32 %v1338_v36, %v1783_v42 }
  0xfa   : > { %v1340_v19 = vpop.f32.mrf.mxu0  ;;  %v1412_v20 = vpop.f32.mrf.mxu1 }
  0xfb   : > { %v1760_v21 = vadd.f32 %v1412_v20, %v1411_v18  ;;  %v1341_v43 = vadd.f32 %v1340_v19, %v1339_v17  ;;  %v1057_v20 = vld [vmem:[%s1776_s11 + $0x20] sm:$0xff] }
  0xfc   : > { %v1342_v22 = vpop.f32.mrf.mxu0  ;;  %v1414_v23 = vpop.f32.mrf.mxu1 }
  0xfd   : > { %v777_v57 = vadd.f32 %v1341_v43, %v1783_v42 }
  0xfe   : > { %v1343_v24 = vpop.f32.mrf.mxu0  ;;  %v1415_v25 = vpop.f32.mrf.mxu1 }
  0xff   : > { %v1762_v26 = vadd.f32 %v1415_v25, %v1414_v23  ;;  %v1344_v61 = vadd.f32 %v1343_v24, %v1342_v22 }
 0x100   : > { %v1345_v27 = vpop.f32.mrf.mxu0  ;;  %v1417_v28 = vpop.f32.mrf.mxu1 }
 0x101   : > { %v782_v17 = vadd.f32 %v1344_v61, %v1783_v42 }
 0x102   : > { %v1346_v29 = vpop.f32.mrf.mxu0  ;;  %v1418_v30 = vpop.f32.mrf.mxu1 }
 0x103   : > { %v1764_v31 = vadd.f32 %v1418_v30, %v1417_v28  ;;  %v1347_v13 = vadd.f32 %v1346_v29, %v1345_v27  ;;  %v1060_v29 = vld [vmem:[%s1776_s11 + $0x38] sm:$0xff] }
 0x104   : > { %v1348_v32 = vpop.f32.mrf.mxu0  ;;  %v1766_v33 = vpop.f32.mrf.mxu1 }
 0x105   : > { %v785_v36 = vadd.f32 %v1347_v13, %v1783_v42 }
 0x106   : > { %v1349_v34 = vpop.f32.mrf.mxu0  ;;  %v1768_v35 = vpop.f32.mrf.mxu1 }
 0x107   : > { %v1350_v54 = vadd.f32 %v1349_v34, %v1348_v32 }
 0x108   : > { %v1351_v37 = vpop.f32.mrf.mxu0  ;;  %v1771_v38 = vpop.f32.mrf.mxu1 }
 0x109   : > { %v790_v8 = vadd.f32 %v1350_v54, %v1783_v42 }
 0x10a   : > { %v1352_v40 = vpop.f32.mrf.mxu0  ;;  %v1778_v41 = vpop.f32.mrf.mxu1 }
 0x10b   : > { %v1353_v4 = vadd.f32 %v1352_v40, %v1351_v37  ;;  %v1058_v40 = vld [vmem:[%s1776_s11 + $0x28] sm:$0xff] }
 0x10c   : > { %v1354_v45 = vpop.f32.mrf.mxu0  ;;  %v1450_v46 = vpop.f32.mrf.mxu1 }
 0x10d   : > { %v935_v49 = vadd.f32 %v1450_v46, %v774_v44  ;;  %v793_v25 = vadd.f32 %v1353_v4, %v1783_v42 }
 0x10e   : > { %v1355_v51 = vpop.f32.mrf.mxu0  ;;  %v926_v52 = vpop.f32.mrf.mxu1 }
 0x10f   : > { %v1087_v55 = vadd.f32 %v1055_v47, %v935_v49  ;;  %v927_v56 = vadd.f32 %v926_v52, %v766_v50  ;;  %v1356_v30 = vadd.f32 %v1355_v51, %v1354_v45  ;;  %v1063_v49 = vld [vmem:[%s1776_s11 + $0x50] sm:$0xff] }
 0x110   : > { %v1357_v58 = vpop.f32.mrf.mxu0  ;;  %v1451_v59 = vpop.f32.mrf.mxu1 }
 0x111   : > { %1120 = vst.msk [vmem:[%s1791_s16 + $0x10] sm:$0xff] %vm1117_vm1, %v1087_v55  ;;  %v1085_v62 = vadd.f32 %v1053_v53, %v927_v56  ;;  %v938_v63 = vadd.f32 %v1451_v59, %v777_v57  ;;  %v798_v53 = vadd.f32 %v1356_v30, %v1783_v42  ;;  %v1061_v56 = vld [vmem:[%s1776_s11 + $0x40] sm:$0xff] }
 0x112   : > { %v1358_v1 = vpop.f32.mrf.mxu0  ;;  %v929_v2 = vpop.f32.mrf.mxu1 }
 0x113   : > { %1118 = vst.msk [vmem:[%s1791_s16] sm:$0xff] %vm1117_vm1, %v1085_v62  ;;  %v1088_v5 = vadd.f32 %v1056_v60, %v938_v63  ;;  %v930_v7 = vadd.f32 %v929_v2, %v769_v0  ;;  %v1359_v50 = vadd.f32 %v1358_v1, %v1357_v58  ;;  %v1064_v62 = vld [vmem:[%s1776_s11 + $0x58] sm:$0xff] }
 0x114   : > { %v1360_v9 = vpop.f32.mrf.mxu0  ;;  %v1454_v10 = vpop.f32.mrf.mxu1 }
 0x115   : > { %1121 = vst.msk [vmem:[%s1791_s16 + $0x18] sm:$0xff] %vm1117_vm1, %v1088_v5  ;;  %v1086_v14 = vadd.f32 %v1054_v3, %v930_v7  ;;  %v951_v15 = vadd.f32 %v1454_v10, %v790_v8  ;;  %v801_v2 = vadd.f32 %v1359_v50, %v1783_v42  ;;  %v1062_v5 = vld [vmem:[%s1776_s11 + $0x48] sm:$0xff] }
 0x116   : > { %v1361_v18 = vpop.f32.mrf.mxu0  ;;  %v942_v19 = vpop.f32.mrf.mxu1 }
 0x117   : > { %1119 = vst.msk [vmem:[%s1791_s16 + $0x8] sm:$0xff] %vm1117_vm1, %v1086_v14  ;;  %v1091_v22 = vadd.f32 %v1059_v12, %v951_v15  ;;  %v1362_v23 = vadd.f32 %v1361_v18, %v1360_v9  ;;  %v943_v24 = vadd.f32 %v942_v19, %v782_v17  ;;  %v1065_v18 = vld [vmem:[%s1776_s11 + $0x60] sm:$0xff] }
 0x118   : > { %v1363_v27 = vpop.f32.mrf.mxu0  ;;  %v1455_v28 = vpop.f32.mrf.mxu1 }
 0x119   : > { %1124 = vst.msk [vmem:[%s1791_s16 + $0x30] sm:$0xff] %vm1117_vm1, %v1091_v22  ;;  %v1089_v32 = vadd.f32 %v1057_v20, %v943_v24  ;;  %v954_v34 = vadd.f32 %v1455_v28, %v793_v25  ;;  %v806_v47 = vadd.f32 %v1362_v23, %v1783_v42  ;;  %v1067_v28 = vld [vmem:[%s1776_s11 + $0x70] sm:$0xff] }
 0x11a   : > { %v1364_v37 = vpop.f32.mrf.mxu0  ;;  %v945_v39 = vpop.f32.mrf.mxu1 }
 0x11b   : > { %1122 = vst.msk [vmem:[%s1791_s16 + $0x20] sm:$0xff] %vm1117_vm1, %v1089_v32  ;;  %v1092_v43 = vadd.f32 %v1060_v29, %v954_v34  ;;  %v1365_v44 = vadd.f32 %v1364_v37, %v1363_v27  ;;  %v946_v46 = vadd.f32 %v945_v39, %v785_v36  ;;  %v1066_v32 = vld [vmem:[%s1776_s11 + $0x68] sm:$0xff] }
 0x11c   : > { %v1366_v45 = vpop.f32.mrf.mxu0  ;;  %v1458_v48 = vpop.f32.mrf.mxu1 }
 0x11d   : > { %1125 = vst.msk [vmem:[%s1791_s16 + $0x38] sm:$0xff] %vm1117_vm1, %v1092_v43  ;;  %v1090_v51 = vadd.f32 %v1058_v40, %v946_v46  ;;  %v967_v52 = vadd.f32 %v1458_v48, %v806_v47  ;;  %v809_v60 = vadd.f32 %v1365_v44, %v1783_v42  ;;  %v1068_v47 = vld [vmem:[%s1776_s11 + $0x78] sm:$0xff] }
 0x11e   : > { %v1367_v54 = vpop.f32.mrf.mxu0  ;;  %v958_v55 = vpop.f32.mrf.mxu1 }
 0x11f   : > { %1123 = vst.msk [vmem:[%s1791_s16 + $0x28] sm:$0xff] %vm1117_vm1, %v1090_v51  ;;  %v1095_v57 = vadd.f32 %v1063_v49, %v967_v52  ;;  %v959_v59 = vadd.f32 %v958_v55, %v798_v53  ;;  %v1368_v63 = vadd.f32 %v1367_v54, %v1366_v45  ;;  %v1069_v55 = vld [vmem:[%s1776_s11 + $0x80] sm:$0xff] }
 0x120   : > { %v1369_v61 = vpop.f32.mrf.mxu0  ;;  %v1459_v58 = vpop.f32.mrf.mxu1 }
 0x121   : > { %1128 = vst.msk [vmem:[%s1791_s16 + $0x50] sm:$0xff] %vm1117_vm1, %v1095_v57  ;;  %v1093_v0 = vadd.f32 %v1061_v56, %v959_v59  ;;  %v970_v1 = vadd.f32 %v1459_v58, %v809_v60  ;;  %v814_v14 = vadd.f32 %v1368_v63, %v1783_v42 }
 0x122   : > { %v1370_v3 = vpop.f32.mrf.mxu0  ;;  %v961_v4 = vpop.f32.mrf.mxu1 }
 0x123   : > { %1126 = vst.msk [vmem:[%s1791_s16 + $0x40] sm:$0xff] %vm1117_vm1, %v1093_v0  ;;  %v1096_v7 = vadd.f32 %v1064_v62, %v970_v1  ;;  %v962_v8 = vadd.f32 %v961_v4, %v801_v2  ;;  %v1371_v12 = vadd.f32 %v1370_v3, %v1369_v61  ;;  %v1070_v0 = vld [vmem:[%s1776_s11 + $0x88] sm:$0xff] }
 0x124   : > { %v1372_v9 = vpop.f32.mrf.mxu0  ;;  %v1462_v10 = vpop.f32.mrf.mxu1 }
 0x125   : > { %1129 = vst.msk [vmem:[%s1791_s16 + $0x58] sm:$0xff] %vm1117_vm1, %v1096_v7  ;;  %v1094_v13 = vadd.f32 %v1062_v5, %v962_v8  ;;  %v817_v27 = vadd.f32 %v1371_v12, %v1783_v42 }
 0x126   : > { %v1373_v15 = vpop.f32.mrf.mxu0  ;;  %v974_v17 = vpop.f32.mrf.mxu1 }
 0x127   : > { %1127 = vst.msk [vmem:[%s1791_s16 + $0x48] sm:$0xff] %vm1117_vm1, %v1094_v13  ;;  %v1374_v19 = vadd.f32 %v1373_v15, %v1372_v9  ;;  %v975_v20 = vadd.f32 %v974_v17, %v814_v14  ;;  %v870_v17 = vadd.f32 %v1758_v16, %v1783_v42  ;;  %v873_v16 = vadd.f32 %v1760_v21, %v1783_v42 }
 0x128   : > { %v1375_v22 = vpop.f32.mrf.mxu0  ;;  %v1463_v23 = vpop.f32.mrf.mxu1 }
 0x129   : > { %v822_v24 = vadd.f32 %v1374_v19, %v1783_v42  ;;  %v1097_v25 = vadd.f32 %v1065_v18, %v975_v20  ;;  %v1079_v20 = vld [vmem:[%s1776_s11 + $0xd0] sm:$0xff] }
 0x12a   : > { %v1376_v29 = vpop.f32.mrf.mxu0  ;;  %v977_v30 = vpop.f32.mrf.mxu1 }
 0x12b   : > { %v983_v34 = vadd.f32 %v1462_v10, %v822_v24  ;;  %1130 = vst.msk [vmem:[%s1791_s16 + $0x60] sm:$0xff] %vm1117_vm1, %v1097_v25  ;;  %v1377_v36 = vadd.f32 %v1376_v29, %v1375_v22  ;;  %v978_v37 = vadd.f32 %v977_v30, %v817_v27  ;;  %v1071_v10 = vld [vmem:[%s1776_s11 + $0x90] sm:$0xff]  ;;  %v862_v25 = vadd.f32 %v1754_v6, %v1783_v42 }
 0x12c   : > { %v1378_v39 = vpop.f32.mrf.mxu0  ;;  %v1466_v40 = vpop.f32.mrf.mxu1  ;;  %v1422_v27 = vadd.f32 %v1768_v35, %v1766_v33  ;;  %v1080_v33 = vld [vmem:[%s1776_s11 + $0xd8] sm:$0xff]  ;;  %v865_v35 = vadd.f32 %v1756_v11, %v1783_v42 }
 0x12d   : > { %v1099_v43 = vadd.f32 %v1067_v28, %v983_v34  ;;  %v825_v44 = vadd.f32 %v1377_v36, %v1783_v42  ;;  %v1098_v46 = vadd.f32 %v1066_v32, %v978_v37  ;;  %v1072_v28 = vld [vmem:[%s1776_s11 + $0x98] sm:$0xff]  ;;  %v1077_v32 = vld [vmem:[%s1776_s11 + $0xc0] sm:$0xff] }
 0x12e   : > { %v1379_v45 = vpop.f32.mrf.mxu0  ;;  %v990_v48 = vpop.f32.mrf.mxu1 }
 0x12f   : > { %1132 = vst.msk [vmem:[%s1791_s16 + $0x70] sm:$0xff] %vm1117_vm1, %v1099_v43  ;;  %v986_v49 = vadd.f32 %v1463_v23, %v825_v44  ;;  %1131 = vst.msk [vmem:[%s1791_s16 + $0x68] sm:$0xff] %vm1117_vm1, %v1098_v46  ;;  %v1380_v50 = vadd.f32 %v1379_v45, %v1378_v39  ;;  %v1073_v45 = vld [vmem:[%s1776_s11 + $0xa0] sm:$0xff] }
 0x130   : > { %v1381_v51 = vpop.f32.mrf.mxu0  ;;  %v1467_v52 = vpop.f32.mrf.mxu1 }
 0x131   : > { %v1100_v53 = vadd.f32 %v1068_v47, %v986_v49  ;;  %v830_v54 = vadd.f32 %v1380_v50, %v1783_v42  ;;  %v1425_v47 = vadd.f32 %v1778_v41, %v1771_v38  ;;  %v1078_v50 = vld [vmem:[%s1776_s11 + $0xc8] sm:$0xff]  ;;  %v1083_v41 = vld [vmem:[%s1776_s11 + $0xf0] sm:$0xff] }
 0x132   : > { %v1382_v56 = vpop.f32.mrf.mxu0  ;;  %v993_v57 = vpop.f32.mrf.mxu1 }
 0x133   : > { %1133 = vst.msk [vmem:[%s1791_s16 + $0x78] sm:$0xff] %vm1117_vm1, %v1100_v53  ;;  %v991_v59 = vadd.f32 %v990_v48, %v830_v54  ;;  %v1383_v60 = vadd.f32 %v1382_v56, %v1381_v51  ;;  %v886_v51 = vadd.f32 %v1422_v27, %v1783_v42  ;;  %v878_v56 = vadd.f32 %v1762_v26, %v1783_v42 }
 0x134   : > { %v1384_v61 = vpop.f32.mrf.mxu0  ;;  %v1856_v58 = vpop.f32.mrf.mxu1 }
 0x135   : > { %v1101_v62 = vadd.f32 %v1069_v55, %v991_v59  ;;  %v833_v63 = vadd.f32 %v1383_v60, %v1783_v42 }
 0x136   : > { %v1385_v1 = vpop.f32.mrf.mxu0  ;;  %v1006_v2 = vpop.f32.mrf.mxu1 }
 0x137   : > { %1134 = vst.msk [vmem:[%s1791_s16 + $0x80] sm:$0xff] %vm1117_vm1, %v1101_v62  ;;  %v994_v3 = vadd.f32 %v993_v57, %v833_v63  ;;  %v1386_v4 = vadd.f32 %v1385_v1, %v1384_v61  ;;  %v1074_v62 = vld [vmem:[%s1776_s11 + $0xa8] sm:$0xff]  ;;  %v1081_v1 = vld [vmem:[%s1776_s11 + $0xe0] sm:$0xff] }
 0x138   : > { %v1387_v5 = vpop.f32.mrf.mxu0  ;;  %v1862_v7 = vpop.f32.mrf.mxu1 }
 0x139   : > { %v1102_v8 = vadd.f32 %v1070_v0, %v994_v3  ;;  %v838_v9 = vadd.f32 %v1386_v4, %v1783_v42 }
 0x13a   : > { %v1388_v12 = vpop.f32.mrf.mxu0  ;;  %v1009_v13 = vpop.f32.mrf.mxu1 }
 0x13b   : > { %1135 = vst.msk [vmem:[%s1791_s16 + $0x88] sm:$0xff] %vm1117_vm1, %v1102_v8  ;;  %v999_v14 = vadd.f32 %v1466_v40, %v838_v9  ;;  %v1389_v15 = vadd.f32 %v1388_v12, %v1387_v5  ;;  %v881_v12 = vadd.f32 %v1764_v31, %v1783_v42 }
 0x13c   : > { %v1390_v18 = vpop.f32.mrf.mxu0  ;;  %v1474_v19 = vpop.f32.mrf.mxu1 }
 0x13d   : > { %v1103_v22 = vadd.f32 %v1071_v10, %v999_v14  ;;  %v841_v23 = vadd.f32 %v1389_v15, %v1783_v42  ;;  %v1031_v24 = vadd.f32 %v1474_v19, %v870_v17  ;;  %v1084_v10 = vld [vmem:[%s1776_s11 + $0xf8] sm:$0xff] }
 0x13e   : > { %v1391_v29 = vpop.f32.mrf.mxu0  ;;  %v1022_v30 = vpop.f32.mrf.mxu1 }
 0x13f   : > { %1136 = vst.msk [vmem:[%s1791_s16 + $0x90] sm:$0xff] %vm1117_vm1, %v1103_v22  ;;  %v1002_v34 = vadd.f32 %v1467_v52, %v841_v23  ;;  %v1111_v36 = vadd.f32 %v1079_v20, %v1031_v24  ;;  %v1392_v37 = vadd.f32 %v1391_v29, %v1390_v18  ;;  %v1023_v39 = vadd.f32 %v1022_v30, %v862_v25  ;;  %v1075_v18 = vld [vmem:[%s1776_s11 + $0xb0] sm:$0xff]  ;;  %v1082_v22 = vld [vmem:[%s1776_s11 + $0xe8] sm:$0xff]  ;;  %v1076_v30 = vld [vmem:[%s1776_s11 + $0xb8] sm:$0xff] }
 0x140   : > { %v1393_v6 = vpop.f32.mrf.mxu0  ;;  %v1475_v40 = vpop.f32.mrf.mxu1 }
 0x141   : > { %v1104_v43 = vadd.f32 %v1072_v28, %v1002_v34  ;;  %1144 = vst.msk [vmem:[%s1791_s16 + $0xd0] sm:$0xff] %vm1117_vm1, %v1111_v36  ;;  %v846_v21 = vadd.f32 %v1392_v37, %v1783_v42  ;;  %v1109_v44 = vadd.f32 %v1077_v32, %v1023_v39  ;;  %v1034_v46 = vadd.f32 %v1475_v40, %v873_v16 }
 0x142   : > { %v1394_v48 = vpop.f32.mrf.mxu0  ;;  %v1025_v49 = vpop.f32.mrf.mxu1 }
 0x143   : > { %1137 = vst.msk [vmem:[%s1791_s16 + $0x98] sm:$0xff] %vm1117_vm1, %v1104_v43  ;;  %v1007_v11 = vadd.f32 %v1006_v2, %v846_v21  ;;  %1142 = vst.msk [vmem:[%s1791_s16 + $0xc0] sm:$0xff] %vm1117_vm1, %v1109_v44  ;;  %v1112_v52 = vadd.f32 %v1080_v33, %v1034_v46  ;;  %v1395_v53 = vadd.f32 %v1394_v48, %v1393_v6 }
 0x144   : > { %v1026_v54 = vadd.f32 %v1025_v49, %v865_v35  ;;  %v1396_v55 = vpop.f32.mrf.mxu0  ;;  %v1478_v38 = vpop.f32.mrf.mxu1  ;;  %v889_v2 = vadd.f32 %v1425_v47, %v1783_v42 }
 0x145   : > { %v1105_v57 = vadd.f32 %v1073_v45, %v1007_v11  ;;  %1145 = vst.msk [vmem:[%s1791_s16 + $0xd8] sm:$0xff] %vm1117_vm1, %v1112_v52  ;;  %v849_v59 = vadd.f32 %v1395_v53, %v1783_v42  ;;  %v1047_v61 = vadd.f32 %v1478_v38, %v886_v51 }
 0x146   : > { %v1110_v60 = vadd.f32 %v1078_v50, %v1026_v54  ;;  %v1397_v63 = vpop.f32.mrf.mxu0  ;;  %v1038_v0 = vpop.f32.mrf.mxu1 }
 0x147   : > { %1138 = vst.msk [vmem:[%s1791_s16 + $0xa0] sm:$0xff] %vm1117_vm1, %v1105_v57  ;;  %v1010_v3 = vadd.f32 %v1009_v13, %v849_v59  ;;  %v1115_v26 = vadd.f32 %v1083_v41, %v1047_v61  ;;  %v1398_v4 = vadd.f32 %v1397_v63, %v1396_v55  ;;  %v1039_v5 = vadd.f32 %v1038_v0, %v878_v56 }
 0x148   : > { %1143 = vst.msk [vmem:[%s1791_s16 + $0xc8] sm:$0xff] %vm1117_vm1, %v1110_v60  ;;  %v1399_v8 = vpop.f32.mrf.mxu0  ;;  %v1479_v9 = vpop.f32.mrf.mxu1 }
 0x149   : > { %v1106_v14 = vadd.f32 %v1074_v62, %v1010_v3  ;;  %1148 = vst.msk [vmem:[%s1791_s16 + $0xf0] sm:$0xff] %vm1117_vm1, %v1115_v26  ;;  %v854_v13 = vadd.f32 %v1398_v4, %v1783_v42  ;;  %v1113_v15 = vadd.f32 %v1081_v1, %v1039_v5  ;;  %v1050_v17 = vadd.f32 %v1479_v9, %v889_v2 }
 0x14a   : > { %v1400_v19 = vpop.f32.mrf.mxu0  ;;  %v1041_v20 = vpop.f32.mrf.mxu1 }
 0x14b   : > { %1139 = vst.msk [vmem:[%s1791_s16 + $0xa8] sm:$0xff] %vm1117_vm1, %v1106_v14  ;;  %v1015_v31 = vadd.f32 %v1856_v58, %v854_v13  ;;  %1146 = vst.msk [vmem:[%s1791_s16 + $0xe0] sm:$0xff] %vm1117_vm1, %v1113_v15  ;;  %v1116_v23 = vadd.f32 %v1084_v10, %v1050_v17  ;;  %v1401_v24 = vadd.f32 %v1400_v19, %v1399_v8 }
 0x14c   : > { %v1042_v25 = vadd.f32 %v1041_v20, %v881_v12 }
 0x14d   : > { %v1107_v27 = vadd.f32 %v1075_v18, %v1015_v31  ;;  %1149 = vst.msk [vmem:[%s1791_s16 + $0xf8] sm:$0xff] %vm1117_vm1, %v1116_v23  ;;  %v857_v28 = vadd.f32 %v1401_v24, %v1783_v42 }
 0x14e   : > { %v1114_v29 = vadd.f32 %v1082_v22, %v1042_v25 }
 0x14f   : > { %1140 = vst.msk [vmem:[%s1791_s16 + $0xb0] sm:$0xff] %vm1117_vm1, %v1107_v27  ;;  %v1018_v32 = vadd.f32 %v1862_v7, %v857_v28 }
 0x150   : > { %1147 = vst.msk [vmem:[%s1791_s16 + $0xe8] sm:$0xff] %vm1117_vm1, %v1114_v29 }
 0x151   : > { %v1108_v16 = vadd.f32 %v1076_v30, %v1018_v32 }
 0x153   : > { %1141 = vst.msk [vmem:[%s1791_s16 + $0xb8] sm:$0xff] %vm1117_vm1, %v1108_v16 }
 0x154 PF: > { %s14_s15 = sadd.s32 1, %s1593_s15  }
 0x155   : > { %p11_p4 = scmp.ge.s32.totalorder %s14_s15, 10  }
 0x157   :  { %13 = sbr.rel (!%p11_p4) target bundleno = 1 (0x1), region = 69 }

// kernel: _lambda_.13
= control target key start
LH: loop header
LB: loop body
LE: loop exit
PB: predicated region body
PF: predicated region fallthrough
CT: control target
= control target key end

     0   :  { %s784_s12 = smov 0   ;;  %s996_s0 = inlined_call_operand.vmem [shape: bf16[512,32], index: 0, kind: input, shape index: {}]   ;;  %s997_s1 = inlined_call_operand.vmem [shape: bf16[32,32], index: 1, kind: input, shape index: {}]   ;;  %s998_s2 = inlined_call_operand.vmem [shape: f32[1,32], index: 2, kind: input, shape index: {}]   ;;  %s999_s3 = inlined_call_operand.vmem [shape: f32[512,32], index: 3, kind: output, shape index: {}]  }
   0x1 LB: > { %s640_s13 = sadd.s32 4294967295, %s761_s12   ;;  %p644_p0 = scmp.ge.s32.totalorder %s761_s12, 1  ;;  %s761_s12 = sphi %s784_s12, %s13_s12  }
   0x2   : > { %p138_p1 = scmp.lt.s32.totalorder %s761_s12, 3 }
   0x4   : > { %p139_p2 = pnand %p644_p0, %p138_p1 }
   0x5   : > { %s645_s16 = sshll.u32 (!%p139_p2), %s640_s13, 5 }
   0x6   : > { %142 = sbr.rel (%p139_p2) target bundleno = 247 (0xf7), region = 32  ;;  %p163_p3 = scmp.lt.s32.totalorder (!%p139_p2), %s645_s16, 63 }
   0xb   : > { %v753_v0 = vld [vmem:[%s997_s1 + $0x8] sm:$0xff]   ;;  %v754_v1 = vld [vmem:[%s997_s1] sm:$0xff]   ;;  %s1001_s16 = smov (!%p163_p3, %s645_s16), 63  ;;  %vm342_vm0 = vcmask 261120   ;;  %v763_v5 = vmov 0  }
   0xc   : > { %704 = vmatprep.subr.bf16.mxu0 %v753_v0  ;;  %740 = vmatprep.subr.bf16.mxu1 %v753_v0  ;;  %s646_s19 = sshll.u32 %s1001_s16, 2  ;;  %s648_s23 = sshll.u32 %s1001_s16, 3 }
   0xd   : > { %705 = vmatpush3.bf16.msra.mxu0 %v753_v0  ;;  %742 = vmatpush3.bf16.msra.mxu1 %v753_v0  ;;  %s804_s22 = scalar_lea.vmem %s996_s0, %s646_s19  ;;  %s895_s28 = scalar_lea.vmem %s999_s3, %s648_s23 }
   0xe   : > { %706 = vmatprep.subr.bf16.mxu0 %v754_v1  ;;  %741 = vmatprep.subr.bf16.mxu1 %v754_v1  ;;  %v175_v2 = vld [vmem:[%s804_s22] sm:$0xf]  ;;  %v176_v3 = vld [vmem:[%s804_s22 + $0x4] sm:$0xf]  ;;  %v177_v10 = vld [vmem:[%s804_s22 + $0x8] sm:$0xf] }
   0xf   : > { %v191_v4 = vld [vmem:[%s804_s22 + $0x40] sm:$0xf]  ;;  %v207_v6 = vmax.bf16 %v763_v5, %v175_v2  ;;  %v208_v7 = vmax.bf16 %v763_v5, %v176_v3  ;;  %v192_v8 = vld [vmem:[%s804_s22 + $0x44] sm:$0xf]  ;;  %v178_v11 = vld [vmem:[%s804_s22 + $0xc] sm:$0xf]  ;;  %v209_v13 = vmax.bf16 %v763_v5, %v177_v10 }
  0x10   : > { %v223_v9 = vmax.bf16 %v763_v5, %v191_v4  ;;  %v224_v12 = vmax.bf16 %v763_v5, %v192_v8  ;;  %v210_v14 = vmax.bf16 %v763_v5, %v178_v11  ;;  %v193_v15 = vld [vmem:[%s804_s22 + $0x48] sm:$0xf]  ;;  %v194_v16 = vld [vmem:[%s804_s22 + $0x4c] sm:$0xf]  ;;  %v179_v17 = vld [vmem:[%s804_s22 + $0x10] sm:$0xf] }
  0x11   : > { %707 = vmatpush3.bf16.msra.mxu0 %v754_v1  ;;  %743 = vmatpush3.bf16.msra.mxu1 %v754_v1  ;;  %v650_v18 = vcombine.low %v207_v6, %v208_v7  ;;  %v225_v19 = vmax.bf16 %v763_v5, %v193_v15  ;;  %v226_v20 = vmax.bf16 %v763_v5, %v194_v16  ;;  %v180_v21 = vld [vmem:[%s804_s22 + $0x14] sm:$0xf]  ;;  %v195_v23 = vld [vmem:[%s804_s22 + $0x50] sm:$0xf]  ;;  %v181_v29 = vld [vmem:[%s804_s22 + $0x18] sm:$0xf] }
  0x12   : > { %v211_v22 = vmax.bf16 %v763_v5, %v179_v17  ;;  %v196_v24 = vld [vmem:[%s804_s22 + $0x54] sm:$0xf]  ;;  %v658_v25 = vcombine.low %v223_v9, %v224_v12  ;;  %v651_v26 = vcombine.low %v209_v13, %v210_v14  ;;  %v212_v27 = vmax.bf16 %v763_v5, %v180_v21  ;;  %v182_v30 = vld [vmem:[%s804_s22 + $0x1c] sm:$0xf]  ;;  %v197_v31 = vld [vmem:[%s804_s22 + $0x58] sm:$0xf] }
  0x13   : > { %v227_v28 = vmax.bf16 %v763_v5, %v195_v23  ;;  %708 = vmatprep.mubr.msk.bf16.mxu0 %vm342_vm0, %v650_v18  ;;  %v659_v32 = vcombine.low %v225_v19, %v226_v20  ;;  %v228_v33 = vmax.bf16 %v763_v5, %v196_v24  ;;  %v213_v34 = vmax.bf16 %v763_v5, %v181_v29  ;;  %v198_v35 = vld [vmem:[%s804_s22 + $0x5c] sm:$0xf]  ;;  %v183_v36 = vld [vmem:[%s804_s22 + $0x20] sm:$0xf]  ;;  %v184_v37 = vld [vmem:[%s804_s22 + $0x24] sm:$0xf] }
  0x14   : > { %724 = vmatprep.mubr.msk.bf16.mxu1 %vm342_vm0, %v658_v25  ;;  %709 = vmatmul.mubr.msk.bf16.vlgmr.msra.gmra.mxu0 %vm342_vm0, %v651_v26  ;;  %v652_v38 = vcombine.low %v211_v22, %v212_v27  ;;  %v214_v39 = vmax.bf16 %v763_v5, %v182_v30  ;;  %v229_v40 = vmax.bf16 %v763_v5, %v197_v31  ;;  %v199_v41 = vld [vmem:[%s804_s22 + $0x60] sm:$0xf]  ;;  %v200_v42 = vld [vmem:[%s804_s22 + $0x64] sm:$0xf]  ;;  %v185_v52 = vld [vmem:[%s804_s22 + $0x28] sm:$0xf] }
  0x15   : > { %725 = vmatmul.mubr.msk.bf16.vlgmr.msra.gmra.mxu1 %vm342_vm0, %v659_v32  ;;  %v660_v43 = vcombine.low %v227_v28, %v228_v33  ;;  %v230_v44 = vmax.bf16 %v763_v5, %v198_v35  ;;  %v215_v45 = vmax.bf16 %v763_v5, %v183_v36  ;;  %v216_v46 = vmax.bf16 %v763_v5, %v184_v37  ;;  %v186_v53 = vld [vmem:[%s804_s22 + $0x2c] sm:$0xf]  ;;  %v201_v54 = vld [vmem:[%s804_s22 + $0x68] sm:$0xf]  ;;  %v187_v57 = vld [vmem:[%s804_s22 + $0x30] sm:$0xf] }
  0x16   : > { %712 = vmatprep.mubr.msk.bf16.mxu0 %vm342_vm0, %v652_v38  ;;  %v231_v47 = vmax.bf16 %v763_v5, %v199_v41  ;;  %v232_v48 = vmax.bf16 %v763_v5, %v200_v42  ;;  %v653_v49 = vcombine.low %v213_v34, %v214_v39  ;;  %v202_v56 = vld [vmem:[%s804_s22 + $0x6c] sm:$0xf]  ;;  %v188_v58 = vld [vmem:[%s804_s22 + $0x34] sm:$0xf]  ;;  %v203_v59 = vld [vmem:[%s804_s22 + $0x70] sm:$0xf]  ;;  %v217_v61 = vmax.bf16 %v763_v5, %v185_v52 }
  0x17   : > { %728 = vmatprep.mubr.msk.bf16.mxu1 %vm342_vm0, %v660_v43  ;;  %v661_v50 = vcombine.low %v229_v40, %v230_v44  ;;  %v654_v51 = vcombine.low %v215_v45, %v216_v46  ;;  %v204_v60 = vld [vmem:[%s804_s22 + $0x74] sm:$0xf]  ;;  %v218_v62 = vmax.bf16 %v763_v5, %v186_v53  ;;  %v233_v63 = vmax.bf16 %v763_v5, %v201_v54  ;;  %v189_v9 = vld [vmem:[%s804_s22 + $0x38] sm:$0xf]  ;;  %v190_v10 = vld [vmem:[%s804_s22 + $0x3c] sm:$0xf] }
  0x18   : > { %v662_v55 = vcombine.low %v231_v47, %v232_v48  ;;  %v234_v0 = vmax.bf16 %v763_v5, %v202_v56  ;;  %v219_v1 = vmax.bf16 %v763_v5, %v187_v57  ;;  %v220_v2 = vmax.bf16 %v763_v5, %v188_v58  ;;  %v205_v12 = vld [vmem:[%s804_s22 + $0x78] sm:$0xf]  ;;  %v206_v13 = vld [vmem:[%s804_s22 + $0x7c] sm:$0xf]  ;;  %v890_v20 = vld [vmem:[%s998_s2] ss:$0 sm:$0xff] }
  0x19   : > { %v235_v3 = vmax.bf16 %v763_v5, %v203_v59  ;;  %v236_v4 = vmax.bf16 %v763_v5, %v204_v60  ;;  %v655_v6 = vcombine.low %v217_v61, %v218_v62  ;;  %v221_v14 = vmax.bf16 %v763_v5, %v189_v9 }
  0x1a   : > { %v663_v7 = vcombine.low %v233_v63, %v234_v0  ;;  %v656_v8 = vcombine.low %v219_v1, %v220_v2  ;;  %v222_v15 = vmax.bf16 %v763_v5, %v190_v10  ;;  %v237_v16 = vmax.bf16 %v763_v5, %v205_v12 }
  0x1b   : > { %v664_v11 = vcombine.low %v235_v3, %v236_v4  ;;  %v238_v17 = vmax.bf16 %v763_v5, %v206_v13 }
  0x1c   : > { %713 = vmatmul.mubr.msk.bf16.gmra.mxu0 %vm342_vm0, %v653_v49  ;;  %v657_v18 = vcombine.low %v221_v14, %v222_v15 }
  0x1d   : > { %729 = vmatmul.mubr.msk.bf16.gmra.mxu1 %vm342_vm0, %v661_v50  ;;  %716 = vmatprep.mubr.msk.bf16.mxu0 %vm342_vm0, %v654_v51  ;;  %v665_v19 = vcombine.low %v237_v16, %v238_v17 }
  0x1e   : > { %732 = vmatprep.mubr.msk.bf16.mxu1 %vm342_vm0, %v662_v55 }
  0x24   : > { %717 = vmatmul.mubr.msk.bf16.gmra.mxu0 %vm342_vm0, %v655_v6 }
  0x25   : > { %733 = vmatmul.mubr.msk.bf16.gmra.mxu1 %vm342_vm0, %v663_v7  ;;  %720 = vmatprep.mubr.msk.bf16.mxu0 %vm342_vm0, %v656_v8 }
  0x26   : > { %736 = vmatprep.mubr.msk.bf16.mxu1 %vm342_vm0, %v664_v11 }
  0x2c   : > { %721 = vmatmul.mubr.msk.bf16.gmra.mxu0 %vm342_vm0, %v657_v18 }
  0x2d   : > { %737 = vmatmul.mubr.msk.bf16.gmra.mxu1 %vm342_vm0, %v665_v19 }
  0xd4   : > { %v710_v5 = vpop.f32.mrf.mxu0 }
  0xd5   : > { %v434_v21 = vadd.f32 %v710_v5, %v890_v20  ;;  %v726_v22 = vpop.f32.mrf.mxu1 }
  0xd6   : > { %v498_v23 = vadd.f32 %v726_v22, %v890_v20  ;;  %v425_v24 = vpop.f32.mrf.mxu0 }
  0xd7   : > { %554 = vst.msk [vmem:[%s895_s28 + $0x10] sm:$0xff] %vm342_vm0, %v434_v21  ;;  %v426_v25 = vadd.f32 %v890_v20, %v425_v24  ;;  %v489_v26 = vpop.f32.mrf.mxu1 }
  0xd8   : > { %570 = vst.msk [vmem:[%s895_s28 + $0x90] sm:$0xff] %vm342_vm0, %v498_v23  ;;  %v490_v27 = vadd.f32 %v890_v20, %v489_v26  ;;  %v711_v28 = vpop.f32.mrf.mxu0 }
  0xd9   : > { %552 = vst.msk [vmem:[%s895_s28] sm:$0xff] %vm342_vm0, %v426_v25  ;;  %v437_v29 = vadd.f32 %v711_v28, %v890_v20  ;;  %v727_v30 = vpop.f32.mrf.mxu1 }
  0xda   : > { %568 = vst.msk [vmem:[%s895_s28 + $0x80] sm:$0xff] %vm342_vm0, %v490_v27  ;;  %v501_v31 = vadd.f32 %v727_v30, %v890_v20  ;;  %v428_v32 = vpop.f32.mrf.mxu0 }
  0xdb   : > { %555 = vst.msk [vmem:[%s895_s28 + $0x18] sm:$0xff] %vm342_vm0, %v437_v29  ;;  %v429_v33 = vadd.f32 %v890_v20, %v428_v32  ;;  %v492_v34 = vpop.f32.mrf.mxu1 }
  0xdc   : > { %571 = vst.msk [vmem:[%s895_s28 + $0x98] sm:$0xff] %vm342_vm0, %v501_v31  ;;  %v493_v35 = vadd.f32 %v890_v20, %v492_v34  ;;  %v714_v36 = vpop.f32.mrf.mxu0 }
  0xdd   : > { %553 = vst.msk [vmem:[%s895_s28 + $0x8] sm:$0xff] %vm342_vm0, %v429_v33  ;;  %v450_v37 = vadd.f32 %v714_v36, %v890_v20  ;;  %v730_v38 = vpop.f32.mrf.mxu1 }
  0xde   : > { %569 = vst.msk [vmem:[%s895_s28 + $0x88] sm:$0xff] %vm342_vm0, %v493_v35  ;;  %v514_v39 = vadd.f32 %v730_v38, %v890_v20  ;;  %v441_v40 = vpop.f32.mrf.mxu0 }
  0xdf   : > { %558 = vst.msk [vmem:[%s895_s28 + $0x30] sm:$0xff] %vm342_vm0, %v450_v37  ;;  %v442_v41 = vadd.f32 %v890_v20, %v441_v40  ;;  %v505_v42 = vpop.f32.mrf.mxu1 }
  0xe0   : > { %574 = vst.msk [vmem:[%s895_s28 + $0xb0] sm:$0xff] %vm342_vm0, %v514_v39  ;;  %v506_v43 = vadd.f32 %v890_v20, %v505_v42  ;;  %v715_v44 = vpop.f32.mrf.mxu0 }
  0xe1   : > { %556 = vst.msk [vmem:[%s895_s28 + $0x20] sm:$0xff] %vm342_vm0, %v442_v41  ;;  %v453_v45 = vadd.f32 %v715_v44, %v890_v20  ;;  %v731_v46 = vpop.f32.mrf.mxu1 }
  0xe2   : > { %572 = vst.msk [vmem:[%s895_s28 + $0xa0] sm:$0xff] %vm342_vm0, %v506_v43  ;;  %v517_v47 = vadd.f32 %v731_v46, %v890_v20  ;;  %v444_v48 = vpop.f32.mrf.mxu0 }
  0xe3   : > { %559 = vst.msk [vmem:[%s895_s28 + $0x38] sm:$0xff] %vm342_vm0, %v453_v45  ;;  %v445_v49 = vadd.f32 %v890_v20, %v444_v48  ;;  %v508_v50 = vpop.f32.mrf.mxu1 }
  0xe4   : > { %575 = vst.msk [vmem:[%s895_s28 + $0xb8] sm:$0xff] %vm342_vm0, %v517_v47  ;;  %v509_v51 = vadd.f32 %v890_v20, %v508_v50  ;;  %v718_v52 = vpop.f32.mrf.mxu0 }
  0xe5   : > { %557 = vst.msk [vmem:[%s895_s28 + $0x28] sm:$0xff] %vm342_vm0, %v445_v49  ;;  %v466_v53 = vadd.f32 %v718_v52, %v890_v20  ;;  %v734_v54 = vpop.f32.mrf.mxu1 }
  0xe6   : > { %573 = vst.msk [vmem:[%s895_s28 + $0xa8] sm:$0xff] %vm342_vm0, %v509_v51  ;;  %v530_v55 = vadd.f32 %v734_v54, %v890_v20  ;;  %v457_v56 = vpop.f32.mrf.mxu0 }
  0xe7   : > { %562 = vst.msk [vmem:[%s895_s28 + $0x50] sm:$0xff] %vm342_vm0, %v466_v53  ;;  %v458_v57 = vadd.f32 %v890_v20, %v457_v56  ;;  %v521_v58 = vpop.f32.mrf.mxu1 }
  0xe8   : > { %578 = vst.msk [vmem:[%s895_s28 + $0xd0] sm:$0xff] %vm342_vm0, %v530_v55  ;;  %v522_v59 = vadd.f32 %v890_v20, %v521_v58  ;;  %v719_v60 = vpop.f32.mrf.mxu0 }
  0xe9   : > { %560 = vst.msk [vmem:[%s895_s28 + $0x40] sm:$0xff] %vm342_vm0, %v458_v57  ;;  %v469_v61 = vadd.f32 %v719_v60, %v890_v20  ;;  %v735_v62 = vpop.f32.mrf.mxu1 }
  0xea   : > { %576 = vst.msk [vmem:[%s895_s28 + $0xc0] sm:$0xff] %vm342_vm0, %v522_v59  ;;  %v533_v63 = vadd.f32 %v735_v62, %v890_v20  ;;  %v460_v0 = vpop.f32.mrf.mxu0 }
  0xeb   : > { %563 = vst.msk [vmem:[%s895_s28 + $0x58] sm:$0xff] %vm342_vm0, %v469_v61  ;;  %v461_v1 = vadd.f32 %v890_v20, %v460_v0  ;;  %v524_v2 = vpop.f32.mrf.mxu1 }
  0xec   : > { %579 = vst.msk [vmem:[%s895_s28 + $0xd8] sm:$0xff] %vm342_vm0, %v533_v63  ;;  %v525_v3 = vadd.f32 %v890_v20, %v524_v2  ;;  %v722_v4 = vpop.f32.mrf.mxu0 }
  0xed   : > { %561 = vst.msk [vmem:[%s895_s28 + $0x48] sm:$0xff] %vm342_vm0, %v461_v1  ;;  %v482_v6 = vadd.f32 %v722_v4, %v890_v20  ;;  %v738_v7 = vpop.f32.mrf.mxu1 }
  0xee   : > { %577 = vst.msk [vmem:[%s895_s28 + $0xc8] sm:$0xff] %vm342_vm0, %v525_v3  ;;  %v546_v8 = vadd.f32 %v738_v7, %v890_v20  ;;  %v473_v9 = vpop.f32.mrf.mxu0 }
  0xef   : > { %566 = vst.msk [vmem:[%s895_s28 + $0x70] sm:$0xff] %vm342_vm0, %v482_v6  ;;  %v474_v10 = vadd.f32 %v890_v20, %v473_v9  ;;  %v537_v11 = vpop.f32.mrf.mxu1 }
  0xf0   : > { %582 = vst.msk [vmem:[%s895_s28 + $0xf0] sm:$0xff] %vm342_vm0, %v546_v8  ;;  %v538_v12 = vadd.f32 %v890_v20, %v537_v11  ;;  %v723_v13 = vpop.f32.mrf.mxu0 }
  0xf1   : > { %564 = vst.msk [vmem:[%s895_s28 + $0x60] sm:$0xff] %vm342_vm0, %v474_v10  ;;  %v485_v14 = vadd.f32 %v723_v13, %v890_v20  ;;  %v739_v15 = vpop.f32.mrf.mxu1 }
  0xf2   : > { %580 = vst.msk [vmem:[%s895_s28 + $0xe0] sm:$0xff] %vm342_vm0, %v538_v12  ;;  %v549_v16 = vadd.f32 %v739_v15, %v890_v20  ;;  %v476_v17 = vpop.f32.mrf.mxu0 }
  0xf3   : > { %567 = vst.msk [vmem:[%s895_s28 + $0x78] sm:$0xff] %vm342_vm0, %v485_v14  ;;  %v477_v18 = vadd.f32 %v890_v20, %v476_v17  ;;  %v540_v19 = vpop.f32.mrf.mxu1 }
  0xf4   : > { %583 = vst.msk [vmem:[%s895_s28 + $0xf8] sm:$0xff] %vm342_vm0, %v549_v16  ;;  %v541_v5 = vadd.f32 %v890_v20, %v540_v19 }
  0xf5   : > { %565 = vst.msk [vmem:[%s895_s28 + $0x68] sm:$0xff] %vm342_vm0, %v477_v18 }
  0xf6   : > { %581 = vst.msk [vmem:[%s895_s28 + $0xe8] sm:$0xff] %vm342_vm0, %v541_v5 }
  0xf7 PF: > { %s13_s12 = sadd.s32 1, %s761_s12  }
  0xf8   : > { %p10_p4 = scmp.ge.s32.totalorder %s13_s12, 4  }
  0xfa   :  { %12 = sbr.rel (!%p10_p4) target bundleno = 1 (0x1), region = 62 }

// kernel: _lambda_.12
= control target key start
LH: loop header
LB: loop body
LE: loop exit
PB: predicated region body
PF: predicated region fallthrough
CT: control target
= control target key end

     0   :  { %s1124_s12 = smov 0   ;;  %s1415_s0 = inlined_call_operand.vmem [shape: bf16[512,144], index: 0, kind: input, shape index: {}]   ;;  %s1416_s1 = inlined_call_operand.vmem [shape: bf16[144,64], index: 1, kind: input, shape index: {}]   ;;  %s1417_s2 = inlined_call_operand.vmem [shape: f32[1,64], index: 2, kind: input, shape index: {}]   ;;  %s1418_s3 = inlined_call_operand.vmem [shape: bf16[512,64], index: 3, kind: output, shape index: {}]  }
   0x1 LB: > { %s924_s13 = sadd.s32 4294967295, %s1101_s12   ;;  %p928_p0 = scmp.ge.s32.totalorder %s1101_s12, 1  ;;  %s1101_s12 = sphi %s1124_s12, %s13_s12  }
   0x2   : > { %p139_p1 = scmp.lt.s32.totalorder %s1101_s12, 3 }
   0x4   : > { %p140_p2 = pnand %p928_p0, %p139_p1 }
   0x5   : > { %s929_s16 = sshll.u32 (!%p140_p2), %s924_s13, 5 }
   0x6   : > { %143 = sbr.rel (%p140_p2) target bundleno = 308 (0x134), region = 32  ;;  %p165_p3 = scmp.lt.s32.totalorder (!%p140_p2), %s929_s16, 63 }
   0xb   : > { %v1086_v0 = vld [vmem:[%s1416_s1 + $0x38] sm:$0xff]   ;;  %v1103_v1 = vmov 0   ;;  %v1087_v2 = vld [vmem:[%s1416_s1 + $0x30] sm:$0xff]   ;;  %s1420_s16 = smov (!%p165_p3, %s929_s16), 63  ;;  %v1088_v3 = vld [vmem:[%s1416_s1 + $0x28] sm:$0xff]   ;;  %vm465_vm0 = vcmask 130048  }
   0xc   : > { %514 = vmatprep.subr.bf16.mxu0 %v1103_v1  ;;  %1059 = vmatprep.subr.bf16.mxu1 %v1103_v1  ;;  %s1026_s21 = sshll.u32 %s1420_s16, 3  ;;  %v1089_v7 = vld [vmem:[%s1416_s1 + $0x20] sm:$0xff]   ;;  %v1090_v15 = vld [vmem:[%s1416_s1 + $0x18] sm:$0xff]   ;;  %v1091_v16 = vld [vmem:[%s1416_s1 + $0x10] sm:$0xff]   ;;  %s933_s13 = sshll.u32 %s1420_s16, 2  ;;  %vm835_vm1 = vcmask 519168  }
   0xd   : > { %515 = vmatpush1.bf16.msra.mxu0 %v1086_v0  ;;  %1068 = vmatpush1.bf16.msra.mxu1 %v1086_v0  ;;  %s1153_s24 = scalar_lea.vmem %s1415_s0, %s1026_s21  ;;  %v1092_v17 = vld [vmem:[%s1416_s1 + $0x8] sm:$0xff]   ;;  %v1093_v25 = vld [vmem:[%s1416_s1] sm:$0xff]   ;;  %s1316_s17 = scalar_lea.vmem %s1418_s3, %s933_s13 }
   0xe   : > { %516 = vmatprep.subr.bf16.mxu0 %v1103_v1  ;;  %1060 = vmatprep.subr.bf16.mxu1 %v1103_v1  ;;  %v178_v4 = vld [vmem:[%s1153_s24] sm:$0xff]  ;;  %v179_v5 = vld [vmem:[%s1153_s24 + $0x8] sm:$0xff]  ;;  %v192_v18 = vld [vmem:[%s1153_s24 + $0x70] sm:$0xff] }
   0xf   : > { %v194_v6 = vld [vmem:[%s1153_s24 + $0x80] sm:$0xff]  ;;  %v1162_v8 = vmax.bf16 %v1103_v1, %v178_v4  ;;  %v1165_v9 = vmax.bf16 %v1103_v1, %v179_v5  ;;  %v195_v10 = vld [vmem:[%s1153_s24 + $0x88] sm:$0xff]  ;;  %v193_v19 = vld [vmem:[%s1153_s24 + $0x78] sm:$0xff]  ;;  %v1199_v22 = vmax.bf16 %v1103_v1, %v192_v18 }
  0x10   : > { %v1169_v11 = vmax.bf16 %v1103_v1, %v194_v6  ;;  %v227_v12 = vmax.bf16 %v1103_v1, %v195_v10  ;;  %v208_v20 = vld [vmem:[%s1153_s24 + $0xf0] sm:$0xff]  ;;  %v209_v21 = vld [vmem:[%s1153_s24 + $0xf8] sm:$0xff]  ;;  %v1202_v23 = vmax.bf16 %v1103_v1, %v193_v19  ;;  %v1094_v36 = vld [vmem:[%s1416_s1 + $0x40] sm:$0xff]  }
  0x11   : > { %517 = vmatpush1.bf16.msra.mxu0 %v1087_v2  ;;  %1069 = vmatpush1.bf16.msra.mxu1 %v1087_v2  ;;  %v936_v13 = vcombine.high %v1162_v8, %v1165_v9  ;;  %v1205_v24 = vmax.bf16 %v1103_v1, %v208_v20  ;;  %v180_v26 = vld [vmem:[%s1153_s24 + $0x10] sm:$0xff]  ;;  %v1212_v27 = vmax.bf16 %v1103_v1, %v209_v21  ;;  %v181_v28 = vld [vmem:[%s1153_s24 + $0x18] sm:$0xff]  ;;  %v182_v44 = vld [vmem:[%s1153_s24 + $0x20] sm:$0xff] }
  0x12   : > { %518 = vmatprep.subr.bf16.mxu0 %v1103_v1  ;;  %1061 = vmatprep.subr.bf16.mxu1 %v1103_v1  ;;  %v952_v14 = vcombine.high %v1169_v11, %v227_v12  ;;  %v196_v29 = vld [vmem:[%s1153_s24 + $0x90] sm:$0xff]  ;;  %v197_v30 = vld [vmem:[%s1153_s24 + $0x98] sm:$0xff]  ;;  %v950_v31 = vcombine.high %v1199_v22, %v1202_v23  ;;  %v949_v33 = vcombine.low %v1199_v22, %v1202_v23  ;;  %v183_v45 = vld [vmem:[%s1153_s24 + $0x28] sm:$0xff] }
  0x13   : > { %976 = vmatprep.mubr.msk.bf16.mxu0 %vm465_vm0, %v936_v13  ;;  %v966_v32 = vcombine.high %v1205_v24, %v1212_v27  ;;  %v965_v34 = vcombine.low %v1205_v24, %v1212_v27  ;;  %v212_v35 = vmax.bf16 %v1103_v1, %v180_v26  ;;  %v213_v37 = vmax.bf16 %v1103_v1, %v181_v28  ;;  %v198_v46 = vld [vmem:[%s1153_s24 + $0xa0] sm:$0xff]  ;;  %v199_v47 = vld [vmem:[%s1153_s24 + $0xa8] sm:$0xff]  ;;  %v184_v56 = vld [vmem:[%s1153_s24 + $0x30] sm:$0xff] }
  0x14   : > { %984 = vmatprep.mubr.msk.bf16.mxu1 %vm465_vm0, %v952_v14  ;;  %v228_v38 = vmax.bf16 %v1103_v1, %v196_v29  ;;  %v229_v39 = vmax.bf16 %v1103_v1, %v197_v30  ;;  %v935_v40 = vcombine.low %v1162_v8, %v1165_v9  ;;  %v951_v41 = vcombine.low %v1169_v11, %v227_v12  ;;  %v185_v57 = vld [vmem:[%s1153_s24 + $0x38] sm:$0xff]  ;;  %v200_v58 = vld [vmem:[%s1153_s24 + $0xb0] sm:$0xff]  ;;  %v186_v5 = vld [vmem:[%s1153_s24 + $0x40] sm:$0xff] }
  0x15   : > { %519 = vmatpush1.bf16.msra.mxu0 %v1088_v3  ;;  %1070 = vmatpush1.bf16.msra.mxu1 %v1088_v3  ;;  %v938_v42 = vcombine.high %v212_v35, %v213_v37  ;;  %v214_v48 = vmax.bf16 %v1103_v1, %v182_v44  ;;  %v215_v49 = vmax.bf16 %v1103_v1, %v183_v45  ;;  %v201_v59 = vld [vmem:[%s1153_s24 + $0xb8] sm:$0xff]  ;;  %v187_v6 = vld [vmem:[%s1153_s24 + $0x48] sm:$0xff]  ;;  %v204_v19 = vld [vmem:[%s1153_s24 + $0xd0] sm:$0xff] }
  0x16   : > { %520 = vmatprep.subr.bf16.mxu0 %v1103_v1  ;;  %1062 = vmatprep.subr.bf16.mxu1 %v1103_v1  ;;  %v954_v43 = vcombine.high %v228_v38, %v229_v39  ;;  %v230_v50 = vmax.bf16 %v1103_v1, %v198_v46  ;;  %v231_v51 = vmax.bf16 %v1103_v1, %v199_v47  ;;  %v203_v8 = vld [vmem:[%s1153_s24 + $0xc8] sm:$0xff]  ;;  %v189_v18 = vld [vmem:[%s1153_s24 + $0x58] sm:$0xff] }
  0x17   : > { %v937_v52 = vcombine.low %v212_v35, %v213_v37  ;;  %v953_v53 = vcombine.low %v228_v38, %v229_v39  ;;  %v940_v54 = vcombine.high %v214_v48, %v215_v49  ;;  %v216_v60 = vmax.bf16 %v1103_v1, %v184_v56  ;;  %v205_v20 = vld [vmem:[%s1153_s24 + $0xd8] sm:$0xff]  ;;  %v190_v37 = vld [vmem:[%s1153_s24 + $0x60] sm:$0xff]  ;;  %v191_v38 = vld [vmem:[%s1153_s24 + $0x68] sm:$0xff] }
  0x18   : > { %v956_v55 = vcombine.high %v230_v50, %v231_v51  ;;  %v217_v61 = vmax.bf16 %v1103_v1, %v185_v57  ;;  %v232_v62 = vmax.bf16 %v1103_v1, %v200_v58  ;;  %v233_v63 = vmax.bf16 %v1103_v1, %v201_v59  ;;  %v206_v39 = vld [vmem:[%s1153_s24 + $0xe0] sm:$0xff] }
  0x19   : > { %521 = vmatpush1.bf16.msra.mxu0 %v1089_v7  ;;  %1071 = vmatpush1.bf16.msra.mxu1 %v1089_v7  ;;  %v939_v0 = vcombine.low %v214_v48, %v215_v49  ;;  %v955_v2 = vcombine.low %v230_v50, %v231_v51  ;;  %v202_v7 = vld [vmem:[%s1153_s24 + $0xc0] sm:$0xff]  ;;  %v218_v9 = vmax.bf16 %v1103_v1, %v186_v5 }
  0x1a   : > { %522 = vmatprep.subr.bf16.mxu0 %v1103_v1  ;;  %1063 = vmatprep.subr.bf16.mxu1 %v1103_v1  ;;  %v942_v3 = vcombine.high %v216_v60, %v217_v61  ;;  %v958_v4 = vcombine.high %v232_v62, %v233_v63  ;;  %v219_v10 = vmax.bf16 %v1103_v1, %v187_v6 }
  0x1b   : > { %v234_v11 = vmax.bf16 %v1103_v1, %v202_v7  ;;  %v235_v12 = vmax.bf16 %v1103_v1, %v203_v8  ;;  %v941_v13 = vcombine.low %v216_v60, %v217_v61  ;;  %v957_v14 = vcombine.low %v232_v62, %v233_v63 }
  0x1c   : > { %v236_v26 = vmax.bf16 %v1103_v1, %v204_v19  ;;  %v237_v28 = vmax.bf16 %v1103_v1, %v205_v20  ;;  %v943_v29 = vcombine.low %v218_v9, %v219_v10 }
  0x1d   : > { %523 = vmatpush1.bf16.msra.mxu0 %v1090_v15  ;;  %1072 = vmatpush1.bf16.msra.mxu1 %v1090_v15  ;;  %v944_v15 = vcombine.high %v218_v9, %v219_v10  ;;  %v959_v30 = vcombine.low %v234_v11, %v235_v12 }
  0x1e   : > { %524 = vmatprep.subr.bf16.mxu0 %v1103_v1  ;;  %1064 = vmatprep.subr.bf16.mxu1 %v1103_v1  ;;  %v961_v46 = vcombine.low %v236_v26, %v237_v28 }
  0x21   : > { %525 = vmatpush1.bf16.msra.mxu0 %v1091_v16  ;;  %1073 = vmatpush1.bf16.msra.mxu1 %v1091_v16  ;;  %v960_v16 = vcombine.high %v234_v11, %v235_v12 }
  0x22   : > { %526 = vmatprep.subr.bf16.mxu0 %v1103_v1  ;;  %1065 = vmatprep.subr.bf16.mxu1 %v1103_v1 }
  0x25   : > { %527 = vmatpush1.bf16.msra.mxu0 %v1092_v17  ;;  %1074 = vmatpush1.bf16.msra.mxu1 %v1092_v17  ;;  %v188_v17 = vld [vmem:[%s1153_s24 + $0x50] sm:$0xff] }
  0x26   : > { %528 = vmatprep.subr.bf16.mxu0 %v1103_v1  ;;  %1066 = vmatprep.subr.bf16.mxu1 %v1103_v1  ;;  %v220_v21 = vmax.bf16 %v1103_v1, %v188_v17 }
  0x29   : > { %529 = vmatpush1.bf16.msra.mxu0 %v1093_v25  ;;  %1075 = vmatpush1.bf16.msra.mxu1 %v1093_v25  ;;  %v221_v25 = vmax.bf16 %v1103_v1, %v189_v18 }
  0x2a   : > { %544 = vmatprep.subr.bf16.mxu0 %v1103_v1  ;;  %1067 = vmatprep.subr.bf16.mxu1 %v1103_v1 }
  0x2b   : > { %v946_v35 = vcombine.high %v220_v21, %v221_v25  ;;  %v945_v45 = vcombine.low %v220_v21, %v221_v25 }
  0x2d   : > { %545 = vmatpush2.bf16.msra.mxu0 %v1094_v36  ;;  %1076 = vmatpush2.bf16.msra.mxu1 %v1094_v36  ;;  %v962_v36 = vcombine.high %v236_v26, %v237_v28 }
  0x30   : > { %547 = vmatmul.mubr.bf16.vlgmr.msra.gmra.mxu0 %v935_v40  ;;  %611 = vmatmul.mubr.bf16.vlgmr.msra.gmra.mxu1 %v951_v41  ;;  %v207_v40 = vld [vmem:[%s1153_s24 + $0xe8] sm:$0xff]  ;;  %v222_v41 = vmax.bf16 %v1103_v1, %v190_v37 }
  0x31   : > { %977 = vmatprep.mubr.msk.bf16.mxu0 %vm465_vm0, %v938_v42  ;;  %985 = vmatprep.mubr.msk.bf16.mxu1 %vm465_vm0, %v954_v43  ;;  %v223_v42 = vmax.bf16 %v1103_v1, %v191_v38  ;;  %v238_v43 = vmax.bf16 %v1103_v1, %v206_v39  ;;  %v239_v44 = vmax.bf16 %v1103_v1, %v207_v40  ;;  %v1308_v1 = vld [vmem:[%s1417_s2] ss:$0 sm:$0xff] }
  0x33   : > { %v948_v47 = vcombine.high %v222_v41, %v223_v42  ;;  %v964_v48 = vcombine.high %v238_v43, %v239_v44  ;;  %v947_v49 = vcombine.low %v222_v41, %v223_v42  ;;  %v963_v50 = vcombine.low %v238_v43, %v239_v44 }
  0x38   : > { %555 = vmatmul.mubr.bf16.gmra.mxu0 %v937_v52  ;;  %619 = vmatmul.mubr.bf16.gmra.mxu1 %v953_v53 }
  0x39   : > { %978 = vmatprep.mubr.msk.bf16.mxu0 %vm465_vm0, %v940_v54  ;;  %986 = vmatprep.mubr.msk.bf16.mxu1 %vm465_vm0, %v956_v55 }
  0x40   : > { %563 = vmatmul.mubr.bf16.gmra.mxu0 %v939_v0  ;;  %627 = vmatmul.mubr.bf16.gmra.mxu1 %v955_v2 }
  0x41   : > { %979 = vmatprep.mubr.msk.bf16.mxu0 %vm465_vm0, %v942_v3  ;;  %987 = vmatprep.mubr.msk.bf16.mxu1 %vm465_vm0, %v958_v4 }
  0x48   : > { %571 = vmatmul.mubr.bf16.gmra.mxu0 %v941_v13  ;;  %635 = vmatmul.mubr.bf16.gmra.mxu1 %v957_v14 }
  0x49   : > { %980 = vmatprep.mubr.msk.bf16.mxu0 %vm465_vm0, %v944_v15  ;;  %988 = vmatprep.mubr.msk.bf16.mxu1 %vm465_vm0, %v960_v16 }
  0x50   : > { %579 = vmatmul.mubr.bf16.gmra.mxu0 %v943_v29  ;;  %643 = vmatmul.mubr.bf16.gmra.mxu1 %v959_v30 }
  0x51   : > { %981 = vmatprep.mubr.msk.bf16.mxu0 %vm465_vm0, %v946_v35  ;;  %989 = vmatprep.mubr.msk.bf16.mxu1 %vm465_vm0, %v962_v36 }
  0x58   : > { %587 = vmatmul.mubr.bf16.gmra.mxu0 %v945_v45  ;;  %651 = vmatmul.mubr.bf16.gmra.mxu1 %v961_v46 }
  0x59   : > { %982 = vmatprep.mubr.msk.bf16.mxu0 %vm465_vm0, %v948_v47  ;;  %990 = vmatprep.mubr.msk.bf16.mxu1 %vm465_vm0, %v964_v48 }
  0x60   : > { %595 = vmatmul.mubr.bf16.gmra.mxu0 %v947_v49  ;;  %659 = vmatmul.mubr.bf16.gmra.mxu1 %v963_v50 }
  0x61   : > { %983 = vmatprep.mubr.msk.bf16.mxu0 %vm465_vm0, %v950_v31  ;;  %991 = vmatprep.mubr.msk.bf16.mxu1 %vm465_vm0, %v966_v32 }
  0x68   : > { %603 = vmatmul.mubr.bf16.gmra.mxu0 %v949_v33  ;;  %667 = vmatmul.mubr.bf16.gmra.mxu1 %v965_v34 }
  0xf0   : > { %v548_v51 = vpop.f32.mrf.mxu0  ;;  %v612_v31 = vpop.f32.mrf.mxu1 }
  0xf1   : > { %v549_v52 = vadd.f32 %v1308_v1, %v548_v51  ;;  %v613_v32 = vadd.f32 %v1308_v1, %v612_v31 }
  0xf2   : > { %v550_v53 = vpop.f32.mrf.mxu0  ;;  %v614_v54 = vpop.f32.mrf.mxu1 }
  0xf3   : > { %v675_v22 = vmax.f32 %v549_v52, 0.0  ;;  %v691_v23 = vmax.f32 %v613_v32, 0.0 }
  0xf4   : > { %v551_v24 = vpop.f32.mrf.mxu0  ;;  %v615_v27 = vpop.f32.mrf.mxu1 }
  0xf5   : > { %v1027_v33 = vpack.c.bf16 %v675_v22, %v675_v22  ;;  %v1043_v34 = vpack.c.bf16 %v691_v23, %v691_v23  ;;  %v552_v55 = vadd.f32 %v1308_v1, %v551_v24  ;;  %v616_v56 = vadd.f32 %v1308_v1, %v615_v27 }
  0xf6   : > { %v553_v57 = vpop.f32.mrf.mxu0  ;;  %v617_v58 = vpop.f32.mrf.mxu1 }
  0xf7   : > { %836 = vst.msk [vmem:[%s1316_s17] sm:$0xf] %vm835_vm1, %v1027_v33  ;;  %852 = vst.msk [vmem:[%s1316_s17 + $0x40] sm:$0xf] %vm835_vm1, %v1043_v34  ;;  %v676_v59 = vmax.f32 %v552_v55, 0.0  ;;  %v692_v60 = vmax.f32 %v616_v56, 0.0 }
  0xf8   : > { %v556_v61 = vpop.f32.mrf.mxu0  ;;  %v620_v62 = vpop.f32.mrf.mxu1 }
  0xf9   : > { %v1028_v63 = vpack.c.bf16 %v676_v59, %v676_v59  ;;  %v1044_v0 = vpack.c.bf16 %v692_v60, %v692_v60  ;;  %v557_v2 = vadd.f32 %v1308_v1, %v556_v61  ;;  %v621_v3 = vadd.f32 %v1308_v1, %v620_v62 }
  0xfa   : > { %v558_v4 = vpop.f32.mrf.mxu0  ;;  %v622_v5 = vpop.f32.mrf.mxu1 }
  0xfb   : > { %837 = vst.msk [vmem:[%s1316_s17 + $0x4] sm:$0xf] %vm835_vm1, %v1028_v63  ;;  %853 = vst.msk [vmem:[%s1316_s17 + $0x44] sm:$0xf] %vm835_vm1, %v1044_v0  ;;  %v677_v6 = vmax.f32 %v557_v2, 0.0  ;;  %v693_v7 = vmax.f32 %v621_v3, 0.0 }
  0xfc   : > { %v559_v8 = vpop.f32.mrf.mxu0  ;;  %v623_v9 = vpop.f32.mrf.mxu1 }
  0xfd   : > { %v1029_v10 = vpack.c.bf16 %v677_v6, %v677_v6  ;;  %v1045_v11 = vpack.c.bf16 %v693_v7, %v693_v7  ;;  %v560_v12 = vadd.f32 %v1308_v1, %v559_v8  ;;  %v624_v13 = vadd.f32 %v1308_v1, %v623_v9 }
  0xfe   : > { %v561_v14 = vpop.f32.mrf.mxu0  ;;  %v625_v15 = vpop.f32.mrf.mxu1 }
  0xff   : > { %838 = vst.msk [vmem:[%s1316_s17 + $0x8] sm:$0xf] %vm835_vm1, %v1029_v10  ;;  %854 = vst.msk [vmem:[%s1316_s17 + $0x48] sm:$0xf] %vm835_vm1, %v1045_v11  ;;  %v678_v16 = vmax.f32 %v560_v12, 0.0  ;;  %v694_v17 = vmax.f32 %v624_v13, 0.0 }
 0x100   : > { %v564_v18 = vpop.f32.mrf.mxu0  ;;  %v628_v19 = vpop.f32.mrf.mxu1 }
 0x101   : > { %v1030_v20 = vpack.c.bf16 %v678_v16, %v678_v16  ;;  %v1046_v21 = vpack.c.bf16 %v694_v17, %v694_v17  ;;  %v565_v25 = vadd.f32 %v1308_v1, %v564_v18  ;;  %v629_v26 = vadd.f32 %v1308_v1, %v628_v19 }
 0x102   : > { %v566_v28 = vpop.f32.mrf.mxu0  ;;  %v630_v29 = vpop.f32.mrf.mxu1 }
 0x103   : > { %839 = vst.msk [vmem:[%s1316_s17 + $0xc] sm:$0xf] %vm835_vm1, %v1030_v20  ;;  %855 = vst.msk [vmem:[%s1316_s17 + $0x4c] sm:$0xf] %vm835_vm1, %v1046_v21  ;;  %v679_v30 = vmax.f32 %v565_v25, 0.0  ;;  %v695_v35 = vmax.f32 %v629_v26, 0.0 }
 0x104   : > { %v567_v36 = vpop.f32.mrf.mxu0  ;;  %v631_v37 = vpop.f32.mrf.mxu1 }
 0x105   : > { %v1031_v38 = vpack.c.bf16 %v679_v30, %v679_v30  ;;  %v1047_v39 = vpack.c.bf16 %v695_v35, %v695_v35  ;;  %v568_v40 = vadd.f32 %v1308_v1, %v567_v36  ;;  %v632_v41 = vadd.f32 %v1308_v1, %v631_v37 }
 0x106   : > { %v569_v42 = vpop.f32.mrf.mxu0  ;;  %v633_v43 = vpop.f32.mrf.mxu1 }
 0x107   : > { %840 = vst.msk [vmem:[%s1316_s17 + $0x10] sm:$0xf] %vm835_vm1, %v1031_v38  ;;  %856 = vst.msk [vmem:[%s1316_s17 + $0x50] sm:$0xf] %vm835_vm1, %v1047_v39  ;;  %v680_v44 = vmax.f32 %v568_v40, 0.0  ;;  %v696_v45 = vmax.f32 %v632_v41, 0.0 }
 0x108   : > { %v572_v46 = vpop.f32.mrf.mxu0  ;;  %v636_v47 = vpop.f32.mrf.mxu1 }
 0x109   : > { %v1032_v48 = vpack.c.bf16 %v680_v44, %v680_v44  ;;  %v1048_v49 = vpack.c.bf16 %v696_v45, %v696_v45  ;;  %v573_v50 = vadd.f32 %v1308_v1, %v572_v46  ;;  %v637_v51 = vadd.f32 %v1308_v1, %v636_v47 }
 0x10a   : > { %v574_v31 = vpop.f32.mrf.mxu0  ;;  %v638_v52 = vpop.f32.mrf.mxu1 }
 0x10b   : > { %841 = vst.msk [vmem:[%s1316_s17 + $0x14] sm:$0xf] %vm835_vm1, %v1032_v48  ;;  %857 = vst.msk [vmem:[%s1316_s17 + $0x54] sm:$0xf] %vm835_vm1, %v1048_v49  ;;  %v681_v32 = vmax.f32 %v573_v50, 0.0  ;;  %v697_v53 = vmax.f32 %v637_v51, 0.0 }
 0x10c   : > { %v575_v54 = vpop.f32.mrf.mxu0  ;;  %v639_v22 = vpop.f32.mrf.mxu1 }
 0x10d   : > { %v1033_v23 = vpack.c.bf16 %v681_v32, %v681_v32  ;;  %v1049_v24 = vpack.c.bf16 %v697_v53, %v697_v53  ;;  %v576_v27 = vadd.f32 %v1308_v1, %v575_v54  ;;  %v640_v33 = vadd.f32 %v1308_v1, %v639_v22 }
 0x10e   : > { %v577_v34 = vpop.f32.mrf.mxu0  ;;  %v641_v55 = vpop.f32.mrf.mxu1 }
 0x10f   : > { %842 = vst.msk [vmem:[%s1316_s17 + $0x18] sm:$0xf] %vm835_vm1, %v1033_v23  ;;  %858 = vst.msk [vmem:[%s1316_s17 + $0x58] sm:$0xf] %vm835_vm1, %v1049_v24  ;;  %v682_v56 = vmax.f32 %v576_v27, 0.0  ;;  %v698_v57 = vmax.f32 %v640_v33, 0.0 }
 0x110   : > { %v580_v58 = vpop.f32.mrf.mxu0  ;;  %v644_v59 = vpop.f32.mrf.mxu1 }
 0x111   : > { %v1034_v60 = vpack.c.bf16 %v682_v56, %v682_v56  ;;  %v1050_v61 = vpack.c.bf16 %v698_v57, %v698_v57  ;;  %v581_v62 = vadd.f32 %v1308_v1, %v580_v58  ;;  %v645_v63 = vadd.f32 %v1308_v1, %v644_v59 }
 0x112   : > { %v582_v0 = vpop.f32.mrf.mxu0  ;;  %v646_v2 = vpop.f32.mrf.mxu1 }
 0x113   : > { %843 = vst.msk [vmem:[%s1316_s17 + $0x1c] sm:$0xf] %vm835_vm1, %v1034_v60  ;;  %859 = vst.msk [vmem:[%s1316_s17 + $0x5c] sm:$0xf] %vm835_vm1, %v1050_v61  ;;  %v683_v3 = vmax.f32 %v581_v62, 0.0  ;;  %v699_v4 = vmax.f32 %v645_v63, 0.0 }
 0x114   : > { %v583_v5 = vpop.f32.mrf.mxu0  ;;  %v647_v6 = vpop.f32.mrf.mxu1 }
 0x115   : > { %v1035_v7 = vpack.c.bf16 %v683_v3, %v683_v3  ;;  %v1051_v8 = vpack.c.bf16 %v699_v4, %v699_v4  ;;  %v584_v9 = vadd.f32 %v1308_v1, %v583_v5  ;;  %v648_v10 = vadd.f32 %v1308_v1, %v647_v6 }
 0x116   : > { %v585_v11 = vpop.f32.mrf.mxu0  ;;  %v649_v12 = vpop.f32.mrf.mxu1 }
 0x117   : > { %844 = vst.msk [vmem:[%s1316_s17 + $0x20] sm:$0xf] %vm835_vm1, %v1035_v7  ;;  %860 = vst.msk [vmem:[%s1316_s17 + $0x60] sm:$0xf] %vm835_vm1, %v1051_v8  ;;  %v684_v13 = vmax.f32 %v584_v9, 0.0  ;;  %v700_v14 = vmax.f32 %v648_v10, 0.0 }
 0x118   : > { %v588_v15 = vpop.f32.mrf.mxu0  ;;  %v652_v16 = vpop.f32.mrf.mxu1 }
 0x119   : > { %v1036_v17 = vpack.c.bf16 %v684_v13, %v684_v13  ;;  %v1052_v18 = vpack.c.bf16 %v700_v14, %v700_v14  ;;  %v589_v19 = vadd.f32 %v1308_v1, %v588_v15  ;;  %v653_v20 = vadd.f32 %v1308_v1, %v652_v16 }
 0x11a   : > { %v590_v21 = vpop.f32.mrf.mxu0  ;;  %v654_v25 = vpop.f32.mrf.mxu1 }
 0x11b   : > { %845 = vst.msk [vmem:[%s1316_s17 + $0x24] sm:$0xf] %vm835_vm1, %v1036_v17  ;;  %861 = vst.msk [vmem:[%s1316_s17 + $0x64] sm:$0xf] %vm835_vm1, %v1052_v18  ;;  %v685_v26 = vmax.f32 %v589_v19, 0.0  ;;  %v701_v28 = vmax.f32 %v653_v20, 0.0 }
 0x11c   : > { %v591_v29 = vpop.f32.mrf.mxu0  ;;  %v655_v30 = vpop.f32.mrf.mxu1 }
 0x11d   : > { %v1037_v35 = vpack.c.bf16 %v685_v26, %v685_v26  ;;  %v1053_v36 = vpack.c.bf16 %v701_v28, %v701_v28  ;;  %v592_v37 = vadd.f32 %v1308_v1, %v591_v29  ;;  %v656_v38 = vadd.f32 %v1308_v1, %v655_v30 }
 0x11e   : > { %v593_v39 = vpop.f32.mrf.mxu0  ;;  %v657_v40 = vpop.f32.mrf.mxu1 }
 0x11f   : > { %846 = vst.msk [vmem:[%s1316_s17 + $0x28] sm:$0xf] %vm835_vm1, %v1037_v35  ;;  %862 = vst.msk [vmem:[%s1316_s17 + $0x68] sm:$0xf] %vm835_vm1, %v1053_v36  ;;  %v686_v41 = vmax.f32 %v592_v37, 0.0  ;;  %v702_v42 = vmax.f32 %v656_v38, 0.0 }
 0x120   : > { %v596_v43 = vpop.f32.mrf.mxu0  ;;  %v660_v44 = vpop.f32.mrf.mxu1 }
 0x121   : > { %v1038_v45 = vpack.c.bf16 %v686_v41, %v686_v41  ;;  %v1054_v46 = vpack.c.bf16 %v702_v42, %v702_v42  ;;  %v597_v47 = vadd.f32 %v1308_v1, %v596_v43  ;;  %v661_v48 = vadd.f32 %v1308_v1, %v660_v44 }
 0x122   : > { %v598_v49 = vpop.f32.mrf.mxu0  ;;  %v662_v50 = vpop.f32.mrf.mxu1 }
 0x123   : > { %847 = vst.msk [vmem:[%s1316_s17 + $0x2c] sm:$0xf] %vm835_vm1, %v1038_v45  ;;  %863 = vst.msk [vmem:[%s1316_s17 + $0x6c] sm:$0xf] %vm835_vm1, %v1054_v46  ;;  %v687_v51 = vmax.f32 %v597_v47, 0.0  ;;  %v703_v31 = vmax.f32 %v661_v48, 0.0 }
 0x124   : > { %v599_v52 = vpop.f32.mrf.mxu0  ;;  %v663_v32 = vpop.f32.mrf.mxu1 }
 0x125   : > { %v1039_v53 = vpack.c.bf16 %v687_v51, %v687_v51  ;;  %v1055_v54 = vpack.c.bf16 %v703_v31, %v703_v31  ;;  %v600_v22 = vadd.f32 %v1308_v1, %v599_v52  ;;  %v664_v23 = vadd.f32 %v1308_v1, %v663_v32 }
 0x126   : > { %v601_v24 = vpop.f32.mrf.mxu0  ;;  %v665_v27 = vpop.f32.mrf.mxu1 }
 0x127   : > { %848 = vst.msk [vmem:[%s1316_s17 + $0x30] sm:$0xf] %vm835_vm1, %v1039_v53  ;;  %864 = vst.msk [vmem:[%s1316_s17 + $0x70] sm:$0xf] %vm835_vm1, %v1055_v54  ;;  %v688_v33 = vmax.f32 %v600_v22, 0.0  ;;  %v704_v34 = vmax.f32 %v664_v23, 0.0 }
 0x128   : > { %v604_v55 = vpop.f32.mrf.mxu0  ;;  %v668_v56 = vpop.f32.mrf.mxu1 }
 0x129   : > { %v1040_v57 = vpack.c.bf16 %v688_v33, %v688_v33  ;;  %v1056_v58 = vpack.c.bf16 %v704_v34, %v704_v34  ;;  %v605_v59 = vadd.f32 %v1308_v1, %v604_v55  ;;  %v669_v60 = vadd.f32 %v1308_v1, %v668_v56 }
 0x12a   : > { %v606_v61 = vpop.f32.mrf.mxu0  ;;  %v670_v62 = vpop.f32.mrf.mxu1 }
 0x12b   : > { %849 = vst.msk [vmem:[%s1316_s17 + $0x34] sm:$0xf] %vm835_vm1, %v1040_v57  ;;  %865 = vst.msk [vmem:[%s1316_s17 + $0x74] sm:$0xf] %vm835_vm1, %v1056_v58  ;;  %v689_v63 = vmax.f32 %v605_v59, 0.0  ;;  %v705_v0 = vmax.f32 %v669_v60, 0.0 }
 0x12c   : > { %v607_v2 = vpop.f32.mrf.mxu0  ;;  %v671_v3 = vpop.f32.mrf.mxu1 }
 0x12d   : > { %v1041_v4 = vpack.c.bf16 %v689_v63, %v689_v63  ;;  %v1057_v5 = vpack.c.bf16 %v705_v0, %v705_v0  ;;  %v608_v6 = vadd.f32 %v1308_v1, %v607_v2  ;;  %v672_v7 = vadd.f32 %v1308_v1, %v671_v3 }
 0x12e   : > { %v609_v8 = vpop.f32.mrf.mxu0  ;;  %v673_v9 = vpop.f32.mrf.mxu1 }
 0x12f   : > { %850 = vst.msk [vmem:[%s1316_s17 + $0x38] sm:$0xf] %vm835_vm1, %v1041_v4  ;;  %866 = vst.msk [vmem:[%s1316_s17 + $0x78] sm:$0xf] %vm835_vm1, %v1057_v5  ;;  %v690_v10 = vmax.f32 %v608_v6, 0.0  ;;  %v706_v11 = vmax.f32 %v672_v7, 0.0 }
 0x131   : > { %v1042_v12 = vpack.c.bf16 %v690_v10, %v690_v10  ;;  %v1058_v13 = vpack.c.bf16 %v706_v11, %v706_v11 }
 0x133   : > { %851 = vst.msk [vmem:[%s1316_s17 + $0x3c] sm:$0xf] %vm835_vm1, %v1042_v12  ;;  %867 = vst.msk [vmem:[%s1316_s17 + $0x7c] sm:$0xf] %vm835_vm1, %v1058_v13 }
 0x134 PF: > { %s13_s12 = sadd.s32 1, %s1101_s12  }
 0x135   : > { %p10_p4 = scmp.ge.s32.totalorder %s13_s12, 4  }
 0x137   :  { %12 = sbr.rel (!%p10_p4) target bundleno = 1 (0x1), region = 62 }

// kernel: _lambda_.14
= control target key start
LH: loop header
LB: loop body
LE: loop exit
PB: predicated region body
PF: predicated region fallthrough
CT: control target
= control target key end

     0   :  { %s2351_s15 = smov 0   ;;  %s2958_s0 = inlined_call_operand.vmem [shape: bf16[512,576], index: 0, kind: input, shape index: {}]   ;;  %s2959_s1 = inlined_call_operand.vmem [shape: bf16[576,32], index: 1, kind: input, shape index: {}]   ;;  %s2960_s2 = inlined_call_operand.vmem [shape: f32[1,32], index: 2, kind: input, shape index: {}]   ;;  %s2961_s3 = inlined_call_operand.vmem [shape: f32[512,32], index: 3, kind: input, shape index: {}]   ;;  %s2962_s4 = inlined_call_operand.vmem [shape: f32[512,32], index: 4, kind: output, shape index: {}]  }
   0x1 LB: > { %s1715_s16 = sadd.s32 4294967295, %s2324_s15   ;;  %p1719_p0 = scmp.ge.s32.totalorder %s2324_s15, 1  ;;  %s2324_s15 = sphi %s2351_s15, %s14_s15  }
   0x2   : > { %p175_p1 = scmp.lt.s32.totalorder %s2324_s15, 3 }
   0x4   : > { %p176_p2 = pnand %p1719_p0, %p175_p1 }
   0x6   : > { %179 = sbr.rel (%p176_p2) target bundleno = 404 (0x194), region = 36 }
   0xb   : > { %v2170_v0 = vld [vmem:[%s2959_s1 + $0x78] sm:$0xff]   ;;  %s1720_s19 = sshll.u32 %s1715_s16, 5  ;;  %v2172_v2 = vld [vmem:[%s2959_s1 + $0x70] sm:$0xff]   ;;  %v2174_v4 = vld [vmem:[%s2959_s1 + $0x68] sm:$0xff]   ;;  %vm1018_vm0 = vcmask 523264   ;;  %vm1614_vm1 = vcmask 261120  }
   0xc   : > { %v2171_v1 = vld [vmem:[%s2959_s1 + $0x38] sm:$0xff]   ;;  %1861 = vmatprep.subr.bf16.mxu0 %v2170_v0  ;;  %2145 = vmatprep.subr.bf16.mxu1 %v2170_v0  ;;  %p208_p3 = scmp.lt.s32.totalorder %s1720_s19, 63  ;;  %v2173_v3 = vld [vmem:[%s2959_s1 + $0x30] sm:$0xff]   ;;  %v2175_v5 = vld [vmem:[%s2959_s1 + $0x28] sm:$0xff]  }
   0xd   : > { %1862 = vmatpush3.bf16.msra.mxu0 %v2171_v1  ;;  %2153 = vmatpush3.bf16.msra.mxu1 %v2171_v1  ;;  %v2176_v6 = vld [vmem:[%s2959_s1 + $0x60] sm:$0xff]   ;;  %v2178_v8 = vld [vmem:[%s2959_s1 + $0x58] sm:$0xff]   ;;  %v2180_v10 = vld [vmem:[%s2959_s1 + $0x50] sm:$0xff]  }
   0xe   : > { %1863 = vmatprep.subr.bf16.mxu0 %v2172_v2  ;;  %2146 = vmatprep.subr.bf16.mxu1 %v2172_v2  ;;  %s3004_s19 = smov (!%p208_p3, %s1720_s19), 63  ;;  %v2177_v7 = vld [vmem:[%s2959_s1 + $0x20] sm:$0xff]   ;;  %v2179_v9 = vld [vmem:[%s2959_s1 + $0x18] sm:$0xff]   ;;  %v2181_v13 = vld [vmem:[%s2959_s1 + $0x10] sm:$0xff]  }
   0xf   : > { %s2161_s6 = smul.u32 20, %s3004_s19  ;;  %v2182_v14 = vld [vmem:[%s2959_s1 + $0x48] sm:$0xff]   ;;  %v2184_v16 = vld [vmem:[%s2959_s1 + $0x40] sm:$0xff]   ;;  %v2192_v18 = vld [vmem:[%s2959_s1 + $0xf8] sm:$0xff]  }
  0x10   : > { %v2183_v15 = vld [vmem:[%s2959_s1 + $0x8] sm:$0xff]   ;;  %v2185_v17 = vld [vmem:[%s2959_s1] sm:$0xff]   ;;  %v2195_v19 = vld [vmem:[%s2959_s1 + $0x118] sm:$0xff]  }
  0x11   : > { %1864 = vmatpush3.bf16.msra.mxu0 %v2173_v3  ;;  %2154 = vmatpush3.bf16.msra.mxu1 %v2173_v3  ;;  %s2392_s13 = scalar_lea.vmem %s2958_s0, %s2161_s6  ;;  %v2193_v22 = vld [vmem:[%s2959_s1 + $0xb8] sm:$0xff]   ;;  %v2194_v23 = vld [vmem:[%s2959_s1 + $0xf0] sm:$0xff]   ;;  %v2203_v28 = vld [vmem:[%s2959_s1 + $0xe8] sm:$0xff]  }
  0x12   : > { %1865 = vmatprep.subr.bf16.mxu0 %v2174_v4  ;;  %2147 = vmatprep.subr.bf16.mxu1 %v2174_v4  ;;  %v2188_v11 = vld [vmem:[%s2392_s13 + $0x4] ss:$20 sps:$4 sm:$0xff]   ;;  %v2186_v20 = vld [vmem:[%s2392_s13] ss:$20 sps:$4 sm:$0xff]   ;;  %v2201_v27 = vld [vmem:[%s2392_s13 + $0x28] ss:$20 sps:$4 sm:$0xff]  }
  0x13   : > { %v2191_v12 = vld [vmem:[%s2392_s13 + $0x1e4] ss:$20 sps:$4 sm:$0xff]   ;;  %1099 = vmatprep.mubr.bf16.mxu0 %v2188_v11  ;;  %v2189_v21 = vld [vmem:[%s2392_s13 + $0x1e0] ss:$20 sps:$4 sm:$0xff]   ;;  %v2202_v29 = vld [vmem:[%s2392_s13 + $0x208] ss:$20 sps:$4 sm:$0xff]  }
  0x14   : > { %1195 = vmatprep.mubr.bf16.mxu1 %v2191_v12  ;;  %v2197_v24 = vld [vmem:[%s2392_s13 + $0x2c] ss:$20 sps:$4 sm:$0xff]   ;;  %v2196_v26 = vld [vmem:[%s2959_s1 + $0xb0] sm:$0xff]   ;;  %v2213_v37 = vld [vmem:[%s2959_s1 + $0xd8] sm:$0xff]  }
  0x15   : > { %1866 = vmatpush3.bf16.msra.mxu0 %v2175_v5  ;;  %2155 = vmatpush3.bf16.msra.mxu1 %v2175_v5  ;;  %v2199_v25 = vld [vmem:[%s2392_s13 + $0x20c] ss:$20 sps:$4 sm:$0xff]   ;;  %v2207_v32 = vld [vmem:[%s2392_s13 + $0x54] ss:$20 sps:$4 sm:$0xff]   ;;  %v2211_v36 = vld [vmem:[%s2392_s13 + $0x50] ss:$20 sps:$4 sm:$0xff]  }
  0x16   : > { %1867 = vmatprep.subr.bf16.mxu0 %v2176_v6  ;;  %2148 = vmatprep.subr.bf16.mxu1 %v2176_v6  ;;  %v2204_v30 = vld [vmem:[%s2959_s1 + $0xa8] sm:$0xff]   ;;  %v2205_v31 = vld [vmem:[%s2959_s1 + $0xe0] sm:$0xff]   ;;  %v2226_v35 = vld [vmem:[%s2959_s1 + $0x110] sm:$0xff]  }
  0x17   : > { %v2209_v33 = vld [vmem:[%s2392_s13 + $0x234] ss:$20 sps:$4 sm:$0xff]   ;;  %v2206_v34 = vld [vmem:[%s2959_s1 + $0xa0] sm:$0xff]   ;;  %v2214_v39 = vld [vmem:[%s2959_s1 + $0x98] sm:$0xff]  }
  0x18   : > { %v2212_v38 = vld [vmem:[%s2392_s13 + $0x230] ss:$20 sps:$4 sm:$0xff]   ;;  %v2221_v44 = vld [vmem:[%s2392_s13 + $0x78] ss:$20 sps:$4 sm:$0xff]   ;;  %v2230_v53 = vld [vmem:[%s2392_s13 + $0x8] ss:$20 sps:$4 sm:$0xff]  }
  0x19   : > { %1868 = vmatpush3.bf16.msra.mxu0 %v2177_v7  ;;  %2156 = vmatpush3.bf16.msra.mxu1 %v2177_v7  ;;  %v2215_v40 = vld [vmem:[%s2959_s1 + $0xd0] sm:$0xff]   ;;  %v2222_v45 = vld [vmem:[%s2392_s13 + $0x258] ss:$20 sps:$4 sm:$0xff]   ;;  %v2225_v49 = vld [vmem:[%s2959_s1 + $0xc0] sm:$0xff]  }
  0x1a   : > { %1869 = vmatprep.subr.bf16.mxu0 %v2178_v8  ;;  %2149 = vmatprep.subr.bf16.mxu1 %v2178_v8  ;;  %v2217_v41 = vld [vmem:[%s2392_s13 + $0x7c] ss:$20 sps:$4 sm:$0xff]   ;;  %v2223_v46 = vld [vmem:[%s2959_s1 + $0xc8] sm:$0xff]   ;;  %v2228_v50 = vld [vmem:[%s2392_s13 + $0xa4] ss:$20 sps:$4 sm:$0xff]  }
  0x1b   : > { %v2219_v42 = vld [vmem:[%s2392_s13 + $0x25c] ss:$20 sps:$4 sm:$0xff]   ;;  %v2246_v47 = vld [vmem:[%s2959_s1 + $0x108] sm:$0xff]   ;;  %v2227_v52 = vld [vmem:[%s2959_s1 + $0x80] sm:$0xff]  }
  0x1c   : > { %v2216_v43 = vld [vmem:[%s2959_s1 + $0x90] sm:$0xff]   ;;  %v2224_v48 = vld [vmem:[%s2959_s1 + $0x88] sm:$0xff]   ;;  %v2265_v56 = vld [vmem:[%s2959_s1 + $0x100] sm:$0xff]  }
  0x1d   : > { %1870 = vmatpush3.bf16.msra.mxu0 %v2179_v9  ;;  %2157 = vmatpush3.bf16.msra.mxu1 %v2179_v9  ;;  %v2232_v51 = vld [vmem:[%s2392_s13 + $0xc] ss:$20 sps:$4 sm:$0xff]   ;;  %v2236_v57 = vld [vmem:[%s2392_s13 + $0x34] ss:$20 sps:$4 sm:$0xff]   ;;  %v2239_v59 = vld [vmem:[%s2392_s13 + $0x30] ss:$20 sps:$4 sm:$0xff]  }
  0x1e   : > { %1871 = vmatprep.subr.bf16.mxu0 %v2180_v10  ;;  %2150 = vmatprep.subr.bf16.mxu1 %v2180_v10  ;;  %v2233_v54 = vld [vmem:[%s2392_s13 + $0xa0] ss:$20 sps:$4 sm:$0xff]   ;;  %v2238_v58 = vld [vmem:[%s2392_s13 + $0xc8] ss:$20 sps:$4 sm:$0xff]   ;;  %v2244_v62 = vld [vmem:[%s2392_s13 + $0xf0] ss:$20 sps:$4 sm:$0xff]  }
  0x1f   : > { %v2234_v55 = vld [vmem:[%s2392_s13 + $0xcc] ss:$20 sps:$4 sm:$0xff]   ;;  %v2240_v60 = vld [vmem:[%s2392_s13 + $0xf4] ss:$20 sps:$4 sm:$0xff]   ;;  %v2242_v61 = vld [vmem:[%s2392_s13 + $0x5c] ss:$20 sps:$4 sm:$0xff]  }
  0x20   : > { %v2245_v63 = vld [vmem:[%s2392_s13 + $0x58] ss:$20 sps:$4 sm:$0xff]   ;;  %v2247_v0 = vld [vmem:[%s2392_s13 + $0x11c] ss:$20 sps:$4 sm:$0xff]   ;;  %v2252_v3 = vld [vmem:[%s2392_s13 + $0x80] ss:$20 sps:$4 sm:$0xff]  }
  0x21   : > { %1872 = vmatpush3.bf16.msra.mxu0 %v2181_v13  ;;  %2158 = vmatpush3.bf16.msra.mxu1 %v2181_v13  ;;  %v2249_v1 = vld [vmem:[%s2392_s13 + $0x84] ss:$20 sps:$4 sm:$0xff]   ;;  %v2255_v5 = vld [vmem:[%s2392_s13 + $0xac] ss:$20 sps:$4 sm:$0xff]   ;;  %v2258_v7 = vld [vmem:[%s2392_s13 + $0xa8] ss:$20 sps:$4 sm:$0xff]  }
  0x22   : > { %1873 = vmatprep.subr.bf16.mxu0 %v2182_v14  ;;  %2151 = vmatprep.subr.bf16.mxu1 %v2182_v14  ;;  %v2251_v2 = vld [vmem:[%s2392_s13 + $0x118] ss:$20 sps:$4 sm:$0xff]   ;;  %v2257_v6 = vld [vmem:[%s2392_s13 + $0x140] ss:$20 sps:$4 sm:$0xff]   ;;  %v2263_v10 = vld [vmem:[%s2392_s13 + $0x168] ss:$20 sps:$4 sm:$0xff]  }
  0x23   : > { %v2253_v4 = vld [vmem:[%s2392_s13 + $0x144] ss:$20 sps:$4 sm:$0xff]   ;;  %v2259_v8 = vld [vmem:[%s2392_s13 + $0x16c] ss:$20 sps:$4 sm:$0xff]   ;;  %v2261_v9 = vld [vmem:[%s2392_s13 + $0xd4] ss:$20 sps:$4 sm:$0xff]  }
  0x24   : > { %v2264_v11 = vld [vmem:[%s2392_s13 + $0xd0] ss:$20 sps:$4 sm:$0xff]   ;;  %v2266_v12 = vld [vmem:[%s2392_s13 + $0x194] ss:$20 sps:$4 sm:$0xff]  }
  0x25   : > { %1874 = vmatpush3.bf16.msra.mxu0 %v2183_v15  ;;  %2159 = vmatpush3.bf16.msra.mxu1 %v2183_v15  ;;  %v2268_v13 = vld [vmem:[%s2392_s13 + $0xfc] ss:$20 sps:$4 sm:$0xff]   ;;  %v2271_v15 = vld [vmem:[%s2392_s13 + $0xf8] ss:$20 sps:$4 sm:$0xff]  }
  0x26   : > { %1875 = vmatprep.subr.bf16.mxu0 %v2184_v16  ;;  %2152 = vmatprep.subr.bf16.mxu1 %v2184_v16  ;;  %v2270_v14 = vld [vmem:[%s2392_s13 + $0x190] ss:$20 sps:$4 sm:$0xff]  }
  0x27   : > { %v2272_v16 = vld [vmem:[%s2392_s13 + $0x1bc] ss:$20 sps:$4 sm:$0xff]  }
  0x29   : > { %1876 = vmatpush3.bf16.msra.mxu0 %v2185_v17  ;;  %2160 = vmatpush3.bf16.msra.mxu1 %v2185_v17  ;;  %v2274_v17 = vld [vmem:[%s2392_s13 + $0x124] ss:$20 sps:$4 sm:$0xff]  }
  0x2a   : > { %1973 = vmatprep.subr.bf16.mxu1 %v2192_v18  ;;  %2105 = vmatprep.subr.bf16.mxu0 %v2195_v19  ;;  %v2276_v18 = vld [vmem:[%s2392_s13 + $0x1b8] ss:$20 sps:$4 sm:$0xff]  }
  0x2c   : > { %1100 = vmatmul.mubr.bf16.vlgmr.msra.gmra.mxu0 %v2186_v20  ;;  %1196 = vmatmul.mubr.bf16.vlgmr.msra.gmra.mxu1 %v2189_v21  ;;  %v2278_v20 = vld [vmem:[%s2392_s13 + $0x14c] ss:$20 sps:$4 sm:$0xff]   ;;  %v2280_v21 = vld [vmem:[%s2392_s13 + $0x10] ss:$20 sps:$4 sm:$0xff]  }
  0x2d   : > { %1974 = vmatpush3.bf16.msra.mxu1 %v2193_v22  ;;  %2106 = vmatpush3.bf16.msra.mxu0 %v2195_v19  ;;  %v2277_v19 = vld [vmem:[%s2392_s13 + $0x120] ss:$20 sps:$4 sm:$0xff]   ;;  %v2281_v22 = vld [vmem:[%s2392_s13 + $0x148] ss:$20 sps:$4 sm:$0xff]  }
  0x2e   : > { %1975 = vmatprep.subr.bf16.mxu1 %v2194_v23  ;;  %1107 = vmatprep.mubr.bf16.mxu0 %v2197_v24  ;;  %v2282_v23 = vld [vmem:[%s2392_s13 + $0x38] ss:$20 sps:$4 sm:$0xff]   ;;  %v2283_v24 = vld [vmem:[%s2392_s13 + $0x174] ss:$20 sps:$4 sm:$0xff]  }
  0x2f   : > { %1203 = vmatprep.mubr.bf16.mxu1 %v2199_v25  ;;  %2107 = vmatprep.subr.bf16.mxu0 %v2226_v35  ;;  %v2285_v25 = vld [vmem:[%s2392_s13 + $0x60] ss:$20 sps:$4 sm:$0xff]  }
  0x31   : > { %1976 = vmatpush3.bf16.msra.mxu1 %v2196_v26  ;;  %2108 = vmatpush3.bf16.msra.mxu0 %v2226_v35  ;;  %v2286_v26 = vld [vmem:[%s2392_s13 + $0x170] ss:$20 sps:$4 sm:$0xff]   ;;  %v2297_v35 = vld [vmem:[%s2392_s13 + $0x128] ss:$20 sps:$4 sm:$0xff]  }
  0x32   : > { %1977 = vmatprep.subr.bf16.mxu1 %v2203_v28  ;;  %2109 = vmatprep.subr.bf16.mxu0 %v2246_v47  ;;  %v2288_v28 = vld [vmem:[%s2392_s13 + $0x19c] ss:$20 sps:$4 sm:$0xff]  }
  0x34   : > { %1108 = vmatmul.mubr.bf16.gmra.mxu0 %v2201_v27  ;;  %1204 = vmatmul.mubr.bf16.gmra.mxu1 %v2202_v29  ;;  %v2287_v27 = vld [vmem:[%s2392_s13 + $0x88] ss:$20 sps:$4 sm:$0xff]   ;;  %v2290_v29 = vld [vmem:[%s2392_s13 + $0xb0] ss:$20 sps:$4 sm:$0xff]  }
  0x35   : > { %1978 = vmatpush3.bf16.msra.mxu1 %v2204_v30  ;;  %1115 = vmatprep.mubr.bf16.mxu0 %v2207_v32  ;;  %v2291_v30 = vld [vmem:[%s2392_s13 + $0x198] ss:$20 sps:$4 sm:$0xff]  }
  0x36   : > { %1979 = vmatprep.subr.bf16.mxu1 %v2205_v31  ;;  %1211 = vmatprep.mubr.bf16.mxu1 %v2209_v33  ;;  %v2292_v31 = vld [vmem:[%s2392_s13 + $0xd8] ss:$20 sps:$4 sm:$0xff]   ;;  %v2295_v33 = vld [vmem:[%s2392_s13 + $0x100] ss:$20 sps:$4 sm:$0xff]  }
  0x37   : > { %2110 = vmatpush3.bf16.msra.mxu0 %v2246_v47  ;;  %v2293_v32 = vld [vmem:[%s2392_s13 + $0x1c4] ss:$20 sps:$4 sm:$0xff]  }
  0x38   : > { %2111 = vmatprep.subr.bf16.mxu0 %v2265_v56  ;;  %v2312_v47 = vld [vmem:[%s2392_s13 + $0x218] ss:$20 sps:$4 sm:$0xff]  }
  0x39   : > { %1980 = vmatpush3.bf16.msra.mxu1 %v2206_v34  ;;  %v2296_v34 = vld [vmem:[%s2392_s13 + $0x1c0] ss:$20 sps:$4 sm:$0xff]  }
  0x3a   : > { %1981 = vmatprep.subr.bf16.mxu1 %v2213_v37  ;;  %v2300_v37 = vld [vmem:[%s2392_s13 + $0x150] ss:$20 sps:$4 sm:$0xff]  }
  0x3b   : > { %2112 = vmatpush3.bf16.msra.mxu0 %v2265_v56 }
  0x3c   : > { %1116 = vmatmul.mubr.bf16.gmra.mxu0 %v2211_v36  ;;  %1212 = vmatmul.mubr.bf16.gmra.mxu1 %v2212_v38  ;;  %v2298_v36 = vld [vmem:[%s2392_s13 + $0x1ec] ss:$20 sps:$4 sm:$0xff]   ;;  %v2301_v38 = vld [vmem:[%s2392_s13 + $0x1e8] ss:$20 sps:$4 sm:$0xff]  }
  0x3d   : > { %1982 = vmatpush3.bf16.msra.mxu1 %v2214_v39  ;;  %1123 = vmatprep.mubr.bf16.mxu0 %v2217_v41  ;;  %v2302_v39 = vld [vmem:[%s2392_s13 + $0x178] ss:$20 sps:$4 sm:$0xff]   ;;  %v2305_v41 = vld [vmem:[%s2392_s13 + $0x1a0] ss:$20 sps:$4 sm:$0xff]  }
  0x3e   : > { %1983 = vmatprep.subr.bf16.mxu1 %v2215_v40  ;;  %1219 = vmatprep.mubr.bf16.mxu1 %v2219_v42  ;;  %v2303_v40 = vld [vmem:[%s2392_s13 + $0x214] ss:$20 sps:$4 sm:$0xff]   ;;  %v2306_v42 = vld [vmem:[%s2392_s13 + $0x210] ss:$20 sps:$4 sm:$0xff]  }
  0x41   : > { %1984 = vmatpush3.bf16.msra.mxu1 %v2216_v43  ;;  %v2307_v43 = vld [vmem:[%s2392_s13 + $0x1c8] ss:$20 sps:$4 sm:$0xff]  }
  0x42   : > { %1985 = vmatprep.subr.bf16.mxu1 %v2223_v46  ;;  %v2311_v46 = vld [vmem:[%s2392_s13 + $0x238] ss:$20 sps:$4 sm:$0xff]  }
  0x44   : > { %1124 = vmatmul.mubr.bf16.gmra.mxu0 %v2221_v44  ;;  %1220 = vmatmul.mubr.bf16.gmra.mxu1 %v2222_v45  ;;  %v2308_v44 = vld [vmem:[%s2392_s13 + $0x23c] ss:$20 sps:$4 sm:$0xff]  }
  0x45   : > { %1986 = vmatpush3.bf16.msra.mxu1 %v2224_v48  ;;  %1131 = vmatprep.mubr.bf16.mxu0 %v2228_v50  ;;  %v2310_v45 = vld [vmem:[%s2392_s13 + $0x1f0] ss:$20 sps:$4 sm:$0xff]   ;;  %v2316_v50 = vld [vmem:[%s2392_s13 + $0x260] ss:$20 sps:$4 sm:$0xff]  }
  0x46   : > { %1987 = vmatprep.subr.bf16.mxu1 %v2225_v49  ;;  %1260 = vmatprep.mubr.bf16.mxu1 %v2232_v51  ;;  %v2313_v48 = vld [vmem:[%s2392_s13 + $0x264] ss:$20 sps:$4 sm:$0xff]   ;;  %v2315_v49 = vld [vmem:[%s2392_s13 + $0x240] ss:$20 sps:$4 sm:$0xff]   ;;  %v2317_v51 = vld [vmem:[%s2392_s13 + $0x268] ss:$20 sps:$4 sm:$0xff]  }
  0x47   : > { %s1723_s13 = sshll.u32 %s3004_s19, 3 }
  0x48   : > { %s2716_s19 = scalar_lea.vmem %s2961_s3, %s1723_s13  ;;  %s2736_s30 = scalar_lea.vmem %s2962_s4, %s1723_s13 }
  0x49   : > { %1988 = vmatpush3.bf16.msra.mxu1 %v2227_v52 }
  0x4c   : > { %1132 = vmatmul.mubr.bf16.gmra.mxu0 %v2233_v54  ;;  %1261 = vmatmul.mubr.bf16.vlgmr.msra.gmra.mxu1 %v2230_v53 }
  0x4d   : > { %1139 = vmatprep.mubr.bf16.mxu0 %v2234_v55  ;;  %1268 = vmatprep.mubr.bf16.mxu1 %v2236_v57 }
  0x54   : > { %1140 = vmatmul.mubr.bf16.gmra.mxu0 %v2238_v58  ;;  %1269 = vmatmul.mubr.bf16.gmra.mxu1 %v2239_v59 }
  0x55   : > { %1147 = vmatprep.mubr.bf16.mxu0 %v2240_v60  ;;  %1276 = vmatprep.mubr.bf16.mxu1 %v2242_v61 }
  0x5c   : > { %1148 = vmatmul.mubr.bf16.gmra.mxu0 %v2244_v62  ;;  %1277 = vmatmul.mubr.bf16.gmra.mxu1 %v2245_v63 }
  0x5d   : > { %1155 = vmatprep.mubr.bf16.mxu0 %v2247_v0  ;;  %1284 = vmatprep.mubr.bf16.mxu1 %v2249_v1 }
  0x64   : > { %1156 = vmatmul.mubr.bf16.gmra.mxu0 %v2251_v2  ;;  %1285 = vmatmul.mubr.bf16.gmra.mxu1 %v2252_v3 }
  0x65   : > { %1163 = vmatprep.mubr.bf16.mxu0 %v2253_v4  ;;  %1292 = vmatprep.mubr.bf16.mxu1 %v2255_v5 }
  0x6c   : > { %1164 = vmatmul.mubr.bf16.gmra.mxu0 %v2257_v6  ;;  %1293 = vmatmul.mubr.bf16.gmra.mxu1 %v2258_v7 }
  0x6d   : > { %1171 = vmatprep.mubr.bf16.mxu0 %v2259_v8  ;;  %1300 = vmatprep.mubr.bf16.mxu1 %v2261_v9 }
  0x74   : > { %1172 = vmatmul.mubr.bf16.gmra.mxu0 %v2263_v10  ;;  %1301 = vmatmul.mubr.bf16.gmra.mxu1 %v2264_v11 }
  0x75   : > { %1179 = vmatprep.mubr.bf16.mxu0 %v2266_v12  ;;  %1308 = vmatprep.mubr.bf16.mxu1 %v2268_v13 }
  0x7c   : > { %1180 = vmatmul.mubr.bf16.gmra.mxu0 %v2270_v14  ;;  %1309 = vmatmul.mubr.bf16.gmra.mxu1 %v2271_v15 }
  0x7d   : > { %1187 = vmatprep.mubr.bf16.mxu0 %v2272_v16  ;;  %1316 = vmatprep.mubr.bf16.mxu1 %v2274_v17 }
  0x84   : > { %1188 = vmatmul.mubr.bf16.gmra.mxu0 %v2276_v18  ;;  %1317 = vmatmul.mubr.bf16.gmra.mxu1 %v2277_v19 }
  0x85   : > { %1324 = vmatprep.mubr.bf16.mxu1 %v2278_v20  ;;  %2113 = vmatprep.mubr.msk.bf16.mxu0 %vm1018_vm0, %v2280_v21 }
  0x8c   : > { %1325 = vmatmul.mubr.bf16.gmra.mxu1 %v2281_v22  ;;  %2114 = vmatmul.mubr.msk.bf16.vlgmr.msra.gmra.mxu0 %vm1018_vm0, %v2282_v23 }
  0x8d   : > { %1332 = vmatprep.mubr.bf16.mxu1 %v2283_v24  ;;  %2117 = vmatprep.mubr.msk.bf16.mxu0 %vm1018_vm0, %v2285_v25 }
  0x94   : > { %1333 = vmatmul.mubr.bf16.gmra.mxu1 %v2286_v26  ;;  %2118 = vmatmul.mubr.msk.bf16.gmra.mxu0 %vm1018_vm0, %v2287_v27 }
  0x95   : > { %1340 = vmatprep.mubr.bf16.mxu1 %v2288_v28  ;;  %2121 = vmatprep.mubr.msk.bf16.mxu0 %vm1018_vm0, %v2290_v29 }
  0x9c   : > { %1341 = vmatmul.mubr.bf16.gmra.mxu1 %v2291_v30  ;;  %2122 = vmatmul.mubr.msk.bf16.gmra.mxu0 %vm1018_vm0, %v2292_v31 }
  0x9d   : > { %1348 = vmatprep.mubr.bf16.mxu1 %v2293_v32  ;;  %2125 = vmatprep.mubr.msk.bf16.mxu0 %vm1018_vm0, %v2295_v33 }
  0xa4   : > { %1349 = vmatmul.mubr.bf16.gmra.mxu1 %v2296_v34  ;;  %2126 = vmatmul.mubr.msk.bf16.gmra.mxu0 %vm1018_vm0, %v2297_v35 }
  0xa5   : > { %1356 = vmatprep.mubr.bf16.mxu1 %v2298_v36  ;;  %2129 = vmatprep.mubr.msk.bf16.mxu0 %vm1018_vm0, %v2300_v37 }
  0xac   : > { %1357 = vmatmul.mubr.bf16.gmra.mxu1 %v2301_v38  ;;  %2130 = vmatmul.mubr.msk.bf16.gmra.mxu0 %vm1018_vm0, %v2302_v39 }
  0xad   : > { %1364 = vmatprep.mubr.bf16.mxu1 %v2303_v40  ;;  %2133 = vmatprep.mubr.msk.bf16.mxu0 %vm1018_vm0, %v2305_v41 }
  0xb4   : > { %1365 = vmatmul.mubr.bf16.gmra.mxu1 %v2306_v42  ;;  %2134 = vmatmul.mubr.msk.bf16.gmra.mxu0 %vm1018_vm0, %v2307_v43 }
  0xb5   : > { %1372 = vmatprep.mubr.bf16.mxu1 %v2308_v44  ;;  %2137 = vmatprep.mubr.msk.bf16.mxu0 %vm1018_vm0, %v2310_v45 }
  0xbc   : > { %1373 = vmatmul.mubr.bf16.gmra.mxu1 %v2311_v46  ;;  %2138 = vmatmul.mubr.msk.bf16.gmra.mxu0 %vm1018_vm0, %v2312_v47 }
  0xbd   : > { %1380 = vmatprep.mubr.bf16.mxu1 %v2313_v48  ;;  %2141 = vmatprep.mubr.msk.bf16.mxu0 %vm1018_vm0, %v2315_v49 }
  0xc4   : > { %1381 = vmatmul.mubr.bf16.gmra.mxu1 %v2316_v50  ;;  %2142 = vmatmul.mubr.msk.bf16.gmra.mxu0 %vm1018_vm0, %v2317_v51 }
  0xec   : > { %v1877_v52 = vpop.f32.mrf.mxu0  ;;  %v1949_v53 = vpop.f32.mrf.mxu1 }
  0xee   : > { %v1878_v54 = vpop.f32.mrf.mxu0  ;;  %v1950_v55 = vpop.f32.mrf.mxu1 }
  0xef   : > { %v2571_v56 = vadd.f32 %v1878_v54, %v1877_v52  ;;  %v2573_v57 = vadd.f32 %v1950_v55, %v1949_v53 }
  0xf0   : > { %v1880_v58 = vpop.f32.mrf.mxu0  ;;  %v1952_v59 = vpop.f32.mrf.mxu1 }
  0xf1   : > { %2963 = vst [vmem:[#allocation2_spill] sm:$0xff] %v2573_v57 }
  0xf2   : > { %v1881_v60 = vpop.f32.mrf.mxu0  ;;  %v1953_v61 = vpop.f32.mrf.mxu1 }
  0xf3   : > { %v2575_v62 = vadd.f32 %v1881_v60, %v1880_v58  ;;  %v2577_v63 = vadd.f32 %v1953_v61, %v1952_v59 }
  0xf4   : > { %v1883_v0 = vpop.f32.mrf.mxu0  ;;  %v1955_v1 = vpop.f32.mrf.mxu1 }
  0xf5   : > { %2964 = vst [vmem:[#allocation3_spill] sm:$0xff] %v2577_v63 }
  0xf6   : > { %v1884_v2 = vpop.f32.mrf.mxu0  ;;  %v1956_v3 = vpop.f32.mrf.mxu1 }
  0xf7   : > { %v2579_v4 = vadd.f32 %v1884_v2, %v1883_v0  ;;  %v2581_v5 = vadd.f32 %v1956_v3, %v1955_v1 }
  0xf8   : > { %v1886_v6 = vpop.f32.mrf.mxu0  ;;  %v1958_v7 = vpop.f32.mrf.mxu1 }
  0xf9   : > { %2965 = vst [vmem:[#allocation4_spill] sm:$0xff] %v2581_v5  ;;  %v2703_v5 = vld [vmem:[%s2960_s2] ss:$0 sm:$0xff] }
  0xfa   : > { %v1887_v8 = vpop.f32.mrf.mxu0  ;;  %v1959_v9 = vpop.f32.mrf.mxu1 }
  0xfb   : > { %v2583_v10 = vadd.f32 %v1887_v8, %v1886_v6  ;;  %v2585_v11 = vadd.f32 %v1959_v9, %v1958_v7 }
  0xfc   : > { %v1889_v12 = vpop.f32.mrf.mxu0  ;;  %v1961_v13 = vpop.f32.mrf.mxu1 }
  0xfd   : > { %2966 = vst [vmem:[#allocation5_spill] sm:$0xff] %v2585_v11 }
  0xfe   : > { %v1890_v14 = vpop.f32.mrf.mxu0  ;;  %v1962_v15 = vpop.f32.mrf.mxu1 }
  0xff   : > { %v2587_v16 = vadd.f32 %v1890_v14, %v1889_v12  ;;  %v2589_v17 = vadd.f32 %v1962_v15, %v1961_v13 }
 0x100   : > { %v1892_v18 = vpop.f32.mrf.mxu0  ;;  %v1964_v19 = vpop.f32.mrf.mxu1 }
 0x101   : > { %2967 = vst [vmem:[#allocation6_spill] sm:$0xff] %v2589_v17 }
 0x102   : > { %v1893_v20 = vpop.f32.mrf.mxu0  ;;  %v1965_v21 = vpop.f32.mrf.mxu1 }
 0x103   : > { %v2591_v22 = vadd.f32 %v1893_v20, %v1892_v18  ;;  %v2593_v23 = vadd.f32 %v1965_v21, %v1964_v19 }
 0x104   : > { %v1895_v24 = vpop.f32.mrf.mxu0  ;;  %v1967_v25 = vpop.f32.mrf.mxu1 }
 0x105   : > { %2968 = vst [vmem:[#allocation7_spill] sm:$0xff] %v2593_v23 }
 0x106   : > { %v1896_v26 = vpop.f32.mrf.mxu0  ;;  %v1968_v27 = vpop.f32.mrf.mxu1 }
 0x107   : > { %v2595_v28 = vadd.f32 %v1896_v26, %v1895_v24  ;;  %v2597_v29 = vadd.f32 %v1968_v27, %v1967_v25 }
 0x108   : > { %v1898_v30 = vpop.f32.mrf.mxu0  ;;  %v1970_v31 = vpop.f32.mrf.mxu1 }
 0x109   : > { %2969 = vst [vmem:[#allocation8_spill] sm:$0xff] %v2597_v29 }
 0x10a   : > { %v1899_v32 = vpop.f32.mrf.mxu0  ;;  %v1971_v33 = vpop.f32.mrf.mxu1 }
 0x10b   : > { %v2599_v34 = vadd.f32 %v1899_v32, %v1898_v30  ;;  %v2601_v35 = vadd.f32 %v1971_v33, %v1970_v31 }
 0x10c   : > { %v1901_v36 = vpop.f32.mrf.mxu0  ;;  %v2603_v37 = vpop.f32.mrf.mxu1 }
 0x10d   : > { %2970 = vst [vmem:[#allocation9_spill] sm:$0xff] %v2601_v35 }
 0x10e   : > { %v1902_v38 = vpop.f32.mrf.mxu0  ;;  %v2605_v39 = vpop.f32.mrf.mxu1 }
 0x10f   : > { %v2607_v40 = vadd.f32 %v1902_v38, %v1901_v36 }
 0x110   : > { %v1904_v41 = vpop.f32.mrf.mxu0  ;;  %v2609_v42 = vpop.f32.mrf.mxu1 }
 0x112   : > { %v1905_v43 = vpop.f32.mrf.mxu0  ;;  %v2611_v44 = vpop.f32.mrf.mxu1 }
 0x113   : > { %v2613_v45 = vadd.f32 %v1905_v43, %v1904_v41 }
 0x114   : > { %v1907_v46 = vpop.f32.mrf.mxu0  ;;  %v1995_v47 = vpop.f32.mrf.mxu1 }
 0x116   : > { %v1908_v48 = vpop.f32.mrf.mxu0  ;;  %v1996_v49 = vpop.f32.mrf.mxu1 }
 0x117   : > { %v2615_v50 = vadd.f32 %v1908_v48, %v1907_v46  ;;  %v1997_v57 = vadd.f32 %v1996_v49, %v1995_v47 }
 0x118   : > { %v1910_v51 = vpop.f32.mrf.mxu0  ;;  %v1998_v52 = vpop.f32.mrf.mxu1 }
 0x11a   : > { %v1911_v53 = vpop.f32.mrf.mxu0  ;;  %v1999_v54 = vpop.f32.mrf.mxu1 }
 0x11b   : > { %v2617_v55 = vadd.f32 %v1911_v53, %v1910_v51 }
 0x11c   : > { %v1913_v58 = vpop.f32.mrf.mxu0  ;;  %v2619_v59 = vpop.f32.mrf.mxu1 }
 0x11e   : > { %v1914_v60 = vpop.f32.mrf.mxu0  ;;  %v2621_v61 = vpop.f32.mrf.mxu1 }
 0x11f   : > { %v2623_v0 = vadd.f32 %v1914_v60, %v1913_v58 }
 0x120   : > { %v1916_v1 = vpop.f32.mrf.mxu0  ;;  %v2625_v2 = vpop.f32.mrf.mxu1 }
 0x122   : > { %v1917_v3 = vpop.f32.mrf.mxu0  ;;  %v2627_v6 = vpop.f32.mrf.mxu1 }
 0x123   : > { %v2629_v7 = vadd.f32 %v1917_v3, %v1916_v1 }
 0x124   : > { %v2631_v8 = vpop.f32.mrf.mxu0  ;;  %v2007_v9 = vpop.f32.mrf.mxu1 }
 0x126   : > { %v2633_v12 = vpop.f32.mrf.mxu0  ;;  %v2008_v13 = vpop.f32.mrf.mxu1 }
 0x128   : > { %v2635_v14 = vpop.f32.mrf.mxu0  ;;  %v2637_v15 = vpop.f32.mrf.mxu1 }
 0x12a   : > { %v2639_v18 = vpop.f32.mrf.mxu0  ;;  %v2641_v19 = vpop.f32.mrf.mxu1 }
 0x12c   : > { %v2643_v20 = vpop.f32.mrf.mxu0  ;;  %v2645_v21 = vpop.f32.mrf.mxu1 }
 0x12e   : > { %v2647_v24 = vpop.f32.mrf.mxu0  ;;  %v2649_v25 = vpop.f32.mrf.mxu1 }
 0x130   : > { %v2651_v26 = vpop.f32.mrf.mxu0  ;;  %v2653_v27 = vpop.f32.mrf.mxu1 }
 0x131   : > { %2971 = vst [vmem:[#allocation10_spill] sm:$0xff] %v2651_v26  ;;  %v1994_v26 = vadd.f32 %v2611_v44, %v2609_v42 }
 0x132   : > { %v2655_v30 = vpop.f32.mrf.mxu0  ;;  %v2657_v31 = vpop.f32.mrf.mxu1 }
 0x133   : > { %2972 = vst [vmem:[#allocation11_spill] sm:$0xff] %v2655_v30 }
 0x134   : > { %v2659_v32 = vpop.f32.mrf.mxu0  ;;  %v2661_v33 = vpop.f32.mrf.mxu1 }
 0x136   : > { %v2663_v36 = vpop.f32.mrf.mxu0  ;;  %v2665_v38 = vpop.f32.mrf.mxu1 }
 0x138   : > { %v2667_v41 = vpop.f32.mrf.mxu0  ;;  %v2669_v43 = vpop.f32.mrf.mxu1 }
 0x139   : > { %2973 = vst [vmem:[#allocation12_spill] sm:$0xff] %v2667_v41  ;;  %v1105_v41 = vadd.f32 %v2575_v62, %v2703_v5  ;;  %v1126_v62 = vadd.f32 %v2595_v28, %v2703_v5 }
 0x13a   : > { %v2671_v46 = vpop.f32.mrf.mxu0  ;;  %v2673_v48 = vpop.f32.mrf.mxu1 }
 0x13b   : > { %2974 = vst [vmem:[#allocation13_spill] sm:$0xff] %v2671_v46 }
 0x13c   : > { %v2675_v51 = vpop.f32.mrf.mxu0  ;;  %v2677_v53 = vpop.f32.mrf.mxu1 }
 0x13d   : > { %2975 = vst [vmem:[#allocation14_spill] sm:$0xff] %v2675_v51  ;;  %v1991_v51 = vadd.f32 %v2605_v39, %v2603_v37  ;;  %v1552_v37 = vld [vmem:[%s2716_s19 + $0x10] sm:$0xff]  ;;  %v1113_v39 = vadd.f32 %v2583_v10, %v2703_v5  ;;  %v1550_v10 = vld [vmem:[%s2716_s19] sm:$0xff] }
 0x13e   : > { %v2679_v58 = vpop.f32.mrf.mxu0  ;;  %v2681_v60 = vpop.f32.mrf.mxu1 }
 0x13f   : > { %2976 = vst [vmem:[#allocation15_spill] sm:$0xff] %v2679_v58  ;;  %v1110_v58 = vadd.f32 %v2579_v4, %v2703_v5 }
 0x140   : > { %v2683_v1 = vpop.f32.mrf.mxu0  ;;  %v2685_v3 = vpop.f32.mrf.mxu1 }
 0x141   : > { %2977 = vst [vmem:[#allocation16_spill] sm:$0xff] %v2683_v1 }
 0x142   : > { %v2687_v35 = vpop.f32.mrf.mxu0  ;;  %v2689_v29 = vpop.f32.mrf.mxu1 }
 0x143   : > { %2978 = vst [vmem:[#allocation17_spill] sm:$0xff] %v2687_v35 }
 0x144   : > { %v2691_v23 = vpop.f32.mrf.mxu0  ;;  %v2693_v17 = vpop.f32.mrf.mxu1 }
 0x145   : > { %2979 = vst [vmem:[#allocation18_spill] sm:$0xff] %v2691_v23  ;;  %v1271_v23 = vadd.f32 %v1997_v57, %v1110_v58  ;;  %v2003_v58 = vadd.f32 %v2621_v61, %v2619_v59 }
 0x146   : > { %v2695_v63 = vpop.f32.mrf.mxu0  ;;  %v2697_v11 = vpop.f32.mrf.mxu1 }
 0x147   : > { %2980 = vst [vmem:[#allocation19_spill] sm:$0xff] %v2695_v63  ;;  %v2000_v63 = vadd.f32 %v1999_v54, %v1998_v52  ;;  %v2009_v52 = vadd.f32 %v2008_v13, %v2007_v9  ;;  %v1266_v13 = vadd.f32 %v1994_v26, %v1105_v41  ;;  %v1129_v26 = vadd.f32 %v2599_v34, %v2703_v5 }
 0x148   : > { %v2705_v1 = vpop.f32.mrf.mxu0  ;;  %v2707_v35 = vpop.f32.mrf.mxu1 }
 0x149   : > { %2981 = vst [vmem:[#allocation20_spill] sm:$0xff] %v2705_v1  ;;  %v1102_v1 = vadd.f32 %v2571_v56, %v2703_v5 }
 0x14a   : > { %v2718_v47 = vpop.f32.mrf.mxu0  ;;  %v2720_v49 = vpop.f32.mrf.mxu1 }
 0x14b   : > { %2982 = vst [vmem:[#allocation21_spill] sm:$0xff] %v2718_v47  ;;  %v1263_v46 = vadd.f32 %v1991_v51, %v1102_v1  ;;  %v1553_v51 = vld [vmem:[%s2716_s19 + $0x18] sm:$0xff] }
 0x14c   : > { %v2724_v4 = vpop.f32.mrf.mxu1  ;;  %v2115_v30 = vpop.f32.mrf.mxu0 }
 0x14d   : > { %v1432_v47 = vadd.f32 %v2115_v30, %v1271_v23  ;;  %v1274_v23 = vadd.f32 %v2000_v63, %v1113_v39  ;;  %v1118_v63 = vadd.f32 %v2587_v16, %v2703_v5  ;;  %v1287_v39 = vadd.f32 %v2009_v52, %v1126_v62 }
 0x14e   : > { %v2738_v56 = vpop.f32.mrf.mxu1  ;;  %v1423_v57 = vpop.f32.mrf.mxu0  ;;  %v1121_v52 = vadd.f32 %v2591_v22, %v2703_v5  ;;  %v2021_v62 = vadd.f32 %v2665_v38, %v2661_v33 }
 0x14f   : > { %v1584_v42 = vadd.f32 %v1552_v37, %v1432_v47  ;;  %v1424_v44 = vadd.f32 %v1423_v57, %v1263_v46  ;;  %v1551_v47 = vld [vmem:[%s2716_s19 + $0x8] sm:$0xff]  ;;  %v2012_v37 = vadd.f32 %v2641_v19, %v2637_v15  ;;  %v1556_v57 = vld [vmem:[%s2716_s19 + $0x30] sm:$0xff] }
 0x150   : > { %v2743_v54 = vpop.f32.mrf.mxu1  ;;  %v2116_v30 = vpop.f32.mrf.mxu0 }
 0x151   : > { %1617 = vst.msk [vmem:[%s2736_s30 + $0x10] sm:$0xff] %vm1614_vm1, %v1584_v42  ;;  %v1582_v1 = vadd.f32 %v1550_v10, %v1424_v44  ;;  %v1435_v9 = vadd.f32 %v2116_v30, %v1274_v23  ;;  %v2006_v10 = vadd.f32 %v2627_v6, %v2625_v2  ;;  %v1279_v42 = vadd.f32 %v2003_v58, %v1118_v63  ;;  %v1554_v23 = vld [vmem:[%s2716_s19 + $0x20] sm:$0xff] }
 0x152   : > { %v2752_v46 = vpop.f32.mrf.mxu1  ;;  %v1426_v28 = vpop.f32.mrf.mxu0  ;;  %v1290_v30 = vadd.f32 %v2012_v37, %v1129_v26  ;;  %v1134_v63 = vadd.f32 %v2607_v40, %v2703_v5  ;;  %v2024_v37 = vadd.f32 %v2673_v48, %v2669_v43  ;;  %v1921_v40 = vadd.f32 %v2633_v12, %v2631_v8  ;;  %v1558_v12 = vld [vmem:[%s2716_s19 + $0x40] sm:$0xff] }
 0x153   : > { %1615 = vst.msk [vmem:[%s2736_s30] sm:$0xff] %vm1614_vm1, %v1582_v1  ;;  %v1585_v59 = vadd.f32 %v1553_v51, %v1435_v9  ;;  %v1427_v61 = vadd.f32 %v1426_v28, %v1266_v13  ;;  %v1142_v51 = vadd.f32 %v2615_v50, %v2703_v5  ;;  %v1557_v1 = vld [vmem:[%s2716_s19 + $0x38] sm:$0xff]  ;;  %v2015_v9 = vadd.f32 %v2649_v25, %v2645_v21 }
 0x154   : > { %v2761_v41 = vpop.f32.mrf.mxu1  ;;  %v2119_v16 = vpop.f32.mrf.mxu0  ;;  %v1282_v13 = vadd.f32 %v2006_v10, %v1121_v52  ;;  %v2018_v43 = vadd.f32 %v2657_v31, %v2653_v27  ;;  %v1158_v52 = vadd.f32 %v1921_v40, %v2703_v5  ;;  %v2983_v40 = vld [vmem:[#allocation12_spill] sm:$0xff] }
 0x155   : > { %1618 = vst.msk [vmem:[%s2736_s30 + $0x18] sm:$0xff] %vm1614_vm1, %v1585_v59  ;;  %v1583_v15 = vadd.f32 %v1551_v47, %v1427_v61  ;;  %v1448_v19 = vadd.f32 %v2119_v16, %v1287_v39  ;;  %v1555_v47 = vld [vmem:[%s2716_s19 + $0x28] sm:$0xff]  ;;  %v1303_v59 = vadd.f32 %v2021_v62, %v1142_v51  ;;  %v1145_v61 = vadd.f32 %v2617_v55, %v2703_v5  ;;  %v1560_v16 = vld [vmem:[%s2716_s19 + $0x50] sm:$0xff]  ;;  %v1561_v62 = vld [vmem:[%s2716_s19 + $0x58] sm:$0xff] }
 0x156   : > { %v2770_v44 = vpop.f32.mrf.mxu1  ;;  %v1439_v34 = vpop.f32.mrf.mxu0  ;;  %v1295_v10 = vadd.f32 %v2015_v9, %v1134_v63  ;;  %v1137_v55 = vadd.f32 %v2613_v45, %v2703_v5  ;;  %v2030_v63 = vadd.f32 %v2689_v29, %v2685_v3 }
 0x157   : > { %1616 = vst.msk [vmem:[%s2736_s30 + $0x8] sm:$0xff] %vm1614_vm1, %v1583_v15  ;;  %v1588_v2 = vadd.f32 %v1556_v57, %v1448_v19  ;;  %v1440_v6 = vadd.f32 %v1439_v34, %v1279_v42  ;;  %v2033_v19 = vadd.f32 %v2697_v11, %v2693_v17  ;;  %v1306_v42 = vadd.f32 %v2024_v37, %v1145_v61 }
 0x158   : > { %v2779_v58 = vpop.f32.mrf.mxu1  ;;  %v2120_v22 = vpop.f32.mrf.mxu0  ;;  %v1924_v34 = vadd.f32 %v2639_v18, %v2635_v14  ;;  %v1559_v18 = vld [vmem:[%s2716_s19 + $0x48] sm:$0xff]  ;;  %v1927_v37 = vadd.f32 %v2647_v24, %v2643_v20  ;;  %v1565_v24 = vld [vmem:[%s2716_s19 + $0x78] sm:$0xff] }
 0x159   : > { %1621 = vst.msk [vmem:[%s2736_s30 + $0x30] sm:$0xff] %vm1614_vm1, %v1588_v2  ;;  %v1586_v33 = vadd.f32 %v1554_v23, %v1440_v6  ;;  %v1451_v38 = vadd.f32 %v2120_v22, %v1290_v30  ;;  %v2027_v2 = vadd.f32 %v2681_v60, %v2677_v53  ;;  %v1298_v6 = vadd.f32 %v2018_v43, %v1137_v55  ;;  %v2986_v55 = vld [vmem:[#allocation11_spill] sm:$0xff] }
 0x15a   : > { %v2788_v28 = vpop.f32.mrf.mxu1  ;;  %v1442_v50 = vpop.f32.mrf.mxu0  ;;  %v1150_v30 = vadd.f32 %v2623_v0, %v2703_v5  ;;  %v2036_v22 = vadd.f32 %v2720_v49, %v2707_v35  ;;  %v1161_v9 = vadd.f32 %v1924_v34, %v2703_v5  ;;  %v2039_v43 = vadd.f32 %v2738_v56, %v2724_v4  ;;  %v2987_v34 = vld [vmem:[#allocation18_spill] sm:$0xff] }
 0x15b   : > { %1619 = vst.msk [vmem:[%s2736_s30 + $0x20] sm:$0xff] %vm1614_vm1, %v1586_v33  ;;  %v1589_v21 = vadd.f32 %v1557_v1, %v1451_v38  ;;  %v1443_v25 = vadd.f32 %v1442_v50, %v1282_v13  ;;  %v1319_v1 = vadd.f32 %v2033_v19, %v1158_v52  ;;  %v1933_v33 = vadd.f32 %v2663_v36, %v2659_v32  ;;  %v1564_v13 = vld [vmem:[%s2716_s19 + $0x70] sm:$0xff] }
 0x15c   : > { %v2799_v39 = vpop.f32.mrf.mxu1  ;;  %v2123_v26 = vpop.f32.mrf.mxu0  ;;  %v1311_v50 = vadd.f32 %v2027_v2, %v1150_v30 }
 0x15d   : > { %1622 = vst.msk [vmem:[%s2736_s30 + $0x38] sm:$0xff] %vm1614_vm1, %v1589_v21  ;;  %v1587_v48 = vadd.f32 %v1555_v47, %v1443_v25  ;;  %v1464_v57 = vadd.f32 %v2123_v26, %v1303_v59  ;;  %v1153_v47 = vadd.f32 %v2629_v7, %v2703_v5  ;;  %v1562_v21 = vld [vmem:[%s2716_s19 + $0x60] sm:$0xff]  ;;  %v2045_v25 = vadd.f32 %v2770_v44, %v2761_v41  ;;  %v2984_v7 = vld [vmem:[#allocation13_spill] sm:$0xff] }
 0x15e   : > { %v2808_v15 = vpop.f32.mrf.mxu1  ;;  %v1455_v8 = vpop.f32.mrf.mxu0  ;;  %v1322_v59 = vadd.f32 %v2036_v22, %v1161_v9  ;;  %v1174_v61 = vadd.f32 %v1933_v33, %v2703_v5  ;;  %v1936_v26 = vadd.f32 %v2984_v7, %v2983_v40  ;;  %v2990_v22 = vld [vmem:[#allocation15_spill] sm:$0xff]  ;;  %v1566_v9 = vld [vmem:[%s2716_s19 + $0x80] sm:$0xff] }
 0x15f   : > { %1620 = vst.msk [vmem:[%s2736_s30 + $0x28] sm:$0xff] %vm1614_vm1, %v1587_v48  ;;  %v1592_v27 = vadd.f32 %v1560_v16, %v1464_v57  ;;  %v1456_v31 = vadd.f32 %v1455_v8, %v1295_v10  ;;  %v1314_v48 = vadd.f32 %v2030_v63, %v1153_v47  ;;  %v1166_v57 = vadd.f32 %v1927_v37, %v2703_v5  ;;  %v2985_v10 = vld [vmem:[#allocation10_spill] sm:$0xff]  ;;  %v2991_v63 = vld [vmem:[#allocation20_spill] sm:$0xff]  ;;  %v1569_v37 = vld [vmem:[%s2716_s19 + $0x98] sm:$0xff] }
 0x160   : > { %v2818_v45 = vpop.f32.mrf.mxu1  ;;  %v2124_v23 = vpop.f32.mrf.mxu0  ;;  %v1930_v8 = vadd.f32 %v2986_v55, %v2985_v10  ;;  %v1177_v52 = vadd.f32 %v1936_v26, %v2703_v5  ;;  %v1567_v7 = vld [vmem:[%s2716_s19 + $0x88] sm:$0xff] }
 0x161   : > { %1625 = vst.msk [vmem:[%s2736_s30 + $0x50] sm:$0xff] %vm1614_vm1, %v1592_v27  ;;  %v1590_v11 = vadd.f32 %v1558_v12, %v1456_v31  ;;  %v1467_v17 = vadd.f32 %v2124_v23, %v1306_v42  ;;  %v1563_v27 = vld [vmem:[%s2716_s19 + $0x68] sm:$0xff]  ;;  %v2048_v31 = vadd.f32 %v2788_v28, %v2779_v58  ;;  %v1335_v42 = vadd.f32 %v2045_v25, %v1174_v61 }
 0x162   : > { %v2827_v51 = vpop.f32.mrf.mxu1  ;;  %v1458_v14 = vpop.f32.mrf.mxu0  ;;  %v2988_v23 = vld [vmem:[#allocation19_spill] sm:$0xff]  ;;  %v1327_v30 = vadd.f32 %v2039_v43, %v1166_v57 }
 0x163   : > { %1623 = vst.msk [vmem:[%s2736_s30 + $0x40] sm:$0xff] %vm1614_vm1, %v1590_v11  ;;  %v1593_v53 = vadd.f32 %v1561_v62, %v1467_v17  ;;  %v1459_v60 = vadd.f32 %v1458_v14, %v1298_v6  ;;  %v1945_v62 = vadd.f32 %v2988_v23, %v2987_v34  ;;  %v1568_v17 = vld [vmem:[%s2716_s19 + $0x90] sm:$0xff]  ;;  %v2042_v6 = vadd.f32 %v2752_v46, %v2743_v54  ;;  %v1573_v34 = vld [vmem:[%s2716_s19 + $0xb8] sm:$0xff] }
 0x164   : > { %v2055_v0 = vpop.f32.mrf.mxu1  ;;  %v2127_v38 = vpop.f32.mrf.mxu0  ;;  %v1169_v14 = vadd.f32 %v1930_v8, %v2703_v5  ;;  %v1338_v46 = vadd.f32 %v2048_v31, %v1177_v52 }
 0x165   : > { %1626 = vst.msk [vmem:[%s2736_s30 + $0x58] sm:$0xff] %vm1614_vm1, %v1593_v53  ;;  %v1591_v35 = vadd.f32 %v1559_v18, %v1459_v60  ;;  %v1480_v49 = vadd.f32 %v2127_v38, %v1319_v1  ;;  %v2989_v18 = vld [vmem:[#allocation14_spill] sm:$0xff] }
 0x166   : > { %v2056_v32 = vpop.f32.mrf.mxu1  ;;  %v1471_v36 = vpop.f32.mrf.mxu0  ;;  %v1939_v53 = vadd.f32 %v2990_v22, %v2989_v18 }
 0x167   : > { %1624 = vst.msk [vmem:[%s2736_s30 + $0x48] sm:$0xff] %vm1614_vm1, %v1591_v35  ;;  %v1596_v29 = vadd.f32 %v1564_v13, %v1480_v49  ;;  %v1472_v3 = vadd.f32 %v1471_v36, %v1311_v50  ;;  %v2057_v33 = vadd.f32 %v2056_v32, %v2055_v0  ;;  %v1190_v13 = vadd.f32 %v1945_v62, %v2703_v5  ;;  %v2992_v35 = vld [vmem:[#allocation21_spill] sm:$0xff] }
 0x168   : > { %v2058_v16 = vpop.f32.mrf.mxu1  ;;  %v2128_v20 = vpop.f32.mrf.mxu0  ;;  %v1948_v49 = vadd.f32 %v2992_v35, %v2991_v63  ;;  %v2051_v36 = vadd.f32 %v2808_v15, %v2799_v39  ;;  %v1182_v25 = vadd.f32 %v1939_v53, %v2703_v5 }
 0x169   : > { %1629 = vst.msk [vmem:[%s2736_s30 + $0x70] sm:$0xff] %vm1614_vm1, %v1596_v29  ;;  %v1594_v41 = vadd.f32 %v1562_v21, %v1472_v3  ;;  %v1483_v44 = vadd.f32 %v2128_v20, %v1322_v59  ;;  %v1330_v21 = vadd.f32 %v2042_v6, %v1169_v14  ;;  %v2993_v29 = vld [vmem:[#allocation16_spill] sm:$0xff]  ;;  %v2994_v3 = vld [vmem:[#allocation17_spill] sm:$0xff]  ;;  %v1351_v20 = vadd.f32 %v2057_v33, %v1190_v13  ;;  %v2996_v6 = vld [vmem:[#allocation2_spill] sm:$0xff] }
 0x16a   : > { %v2059_v12 = vpop.f32.mrf.mxu1  ;;  %v1474_v19 = vpop.f32.mrf.mxu0  ;;  %v1942_v59 = vadd.f32 %v2994_v3, %v2993_v29  ;;  %v1343_v10 = vadd.f32 %v2051_v36, %v1182_v25  ;;  %v1571_v14 = vld [vmem:[%s2716_s19 + $0xa8] sm:$0xff]  ;;  %v1577_v29 = vld [vmem:[%s2716_s19 + $0xd8] sm:$0xff] }
 0x16b   : > { %1627 = vst.msk [vmem:[%s2736_s30 + $0x60] sm:$0xff] %vm1614_vm1, %v1594_v41  ;;  %v1597_v4 = vadd.f32 %v1565_v24, %v1483_v44  ;;  %v1475_v56 = vadd.f32 %v1474_v19, %v1314_v48  ;;  %v2060_v26 = vadd.f32 %v2059_v12, %v2058_v16  ;;  %v1193_v24 = vadd.f32 %v1948_v49, %v2703_v5  ;;  %v1572_v44 = vld [vmem:[%s2716_s19 + $0xb0] sm:$0xff]  ;;  %v1570_v19 = vld [vmem:[%s2716_s19 + $0xa0] sm:$0xff] }
 0x16c   : > { %v2061_v2 = vpop.f32.mrf.mxu1  ;;  %v2131_v11 = vpop.f32.mrf.mxu0  ;;  %v2054_v48 = vadd.f32 %v2827_v51, %v2818_v45  ;;  %v1185_v55 = vadd.f32 %v1942_v59, %v2703_v5  ;;  %v2995_v51 = vld [vmem:[#allocation4_spill] sm:$0xff] }
 0x16d   : > { %1630 = vst.msk [vmem:[%s2736_s30 + $0x78] sm:$0xff] %vm1614_vm1, %v1597_v4  ;;  %v1595_v58 = vadd.f32 %v1563_v27, %v1475_v56  ;;  %v1496_v28 = vadd.f32 %v2131_v11, %v1335_v42  ;;  %v1354_v45 = vadd.f32 %v2060_v26, %v1193_v24  ;;  %v1206_v56 = vadd.f32 %v2995_v51, %v2703_v5 }
 0x16e   : > { %v2062_v60 = vpop.f32.mrf.mxu1  ;;  %v1487_v1 = vpop.f32.mrf.mxu0 }
 0x16f   : > { %1628 = vst.msk [vmem:[%s2736_s30 + $0x68] sm:$0xff] %vm1614_vm1, %v1595_v58  ;;  %v1600_v38 = vadd.f32 %v1568_v17, %v1496_v28  ;;  %v1488_v54 = vadd.f32 %v1487_v1, %v1327_v30  ;;  %v2063_v23 = vadd.f32 %v2062_v60, %v2061_v2  ;;  %v1346_v17 = vadd.f32 %v2054_v48, %v1185_v55  ;;  %v2997_v60 = vld [vmem:[#allocation5_spill] sm:$0xff] }
 0x170   : > { %v2064_v50 = vpop.f32.mrf.mxu1  ;;  %v2132_v47 = vpop.f32.mrf.mxu0  ;;  %v1198_v58 = vadd.f32 %v2996_v6, %v2703_v5  ;;  %v1209_v1 = vadd.f32 %v2997_v60, %v2703_v5  ;;  %v3002_v6 = vld [vmem:[#allocation9_spill] sm:$0xff] }
 0x171   : > { %1633 = vst.msk [vmem:[%s2736_s30 + $0x90] sm:$0xff] %vm1614_vm1, %v1600_v38  ;;  %v1598_v0 = vadd.f32 %v1566_v9, %v1488_v54  ;;  %v1499_v32 = vadd.f32 %v2132_v47, %v1338_v46  ;;  %v1576_v38 = vld [vmem:[%s2716_s19 + $0xd0] sm:$0xff]  ;;  %v1574_v47 = vld [vmem:[%s2716_s19 + $0xc0] sm:$0xff] }
 0x172   : > { %v2065_v61 = vpop.f32.mrf.mxu1  ;;  %v1490_v40 = vpop.f32.mrf.mxu0  ;;  %v1359_v63 = vadd.f32 %v2063_v23, %v1198_v58  ;;  %v1580_v23 = vld [vmem:[%s2716_s19 + $0xf0] sm:$0xff]  ;;  %v1225_v58 = vadd.f32 %v3002_v6, %v2703_v5 }
 0x173   : > { %1631 = vst.msk [vmem:[%s2736_s30 + $0x80] sm:$0xff] %vm1614_vm1, %v1598_v0  ;;  %v1601_v39 = vadd.f32 %v1569_v37, %v1499_v32  ;;  %v1491_v15 = vadd.f32 %v1490_v40, %v1330_v21  ;;  %v2066_v54 = vadd.f32 %v2065_v61, %v2064_v50  ;;  %v2998_v37 = vld [vmem:[#allocation3_spill] sm:$0xff] }
 0x174   : > { %v2067_v43 = vpop.f32.mrf.mxu1  ;;  %v2135_v41 = vpop.f32.mrf.mxu0  ;;  %v1201_v36 = vadd.f32 %v2998_v37, %v2703_v5 }
 0x175   : > { %1634 = vst.msk [vmem:[%s2736_s30 + $0x98] sm:$0xff] %vm1614_vm1, %v1601_v39  ;;  %v1599_v57 = vadd.f32 %v1567_v7, %v1491_v15  ;;  %v1512_v16 = vadd.f32 %v2135_v41, %v1351_v20  ;;  %v1575_v39 = vld [vmem:[%s2716_s19 + $0xc8] sm:$0xff]  ;;  %v2999_v15 = vld [vmem:[#allocation6_spill] sm:$0xff] }
 0x176   : > { %v2068_v8 = vpop.f32.mrf.mxu1  ;;  %v1503_v12 = vpop.f32.mrf.mxu0  ;;  %v1362_v40 = vadd.f32 %v2066_v54, %v1201_v36  ;;  %v1214_v20 = vadd.f32 %v2999_v15, %v2703_v5 }
 0x177   : > { %1632 = vst.msk [vmem:[%s2736_s30 + $0x88] sm:$0xff] %vm1614_vm1, %v1599_v57  ;;  %v1604_v27 = vadd.f32 %v1572_v44, %v1512_v16  ;;  %v2069_v31 = vadd.f32 %v2068_v8, %v2067_v43  ;;  %v1504_v4 = vadd.f32 %v1503_v12, %v1343_v10  ;;  %v1578_v8 = vld [vmem:[%s2716_s19 + $0xe0] sm:$0xff]  ;;  %v3000_v12 = vld [vmem:[#allocation7_spill] sm:$0xff] }
 0x178   : > { %v2070_v42 = vpop.f32.mrf.mxu1  ;;  %v2136_v52 = vpop.f32.mrf.mxu0 }
 0x179   : > { %1637 = vst.msk [vmem:[%s2736_s30 + $0xb0] sm:$0xff] %vm1614_vm1, %v1604_v27  ;;  %v1602_v62 = vadd.f32 %v1570_v19, %v1504_v4  ;;  %v1515_v11 = vadd.f32 %v2136_v52, %v1354_v45  ;;  %v1367_v53 = vadd.f32 %v2069_v31, %v1206_v56  ;;  %v1217_v19 = vadd.f32 %v3000_v12, %v2703_v5  ;;  %v3001_v27 = vld [vmem:[#allocation8_spill] sm:$0xff] }
 0x17a   : > { %v2071_v28 = vpop.f32.mrf.mxu1  ;;  %v1506_v30 = vpop.f32.mrf.mxu0  ;;  %v1222_v31 = vadd.f32 %v3001_v27, %v2703_v5 }
 0x17b   : > { %1635 = vst.msk [vmem:[%s2736_s30 + $0xa0] sm:$0xff] %vm1614_vm1, %v1602_v62  ;;  %v1605_v18 = vadd.f32 %v1573_v34, %v1515_v11  ;;  %v2072_v22 = vadd.f32 %v2071_v28, %v2070_v42  ;;  %v1507_v2 = vadd.f32 %v1506_v30, %v1346_v17  ;;  %v1579_v17 = vld [vmem:[%s2716_s19 + $0xe8] sm:$0xff] }
 0x17c   : > { %v2073_v9 = vpop.f32.mrf.mxu1  ;;  %v2139_v33 = vpop.f32.mrf.mxu0 }
 0x17d   : > { %1638 = vst.msk [vmem:[%s2736_s30 + $0xb8] sm:$0xff] %vm1614_vm1, %v1605_v18  ;;  %v1603_v46 = vadd.f32 %v1571_v14, %v1507_v2  ;;  %v1528_v13 = vadd.f32 %v2139_v33, %v1367_v53  ;;  %v1370_v21 = vadd.f32 %v2072_v22, %v1209_v1  ;;  %v1581_v53 = vld [vmem:[%s2716_s19 + $0xf8] sm:$0xff] }
 0x17e   : > { %v2074_v35 = vpop.f32.mrf.mxu1  ;;  %v1519_v49 = vpop.f32.mrf.mxu0 }
 0x17f   : > { %1636 = vst.msk [vmem:[%s2736_s30 + $0xa8] sm:$0xff] %vm1614_vm1, %v1603_v46  ;;  %v1608_v0 = vadd.f32 %v1576_v38, %v1528_v13  ;;  %v1520_v32 = vadd.f32 %v1519_v49, %v1359_v63  ;;  %v2075_v3 = vadd.f32 %v2074_v35, %v2073_v9 }
 0x180   : > { %v2076_v50 = vpop.f32.mrf.mxu1  ;;  %v2140_v25 = vpop.f32.mrf.mxu0 }
 0x181   : > { %1641 = vst.msk [vmem:[%s2736_s30 + $0xd0] sm:$0xff] %vm1614_vm1, %v1608_v0  ;;  %v1606_v59 = vadd.f32 %v1574_v47, %v1520_v32  ;;  %v1531_v61 = vadd.f32 %v2140_v25, %v1370_v21  ;;  %v1375_v16 = vadd.f32 %v2075_v3, %v1214_v20 }
 0x182   : > { %v2077_v7 = vpop.f32.mrf.mxu1  ;;  %v1522_v26 = vpop.f32.mrf.mxu0 }
 0x183   : > { %1639 = vst.msk [vmem:[%s2736_s30 + $0xc0] sm:$0xff] %vm1614_vm1, %v1606_v59  ;;  %v1609_v24 = vadd.f32 %v1577_v29, %v1531_v61  ;;  %v1523_v43 = vadd.f32 %v1522_v26, %v1362_v40  ;;  %v2078_v48 = vadd.f32 %v2077_v7, %v2076_v50 }
 0x184   : > { %v2079_v41 = vpop.f32.mrf.mxu1  ;;  %v2143_v44 = vpop.f32.mrf.mxu0 }
 0x185   : > { %1642 = vst.msk [vmem:[%s2736_s30 + $0xd8] sm:$0xff] %vm1614_vm1, %v1609_v24  ;;  %v1607_v57 = vadd.f32 %v1575_v39, %v1523_v43  ;;  %v1378_v34 = vadd.f32 %v2078_v48, %v1217_v19 }
 0x186   : > { %v2080_v10 = vpop.f32.mrf.mxu1  ;;  %v1535_v55 = vpop.f32.mrf.mxu0 }
 0x187   : > { %1640 = vst.msk [vmem:[%s2736_s30 + $0xc8] sm:$0xff] %vm1614_vm1, %v1607_v57  ;;  %v2081_v4 = vadd.f32 %v2080_v10, %v2079_v41  ;;  %v1536_v45 = vadd.f32 %v1535_v55, %v1375_v16 }
 0x188   : > { %v2082_v51 = vpop.f32.mrf.mxu1  ;;  %v2144_v56 = vpop.f32.mrf.mxu0 }
 0x189   : > { %v1383_v42 = vadd.f32 %v2081_v4, %v1222_v31  ;;  %v1610_v52 = vadd.f32 %v1578_v8, %v1536_v45 }
 0x18a   : > { %v2083_v62 = vpop.f32.mrf.mxu1  ;;  %v1538_v11 = vpop.f32.mrf.mxu0 }
 0x18b   : > { %v1544_v28 = vadd.f32 %v2143_v44, %v1383_v42  ;;  %1643 = vst.msk [vmem:[%s2736_s30 + $0xe0] sm:$0xff] %vm1614_vm1, %v1610_v52  ;;  %v2084_v30 = vadd.f32 %v2083_v62, %v2082_v51  ;;  %v1539_v14 = vadd.f32 %v1538_v11, %v1378_v34 }
 0x18d   : > { %v1612_v18 = vadd.f32 %v1580_v23, %v1544_v28  ;;  %v1386_v22 = vadd.f32 %v2084_v30, %v1225_v58  ;;  %v1611_v2 = vadd.f32 %v1579_v17, %v1539_v14 }
 0x18f   : > { %1645 = vst.msk [vmem:[%s2736_s30 + $0xf0] sm:$0xff] %vm1614_vm1, %v1612_v18  ;;  %v1547_v60 = vadd.f32 %v2144_v56, %v1386_v22  ;;  %1644 = vst.msk [vmem:[%s2736_s30 + $0xe8] sm:$0xff] %vm1614_vm1, %v1611_v2 }
 0x191   : > { %v1613_v1 = vadd.f32 %v1581_v53, %v1547_v60 }
 0x193   : > { %1646 = vst.msk [vmem:[%s2736_s30 + $0xf8] sm:$0xff] %vm1614_vm1, %v1613_v1 }
 0x194 PF: > { %s14_s15 = sadd.s32 1, %s2324_s15  }
 0x195   : > { %p11_p4 = scmp.ge.s32.totalorder %s14_s15, 4  }
 0x197   :  { %13 = sbr.rel (!%p11_p4) target bundleno = 1 (0x1), region = 69 }

// kernel: _lambda_.16
= control target key start
LH: loop header
LB: loop body
LE: loop exit
PB: predicated region body
PF: predicated region fallthrough
CT: control target
= control target key end

     0   :  { %v338_v6 = vmov 0   ;;  %vm126_vm0 = vcmask 523264   ;;  %s494_s1 = inlined_call_operand.vmem [shape: bf16[64,64], index: 1, kind: input, shape index: {}]   ;;  %s495_s0 = inlined_call_operand.vmem [shape: bf16[128,64], index: 0, kind: input, shape index: {}]   ;;  %s496_s2 = inlined_call_operand.vmem [shape: f32[1,64], index: 2, kind: input, shape index: {}]   ;;  %s497_s3 = inlined_call_operand.vmem [shape: f32[128,64], index: 3, kind: output, shape index: {}]  }
   0x1   :  { %v334_v0 = vld [vmem:[%s494_s1 + $0x18] sm:$0xff]   ;;  %v335_v1 = vld [vmem:[%s494_s1 + $0x10] sm:$0xff]   ;;  %v336_v2 = vld [vmem:[%s494_s1 + $0x8] sm:$0xff]  }
   0x2   :  { %301 = vmatprep.subr.bf16.mxu0 %v334_v0  ;;  %325 = vmatprep.subr.bf16.mxu1 %v334_v0  ;;  %v15_v3 = vld [vmem:[%s495_s0] sm:$0xf]  ;;  %v16_v4 = vld [vmem:[%s495_s0 + $0x4] sm:$0xf]  ;;  %v17_v13 = vld [vmem:[%s495_s0 + $0x8] sm:$0xf] }
   0x3   :  { %302 = vmatpush3.bf16.msra.mxu0 %v334_v0  ;;  %329 = vmatpush3.bf16.msra.mxu1 %v334_v0  ;;  %v23_v5 = vld [vmem:[%s495_s0 + $0x20] sm:$0xf]  ;;  %v31_v7 = vmax.bf16 %v338_v6, %v15_v3  ;;  %v32_v8 = vmax.bf16 %v338_v6, %v16_v4  ;;  %v24_v9 = vld [vmem:[%s495_s0 + $0x24] sm:$0xf]  ;;  %v18_v14 = vld [vmem:[%s495_s0 + $0xc] sm:$0xf]  ;;  %v33_v23 = vmax.bf16 %v338_v6, %v17_v13 }
   0x4   :  { %303 = vmatprep.subr.bf16.mxu0 %v335_v1  ;;  %326 = vmatprep.subr.bf16.mxu1 %v335_v1  ;;  %v39_v10 = vmax.bf16 %v338_v6, %v23_v5  ;;  %v337_v11 = vld [vmem:[%s494_s1] sm:$0xff]   ;;  %v40_v12 = vmax.bf16 %v338_v6, %v24_v9  ;;  %v25_v16 = vld [vmem:[%s495_s0 + $0x28] sm:$0xf]  ;;  %v26_v17 = vld [vmem:[%s495_s0 + $0x2c] sm:$0xf]  ;;  %v34_v24 = vmax.bf16 %v338_v6, %v18_v14 }
   0x5   :  { %v269_v15 = vcombine.low %v31_v7, %v32_v8  ;;  %v19_v18 = vld [vmem:[%s495_s0 + $0x10] sm:$0xf]  ;;  %v20_v20 = vld [vmem:[%s495_s0 + $0x14] sm:$0xf]  ;;  %v41_v25 = vmax.bf16 %v338_v6, %v25_v16  ;;  %v42_v26 = vmax.bf16 %v338_v6, %v26_v17  ;;  %v21_v33 = vld [vmem:[%s495_s0 + $0x18] sm:$0xf] }
   0x6   :  { %v273_v19 = vcombine.low %v39_v10, %v40_v12  ;;  %v27_v21 = vld [vmem:[%s495_s0 + $0x30] sm:$0xf]  ;;  %v28_v22 = vld [vmem:[%s495_s0 + $0x34] sm:$0xf]  ;;  %v35_v27 = vmax.bf16 %v338_v6, %v19_v18  ;;  %v36_v28 = vmax.bf16 %v338_v6, %v20_v20  ;;  %v270_v31 = vcombine.low %v33_v23, %v34_v24  ;;  %v22_v36 = vld [vmem:[%s495_s0 + $0x1c] sm:$0xf] }
   0x7   :  { %304 = vmatpush3.bf16.msra.mxu0 %v335_v1  ;;  %330 = vmatpush3.bf16.msra.mxu1 %v335_v1  ;;  %v43_v29 = vmax.bf16 %v338_v6, %v27_v21  ;;  %v44_v30 = vmax.bf16 %v338_v6, %v28_v22  ;;  %v274_v32 = vcombine.low %v41_v25, %v42_v26  ;;  %v29_v37 = vld [vmem:[%s495_s0 + $0x38] sm:$0xf]  ;;  %v30_v38 = vld [vmem:[%s495_s0 + $0x3c] sm:$0xf]  ;;  %v268_v45 = vld [vmem:[%s496_s2] ss:$0 sm:$0xff] }
   0x8   :  { %305 = vmatprep.subr.bf16.mxu0 %v336_v2  ;;  %327 = vmatprep.subr.bf16.mxu1 %v336_v2  ;;  %v271_v34 = vcombine.low %v35_v27, %v36_v28  ;;  %v37_v39 = vmax.bf16 %v338_v6, %v21_v33  ;;  %v38_v40 = vmax.bf16 %v338_v6, %v22_v36 }
   0x9   :  { %309 = vmatprep.mubr.msk.bf16.mxu0 %vm126_vm0, %v269_v15  ;;  %317 = vmatprep.mubr.msk.bf16.mxu1 %vm126_vm0, %v273_v19  ;;  %v275_v35 = vcombine.low %v43_v29, %v44_v30  ;;  %v45_v41 = vmax.bf16 %v338_v6, %v29_v37  ;;  %v46_v42 = vmax.bf16 %v338_v6, %v30_v38 }
   0xa   :  { %v272_v43 = vcombine.low %v37_v39, %v38_v40 }
   0xb   :  { %306 = vmatpush3.bf16.msra.mxu0 %v336_v2  ;;  %331 = vmatpush3.bf16.msra.mxu1 %v336_v2  ;;  %v276_v44 = vcombine.low %v45_v41, %v46_v42 }
   0xc   :  { %307 = vmatprep.subr.bf16.mxu0 %v337_v11  ;;  %328 = vmatprep.subr.bf16.mxu1 %v337_v11 }
   0xf   :  { %308 = vmatpush3.bf16.msra.mxu0 %v337_v11  ;;  %332 = vmatpush3.bf16.msra.mxu1 %v337_v11 }
  0x12   :  { %310 = vmatmul.mubr.msk.bf16.vlgmr.msra.gmra.mxu0 %vm126_vm0, %v270_v31  ;;  %318 = vmatmul.mubr.msk.bf16.vlgmr.msra.gmra.mxu1 %vm126_vm0, %v274_v32 }
  0x13   :  { %313 = vmatprep.mubr.msk.bf16.mxu0 %vm126_vm0, %v271_v34  ;;  %321 = vmatprep.mubr.msk.bf16.mxu1 %vm126_vm0, %v275_v35 }
  0x1a   :  { %314 = vmatmul.mubr.msk.bf16.gmra.mxu0 %vm126_vm0, %v272_v43  ;;  %322 = vmatmul.mubr.msk.bf16.gmra.mxu1 %vm126_vm0, %v276_v44 }
  0xd2   :  { %v311_v46 = vpop.f32.mrf.mxu0  ;;  %v319_v47 = vpop.f32.mrf.mxu1 }
  0xd3   :  { %v194_v48 = vadd.f32 %v311_v46, %v268_v45  ;;  %v226_v49 = vadd.f32 %v319_v47, %v268_v45 }
  0xd4   :  { %v185_v50 = vpop.f32.mrf.mxu0  ;;  %v217_v51 = vpop.f32.mrf.mxu1 }
  0xd5   :  { %250 = vst.msk [vmem:[%s497_s3 + $0x10] sm:$0xff] %vm126_vm0, %v194_v48  ;;  %258 = vst.msk [vmem:[%s497_s3 + $0x50] sm:$0xff] %vm126_vm0, %v226_v49  ;;  %v186_v52 = vadd.f32 %v268_v45, %v185_v50  ;;  %v218_v53 = vadd.f32 %v268_v45, %v217_v51 }
  0xd6   :  { %v312_v54 = vpop.f32.mrf.mxu0  ;;  %v320_v55 = vpop.f32.mrf.mxu1 }
  0xd7   :  { %248 = vst.msk [vmem:[%s497_s3] sm:$0xff] %vm126_vm0, %v186_v52  ;;  %256 = vst.msk [vmem:[%s497_s3 + $0x40] sm:$0xff] %vm126_vm0, %v218_v53  ;;  %v197_v56 = vadd.f32 %v312_v54, %v268_v45  ;;  %v229_v57 = vadd.f32 %v320_v55, %v268_v45 }
  0xd8   :  { %v188_v58 = vpop.f32.mrf.mxu0  ;;  %v220_v59 = vpop.f32.mrf.mxu1 }
  0xd9   :  { %251 = vst.msk [vmem:[%s497_s3 + $0x18] sm:$0xff] %vm126_vm0, %v197_v56  ;;  %259 = vst.msk [vmem:[%s497_s3 + $0x58] sm:$0xff] %vm126_vm0, %v229_v57  ;;  %v189_v60 = vadd.f32 %v268_v45, %v188_v58  ;;  %v221_v61 = vadd.f32 %v268_v45, %v220_v59 }
  0xda   :  { %v315_v62 = vpop.f32.mrf.mxu0  ;;  %v323_v63 = vpop.f32.mrf.mxu1 }
  0xdb   :  { %249 = vst.msk [vmem:[%s497_s3 + $0x8] sm:$0xff] %vm126_vm0, %v189_v60  ;;  %257 = vst.msk [vmem:[%s497_s3 + $0x48] sm:$0xff] %vm126_vm0, %v221_v61  ;;  %v210_v0 = vadd.f32 %v315_v62, %v268_v45  ;;  %v242_v1 = vadd.f32 %v323_v63, %v268_v45 }
  0xdc   :  { %v201_v2 = vpop.f32.mrf.mxu0  ;;  %v233_v3 = vpop.f32.mrf.mxu1 }
  0xdd   :  { %254 = vst.msk [vmem:[%s497_s3 + $0x30] sm:$0xff] %vm126_vm0, %v210_v0  ;;  %262 = vst.msk [vmem:[%s497_s3 + $0x70] sm:$0xff] %vm126_vm0, %v242_v1  ;;  %v202_v4 = vadd.f32 %v268_v45, %v201_v2  ;;  %v234_v5 = vadd.f32 %v268_v45, %v233_v3 }
  0xde   :  { %v316_v6 = vpop.f32.mrf.mxu0  ;;  %v324_v7 = vpop.f32.mrf.mxu1 }
  0xdf   :  { %252 = vst.msk [vmem:[%s497_s3 + $0x20] sm:$0xff] %vm126_vm0, %v202_v4  ;;  %260 = vst.msk [vmem:[%s497_s3 + $0x60] sm:$0xff] %vm126_vm0, %v234_v5  ;;  %v213_v8 = vadd.f32 %v316_v6, %v268_v45  ;;  %v245_v9 = vadd.f32 %v324_v7, %v268_v45 }
  0xe0   :  { %v204_v10 = vpop.f32.mrf.mxu0  ;;  %v236_v11 = vpop.f32.mrf.mxu1 }
  0xe1   :  { %255 = vst.msk [vmem:[%s497_s3 + $0x38] sm:$0xff] %vm126_vm0, %v213_v8  ;;  %263 = vst.msk [vmem:[%s497_s3 + $0x78] sm:$0xff] %vm126_vm0, %v245_v9  ;;  %v205_v12 = vadd.f32 %v268_v45, %v204_v10  ;;  %v237_v13 = vadd.f32 %v268_v45, %v236_v11 }
  0xe3   :  { %253 = vst.msk [vmem:[%s497_s3 + $0x28] sm:$0xff] %vm126_vm0, %v205_v12  ;;  %261 = vst.msk [vmem:[%s497_s3 + $0x68] sm:$0xff] %vm126_vm0, %v237_v13 }

// kernel: _lambda_.15
= control target key start
LH: loop header
LB: loop body
LE: loop exit
PB: predicated region body
PF: predicated region fallthrough
CT: control target
= control target key end

     0   :  { %v928_v14 = vmov 0   ;;  %vm350_vm0 = vcmask 261120   ;;  %s1208_s1 = inlined_call_operand.vmem [shape: bf16[288,128], index: 1, kind: input, shape index: {}]   ;;  %s1209_s0 = inlined_call_operand.vmem [shape: bf16[128,288], index: 0, kind: input, shape index: {}]   ;;  %s1210_s2 = inlined_call_operand.vmem [shape: f32[1,128], index: 2, kind: input, shape index: {}]   ;;  %s1211_s3 = inlined_call_operand.vmem [shape: bf16[128,128], index: 3, kind: output, shape index: {}]  }
   0x1   :  { %v910_v0 = vld [vmem:[%s1208_s1 + $0x78] sm:$0xff]   ;;  %v912_v2 = vld [vmem:[%s1208_s1 + $0x70] sm:$0xff]   ;;  %v914_v4 = vld [vmem:[%s1208_s1 + $0x68] sm:$0xff]  }
   0x2   :  { %v911_v1 = vld [vmem:[%s1208_s1 + $0x38] sm:$0xff]   ;;  %799 = vmatprep.subr.bf16.mxu0 %v910_v0  ;;  %893 = vmatprep.subr.bf16.mxu1 %v910_v0  ;;  %v913_v3 = vld [vmem:[%s1208_s1 + $0x30] sm:$0xff]   ;;  %v915_v5 = vld [vmem:[%s1208_s1 + $0x28] sm:$0xff]  }
   0x3   :  { %800 = vmatpush3.bf16.msra.mxu0 %v911_v1  ;;  %901 = vmatpush3.bf16.msra.mxu1 %v911_v1  ;;  %v916_v6 = vld [vmem:[%s1208_s1 + $0x60] sm:$0xff]   ;;  %v918_v8 = vld [vmem:[%s1208_s1 + $0x58] sm:$0xff]   ;;  %v920_v10 = vld [vmem:[%s1208_s1 + $0x50] sm:$0xff]  }
   0x4   :  { %801 = vmatprep.subr.bf16.mxu0 %v912_v2  ;;  %894 = vmatprep.subr.bf16.mxu1 %v912_v2  ;;  %v917_v7 = vld [vmem:[%s1208_s1 + $0x20] sm:$0xff]   ;;  %v919_v9 = vld [vmem:[%s1208_s1 + $0x18] sm:$0xff]   ;;  %v17_v12 = vld [vmem:[%s1209_s0 + $0xc] sm:$0xff] }
   0x5   :  { %v15_v11 = vld [vmem:[%s1209_s0] sm:$0xff]  ;;  %v39_v13 = vld [vmem:[%s1209_s0 + $0x90] sm:$0xff]  ;;  %v49_v16 = vmax.bf16 %v928_v14, %v17_v12  ;;  %v922_v22 = vld [vmem:[%s1208_s1 + $0x48] sm:$0xff]  }
   0x6   :  { %v47_v15 = vmax.bf16 %v928_v14, %v15_v11  ;;  %v41_v17 = vld [vmem:[%s1209_s0 + $0x9c] sm:$0xff]  ;;  %v71_v18 = vmax.bf16 %v928_v14, %v39_v13  ;;  %v921_v20 = vld [vmem:[%s1208_s1 + $0x10] sm:$0xff]   ;;  %v923_v24 = vld [vmem:[%s1208_s1 + $0x8] sm:$0xff]  }
   0x7   :  { %802 = vmatpush3.bf16.msra.mxu0 %v913_v3  ;;  %902 = vmatpush3.bf16.msra.mxu1 %v913_v3  ;;  %v73_v19 = vmax.bf16 %v928_v14, %v41_v17  ;;  %v924_v25 = vld [vmem:[%s1208_s1 + $0x40] sm:$0xff]   ;;  %v19_v26 = vld [vmem:[%s1209_s0 + $0x18] sm:$0xff]  ;;  %v43_v28 = vld [vmem:[%s1209_s0 + $0xa8] sm:$0xff] }
   0x8   :  { %803 = vmatprep.subr.bf16.mxu0 %v914_v4  ;;  %895 = vmatprep.subr.bf16.mxu1 %v914_v4  ;;  %v671_v21 = vcombine.high %v47_v15, %v49_v16  ;;  %v21_v27 = vld [vmem:[%s1209_s0 + $0x24] sm:$0xff]  ;;  %v45_v29 = vld [vmem:[%s1209_s0 + $0xb4] sm:$0xff]  ;;  %v51_v31 = vmax.bf16 %v928_v14, %v19_v26  ;;  %v75_v34 = vmax.bf16 %v928_v14, %v43_v28  ;;  %v25_v42 = vld [vmem:[%s1209_s0 + $0x3c] sm:$0xff] }
   0x9   :  { %v689_v23 = vcombine.high %v71_v18, %v73_v19  ;;  %v925_v30 = vld [vmem:[%s1208_s1] sm:$0xff]   ;;  %v53_v32 = vmax.bf16 %v928_v14, %v21_v27  ;;  %v926_v33 = vld [vmem:[%s1208_s1 + $0x88] sm:$0xff]   ;;  %v77_v35 = vmax.bf16 %v928_v14, %v45_v29  ;;  %v670_v36 = vcombine.low %v47_v15, %v49_v16  ;;  %v23_v40 = vld [vmem:[%s1209_s0 + $0x30] sm:$0xff] }
   0xa   :  { %407 = vmatprep.mubr.bf16.mxu0 %v671_v21  ;;  %v688_v37 = vcombine.low %v71_v18, %v73_v19  ;;  %v927_v39 = vld [vmem:[%s1208_s1 + $0x80] sm:$0xff]   ;;  %v16_v43 = vld [vmem:[%s1209_s0 + $0x8] sm:$0xf]  ;;  %v18_v44 = vld [vmem:[%s1209_s0 + $0x14] sm:$0xf]  ;;  %v55_v45 = vmax.bf16 %v928_v14, %v23_v40  ;;  %v57_v46 = vmax.bf16 %v928_v14, %v25_v42 }
   0xb   :  { %804 = vmatpush3.bf16.msra.mxu0 %v915_v5  ;;  %903 = vmatpush3.bf16.msra.mxu1 %v915_v5  ;;  %v674_v38 = vcombine.high %v51_v31, %v53_v32  ;;  %v692_v41 = vcombine.high %v75_v34, %v77_v35  ;;  %v48_v47 = vmax.bf16 %v928_v14, %v16_v43  ;;  %v20_v53 = vld [vmem:[%s1209_s0 + $0x20] sm:$0xf]  ;;  %v22_v54 = vld [vmem:[%s1209_s0 + $0x2c] sm:$0xf]  ;;  %v29_v56 = vld [vmem:[%s1209_s0 + $0x54] sm:$0xff] }
   0xc   :  { %805 = vmatprep.subr.bf16.mxu0 %v916_v6  ;;  %896 = vmatprep.subr.bf16.mxu1 %v916_v6  ;;  %v50_v48 = vmax.bf16 %v928_v14, %v18_v44  ;;  %v673_v49 = vcombine.low %v51_v31, %v53_v32  ;;  %v691_v50 = vcombine.low %v75_v34, %v77_v35  ;;  %v27_v55 = vld [vmem:[%s1209_s0 + $0x48] sm:$0xff]  ;;  %v24_v57 = vld [vmem:[%s1209_s0 + $0x38] sm:$0xf]  ;;  %v26_v58 = vld [vmem:[%s1209_s0 + $0x44] sm:$0xf] }
   0xd   :  { %455 = vmatprep.mubr.bf16.mxu1 %v689_v23  ;;  %v677_v51 = vcombine.high %v55_v45, %v57_v46  ;;  %v52_v59 = vmax.bf16 %v928_v14, %v20_v53  ;;  %v54_v60 = vmax.bf16 %v928_v14, %v22_v54  ;;  %v59_v61 = vmax.bf16 %v928_v14, %v27_v55  ;;  %v28_v5 = vld [vmem:[%s1209_s0 + $0x50] sm:$0xf]  ;;  %v30_v6 = vld [vmem:[%s1209_s0 + $0x5c] sm:$0xf]  ;;  %v38_v23 = vld [vmem:[%s1209_s0 + $0x8c] sm:$0xf] }
   0xe   :  { %v672_v52 = vcombine.low %v48_v47, %v50_v48  ;;  %v61_v62 = vmax.bf16 %v928_v14, %v29_v56  ;;  %v56_v63 = vmax.bf16 %v928_v14, %v24_v57  ;;  %v58_v0 = vmax.bf16 %v928_v14, %v26_v58  ;;  %v40_v26 = vld [vmem:[%s1209_s0 + $0x98] sm:$0xf]  ;;  %v42_v27 = vld [vmem:[%s1209_s0 + $0xa4] sm:$0xf] }
   0xf   :  { %806 = vmatpush3.bf16.msra.mxu0 %v917_v7  ;;  %904 = vmatpush3.bf16.msra.mxu1 %v917_v7  ;;  %v676_v1 = vcombine.low %v55_v45, %v57_v46  ;;  %v675_v2 = vcombine.low %v52_v59, %v54_v60  ;;  %v31_v7 = vld [vmem:[%s1209_s0 + $0x60] sm:$0xff]  ;;  %v60_v11 = vmax.bf16 %v928_v14, %v28_v5 }
  0x10   :  { %807 = vmatprep.subr.bf16.mxu0 %v918_v8  ;;  %897 = vmatprep.subr.bf16.mxu1 %v918_v8  ;;  %v680_v3 = vcombine.high %v59_v61, %v61_v62  ;;  %v678_v4 = vcombine.low %v56_v63, %v58_v0  ;;  %v33_v8 = vld [vmem:[%s1209_s0 + $0x6c] sm:$0xff]  ;;  %v62_v12 = vmax.bf16 %v928_v14, %v30_v6  ;;  %v1158_v63 = vld [vmem:[%s1210_s2] ss:$0 sm:$0xff] }
  0x11   :  { %v63_v13 = vmax.bf16 %v928_v14, %v31_v7  ;;  %v65_v15 = vmax.bf16 %v928_v14, %v33_v8  ;;  %v679_v18 = vcombine.low %v59_v61, %v61_v62  ;;  %v70_v29 = vmax.bf16 %v928_v14, %v38_v23 }
  0x12   :  { %v681_v19 = vcombine.low %v60_v11, %v62_v12  ;;  %v72_v32 = vmax.bf16 %v928_v14, %v40_v26 }
  0x13   :  { %808 = vmatpush3.bf16.msra.mxu0 %v919_v9  ;;  %905 = vmatpush3.bf16.msra.mxu1 %v919_v9  ;;  %v32_v9 = vld [vmem:[%s1209_s0 + $0x68] sm:$0xf]  ;;  %v682_v34 = vcombine.low %v63_v13, %v65_v15 }
  0x14   :  { %809 = vmatprep.subr.bf16.mxu0 %v920_v10  ;;  %898 = vmatprep.subr.bf16.mxu1 %v920_v10  ;;  %v34_v10 = vld [vmem:[%s1209_s0 + $0x74] sm:$0xf]  ;;  %v64_v16 = vmax.bf16 %v928_v14, %v32_v9 }
  0x15   :  { %v66_v17 = vmax.bf16 %v928_v14, %v34_v10 }
  0x17   :  { %810 = vmatpush3.bf16.msra.mxu0 %v921_v20  ;;  %906 = vmatpush3.bf16.msra.mxu1 %v921_v20  ;;  %v683_v20 = vcombine.high %v63_v13, %v65_v15  ;;  %v684_v21 = vcombine.low %v64_v16, %v66_v17 }
  0x18   :  { %811 = vmatprep.subr.bf16.mxu0 %v922_v22  ;;  %899 = vmatprep.subr.bf16.mxu1 %v922_v22  ;;  %v36_v22 = vld [vmem:[%s1209_s0 + $0x80] sm:$0xf] }
  0x19   :  { %v68_v28 = vmax.bf16 %v928_v14, %v36_v22 }
  0x1b   :  { %812 = vmatpush3.bf16.msra.mxu0 %v923_v24  ;;  %907 = vmatpush3.bf16.msra.mxu1 %v923_v24  ;;  %v35_v24 = vld [vmem:[%s1209_s0 + $0x78] sm:$0xff]  ;;  %v687_v35 = vcombine.low %v68_v28, %v70_v29 }
  0x1c   :  { %813 = vmatprep.subr.bf16.mxu0 %v924_v25  ;;  %900 = vmatprep.subr.bf16.mxu1 %v924_v25  ;;  %v37_v25 = vld [vmem:[%s1209_s0 + $0x84] sm:$0xff] }
  0x1d   :  { %v69_v31 = vmax.bf16 %v928_v14, %v37_v25 }
  0x1f   :  { %814 = vmatpush3.bf16.msra.mxu0 %v925_v30  ;;  %908 = vmatpush3.bf16.msra.mxu1 %v925_v30  ;;  %v67_v30 = vmax.bf16 %v928_v14, %v35_v24 }
  0x20   :  { %873 = vmatprep.subr.bf16.mxu1 %v926_v33 }
  0x21   :  { %v685_v42 = vcombine.low %v67_v30, %v69_v31 }
  0x22   :  { %408 = vmatmul.mubr.bf16.vlgmr.msra.gmra.mxu0 %v670_v36  ;;  %456 = vmatmul.mubr.bf16.vlgmr.msra.gmra.mxu1 %v688_v37  ;;  %v686_v36 = vcombine.high %v67_v30, %v69_v31 }
  0x23   :  { %874 = vmatpush3.bf16.msra.mxu1 %v926_v33  ;;  %415 = vmatprep.mubr.bf16.mxu0 %v674_v38  ;;  %v74_v33 = vmax.bf16 %v928_v14, %v42_v27  ;;  %v44_v38 = vld [vmem:[%s1209_s0 + $0xb0] sm:$0xf] }
  0x24   :  { %463 = vmatprep.mubr.bf16.mxu1 %v692_v41  ;;  %875 = vmatprep.subr.bf16.mxu1 %v927_v39  ;;  %v76_v40 = vmax.bf16 %v928_v14, %v44_v38 }
  0x25   :  { %v690_v37 = vcombine.low %v72_v32, %v74_v33 }
  0x27   :  { %876 = vmatpush3.bf16.msra.mxu1 %v927_v39  ;;  %v46_v39 = vld [vmem:[%s1209_s0 + $0xbc] sm:$0xf] }
  0x28   :  { %v78_v41 = vmax.bf16 %v928_v14, %v46_v39 }
  0x2a   :  { %416 = vmatmul.mubr.bf16.gmra.mxu0 %v673_v49  ;;  %464 = vmatmul.mubr.bf16.gmra.mxu1 %v691_v50  ;;  %v693_v43 = vcombine.low %v76_v40, %v78_v41 }
  0x2b   :  { %423 = vmatprep.mubr.bf16.mxu0 %v677_v51  ;;  %877 = vmatprep.mubr.msk.bf16.mxu1 %vm350_vm0, %v672_v52 }
  0x32   :  { %424 = vmatmul.mubr.bf16.gmra.mxu0 %v676_v1  ;;  %878 = vmatmul.mubr.msk.bf16.vlgmr.msra.gmra.mxu1 %vm350_vm0, %v675_v2 }
  0x33   :  { %431 = vmatprep.mubr.bf16.mxu0 %v680_v3  ;;  %881 = vmatprep.mubr.msk.bf16.mxu1 %vm350_vm0, %v678_v4 }
  0x3a   :  { %432 = vmatmul.mubr.bf16.gmra.mxu0 %v679_v18  ;;  %882 = vmatmul.mubr.msk.bf16.gmra.mxu1 %vm350_vm0, %v681_v19 }
  0x3b   :  { %439 = vmatprep.mubr.bf16.mxu0 %v683_v20  ;;  %885 = vmatprep.mubr.msk.bf16.mxu1 %vm350_vm0, %v684_v21 }
  0x42   :  { %440 = vmatmul.mubr.bf16.gmra.mxu0 %v682_v34  ;;  %886 = vmatmul.mubr.msk.bf16.gmra.mxu1 %vm350_vm0, %v687_v35 }
  0x43   :  { %447 = vmatprep.mubr.bf16.mxu0 %v686_v36  ;;  %889 = vmatprep.mubr.msk.bf16.mxu1 %vm350_vm0, %v690_v37 }
  0x4a   :  { %448 = vmatmul.mubr.bf16.gmra.mxu0 %v685_v42  ;;  %890 = vmatmul.mubr.msk.bf16.gmra.mxu1 %vm350_vm0, %v693_v43 }
  0xe2   :  { %v815_v44 = vpop.f32.mrf.mxu0  ;;  %v1139_v45 = vpop.f32.mrf.mxu1 }
  0xe4   :  { %v816_v46 = vpop.f32.mrf.mxu0  ;;  %v1141_v47 = vpop.f32.mrf.mxu1 }
  0xe5   :  { %v817_v60 = vadd.f32 %v816_v46, %v815_v44 }
  0xe6   :  { %v818_v48 = vpop.f32.mrf.mxu0  ;;  %v1143_v49 = vpop.f32.mrf.mxu1 }
  0xe7   :  { %v410_v6 = vadd.f32 %v817_v60, %v1158_v63 }
  0xe8   :  { %v819_v50 = vpop.f32.mrf.mxu0  ;;  %v1145_v51 = vpop.f32.mrf.mxu1 }
  0xe9   :  { %v820_v1 = vadd.f32 %v819_v50, %v818_v48 }
  0xea   :  { %v821_v14 = vpop.f32.mrf.mxu0  ;;  %v1147_v52 = vpop.f32.mrf.mxu1 }
  0xeb   :  { %v413_v12 = vadd.f32 %v820_v1, %v1158_v63 }
  0xec   :  { %v822_v53 = vpop.f32.mrf.mxu0  ;;  %v1149_v54 = vpop.f32.mrf.mxu1 }
  0xed   :  { %v823_v57 = vadd.f32 %v822_v53, %v821_v14  ;;  %v859_v60 = vadd.f32 %v1149_v54, %v1147_v52 }
  0xee   :  { %v824_v55 = vpop.f32.mrf.mxu0  ;;  %v1151_v56 = vpop.f32.mrf.mxu1 }
  0xef   :  { %v418_v2 = vadd.f32 %v823_v57, %v1158_v63 }
  0xf0   :  { %v825_v58 = vpop.f32.mrf.mxu0  ;;  %v1153_v59 = vpop.f32.mrf.mxu1 }
  0xf1   :  { %v826_v61 = vadd.f32 %v825_v58, %v824_v55 }
  0xf2   :  { %v827_v62 = vpop.f32.mrf.mxu0  ;;  %v879_v0 = vpop.f32.mrf.mxu1 }
  0xf3   :  { %v515_v5 = vadd.f32 %v879_v0, %v418_v2  ;;  %v421_v7 = vadd.f32 %v826_v61, %v1158_v63 }
  0xf4   :  { %v828_v3 = vpop.f32.mrf.mxu0  ;;  %v506_v4 = vpop.f32.mrf.mxu1 }
  0xf5   :  { %v507_v10 = vadd.f32 %v506_v4, %v410_v6  ;;  %v571_v16 = vmax.f32 %v515_v5, 0.0  ;;  %v829_v17 = vadd.f32 %v828_v3, %v827_v62  ;;  %v862_v3 = vadd.f32 %v1153_v59, %v1151_v56 }
  0xf6   :  { %v830_v8 = vpop.f32.mrf.mxu0  ;;  %v880_v9 = vpop.f32.mrf.mxu1  ;;  %v853_v6 = vadd.f32 %v1141_v47, %v1139_v45 }
  0xf7   :  { %v518_v11 = vadd.f32 %v880_v9, %v421_v7  ;;  %v569_v22 = vmax.f32 %v507_v10, 0.0  ;;  %v426_v30 = vadd.f32 %v829_v17, %v1158_v63  ;;  %v466_v9 = vadd.f32 %v859_v60, %v1158_v63 }
  0xf8   :  { %v831_v13 = vpop.f32.mrf.mxu0  ;;  %v509_v15 = vpop.f32.mrf.mxu1  ;;  %v856_v10 = vadd.f32 %v1145_v51, %v1143_v49  ;;  %v469_v45 = vadd.f32 %v862_v3, %v1158_v63  ;;  %v458_v47 = vadd.f32 %v853_v6, %v1158_v63 }
  0xf9   :  { %v572_v18 = vmax.f32 %v518_v11, 0.0  ;;  %v510_v19 = vadd.f32 %v509_v15, %v413_v12  ;;  %v832_v24 = vadd.f32 %v831_v13, %v830_v8 }
  0xfa   :  { %v833_v20 = vpop.f32.mrf.mxu0  ;;  %v883_v21 = vpop.f32.mrf.mxu1  ;;  %v461_v49 = vadd.f32 %v856_v10, %v1158_v63 }
  0xfb   :  { %v760_v23 = vpack.c.bf16 %v572_v18, %v571_v16  ;;  %v570_v25 = vmax.f32 %v510_v19, 0.0  ;;  %v429_v35 = vadd.f32 %v832_v24, %v1158_v63 }
  0xfc   :  { %v834_v26 = vpop.f32.mrf.mxu0  ;;  %v522_v27 = vpop.f32.mrf.mxu1 }
  0xfd   :  { %792 = vst [vmem:[%s1211_s3 + $0x8] sm:$0xff] %v760_v23   ;;  %v755_v28 = vpack.c.bf16 %v570_v25, %v569_v22  ;;  %v835_v29 = vadd.f32 %v834_v26, %v833_v20  ;;  %v523_v34 = vadd.f32 %v522_v27, %v426_v30 }
  0xfe   :  { %v836_v31 = vpop.f32.mrf.mxu0  ;;  %v884_v32 = vpop.f32.mrf.mxu1 }
  0xff   :  { %756 = vst [vmem:[%s1211_s3] sm:$0xff] %v755_v28   ;;  %v434_v33 = vadd.f32 %v835_v29, %v1158_v63  ;;  %v573_v43 = vmax.f32 %v523_v34, 0.0 }
 0x100   :  { %v837_v36 = vpop.f32.mrf.mxu0  ;;  %v525_v37 = vpop.f32.mrf.mxu1 }
 0x101   :  { %v838_v38 = vadd.f32 %v837_v36, %v836_v31  ;;  %v526_v39 = vadd.f32 %v525_v37, %v429_v35  ;;  %v531_v42 = vadd.f32 %v883_v21, %v434_v33 }
 0x102   :  { %v839_v40 = vpop.f32.mrf.mxu0  ;;  %v887_v41 = vpop.f32.mrf.mxu1 }
 0x103   :  { %v437_v44 = vadd.f32 %v838_v38, %v1158_v63  ;;  %v574_v46 = vmax.f32 %v526_v39, 0.0  ;;  %v575_v61 = vmax.f32 %v531_v42, 0.0 }
 0x104   :  { %v840_v48 = vpop.f32.mrf.mxu0  ;;  %v538_v50 = vpop.f32.mrf.mxu1 }
 0x105   :  { %v534_v14 = vadd.f32 %v884_v32, %v437_v44  ;;  %v765_v53 = vpack.c.bf16 %v574_v46, %v573_v43  ;;  %v841_v55 = vadd.f32 %v840_v48, %v839_v40 }
 0x106   :  { %v842_v57 = vpop.f32.mrf.mxu0  ;;  %v888_v58 = vpop.f32.mrf.mxu1 }
 0x107   :  { %v576_v62 = vmax.f32 %v534_v14, 0.0  ;;  %793 = vst [vmem:[%s1211_s3 + $0x10] sm:$0xff] %v765_v53   ;;  %v442_v0 = vadd.f32 %v841_v55, %v1158_v63 }
 0x108   :  { %v843_v1 = vpop.f32.mrf.mxu0  ;;  %v541_v2 = vpop.f32.mrf.mxu1 }
 0x109   :  { %v770_v4 = vpack.c.bf16 %v576_v62, %v575_v61  ;;  %v844_v5 = vadd.f32 %v843_v1, %v842_v57  ;;  %v539_v54 = vadd.f32 %v538_v50, %v442_v0 }
 0x10a   :  { %v845_v7 = vpop.f32.mrf.mxu0  ;;  %v891_v52 = vpop.f32.mrf.mxu1 }
 0x10b   :  { %794 = vst [vmem:[%s1211_s3 + $0x18] sm:$0xff] %v770_v4   ;;  %v445_v8 = vadd.f32 %v844_v5, %v1158_v63  ;;  %v563_v12 = vadd.f32 %v891_v52, %v466_v9  ;;  %v577_v17 = vmax.f32 %v539_v54, 0.0 }
 0x10c   :  { %v846_v56 = vpop.f32.mrf.mxu0  ;;  %v554_v59 = vpop.f32.mrf.mxu1 }
 0x10d   :  { %v542_v11 = vadd.f32 %v541_v2, %v445_v8  ;;  %v847_v13 = vadd.f32 %v846_v56, %v845_v7  ;;  %v555_v21 = vadd.f32 %v554_v59, %v458_v47  ;;  %v583_v24 = vmax.f32 %v563_v12, 0.0 }
 0x10e   :  { %v848_v15 = vpop.f32.mrf.mxu0  ;;  %v892_v16 = vpop.f32.mrf.mxu1 }
 0x10f   :  { %v578_v18 = vmax.f32 %v542_v11, 0.0  ;;  %v450_v19 = vadd.f32 %v847_v13, %v1158_v63  ;;  %v566_v20 = vadd.f32 %v892_v16, %v469_v45  ;;  %v581_v31 = vmax.f32 %v555_v21, 0.0 }
 0x110   :  { %v849_v22 = vpop.f32.mrf.mxu0  ;;  %v557_v51 = vpop.f32.mrf.mxu1 }
 0x111   :  { %v775_v23 = vpack.c.bf16 %v578_v18, %v577_v17  ;;  %v584_v25 = vmax.f32 %v566_v20, 0.0  ;;  %v850_v26 = vadd.f32 %v849_v22, %v848_v15  ;;  %v558_v27 = vadd.f32 %v557_v51, %v461_v49 }
 0x112   :  { %v547_v28 = vadd.f32 %v887_v41, %v450_v19 }
 0x113   :  { %795 = vst [vmem:[%s1211_s3 + $0x20] sm:$0xff] %v775_v23   ;;  %v790_v29 = vpack.c.bf16 %v584_v25, %v583_v24  ;;  %v453_v30 = vadd.f32 %v850_v26, %v1158_v63  ;;  %v582_v32 = vmax.f32 %v558_v27, 0.0 }
 0x114   :  { %v579_v35 = vmax.f32 %v547_v28, 0.0 }
 0x115   :  { %798 = vst [vmem:[%s1211_s3 + $0x38] sm:$0xff] %v790_v29   ;;  %v550_v33 = vadd.f32 %v888_v58, %v453_v30  ;;  %v785_v34 = vpack.c.bf16 %v582_v32, %v581_v31 }
 0x117   :  { %v580_v36 = vmax.f32 %v550_v33, 0.0  ;;  %797 = vst [vmem:[%s1211_s3 + $0x30] sm:$0xff] %v785_v34  }
 0x119   :  { %v780_v37 = vpack.c.bf16 %v580_v36, %v579_v35 }
 0x11b   :  { %796 = vst [vmem:[%s1211_s3 + $0x28] sm:$0xff] %v780_v37  }

// kernel: _lambda_.17
= control target key start
LH: loop header
LB: loop body
LE: loop exit
PB: predicated region body
PF: predicated region fallthrough
CT: control target
= control target key end

     0   :  { %vm1566_vm0 = vcmask 523264   ;;  %s2956_s1 = inlined_call_operand.vmem [shape: bf16[1152,64], index: 1, kind: input, shape index: {}]   ;;  %s2957_s0 = inlined_call_operand.vmem [shape: bf16[128,1152], index: 0, kind: input, shape index: {}]   ;;  %s2958_s2 = inlined_call_operand.vmem [shape: f32[1,64], index: 2, kind: input, shape index: {}]   ;;  %s2959_s3 = inlined_call_operand.vmem [shape: f32[128,64], index: 3, kind: input, shape index: {}]   ;;  %s2960_s4 = inlined_call_operand.vmem [shape: f32[128,64], index: 4, kind: output, shape index: {}]  }
   0x1   :  { %v2052_v0 = vld [vmem:[%s2956_s1 + $0x78] sm:$0xff]   ;;  %v2056_v4 = vld [vmem:[%s2956_s1 + $0x70] sm:$0xff]   ;;  %v2060_v8 = vld [vmem:[%s2956_s1 + $0x68] sm:$0xff]  }
   0x2   :  { %v2053_v1 = vld [vmem:[%s2956_s1 + $0xf8] sm:$0xff]   ;;  %1732 = vmatprep.subr.bf16.mxu0 %v2052_v0  ;;  %v2057_v5 = vld [vmem:[%s2956_s1 + $0xf0] sm:$0xff]   ;;  %v2061_v9 = vld [vmem:[%s2956_s1 + $0xe8] sm:$0xff]  }
   0x3   :  { %v2054_v2 = vld [vmem:[%s2956_s1 + $0x38] sm:$0xff]   ;;  %1796 = vmatprep.subr.bf16.mxu1 %v2053_v1  ;;  %v2058_v6 = vld [vmem:[%s2956_s1 + $0x30] sm:$0xff]   ;;  %v2062_v10 = vld [vmem:[%s2956_s1 + $0x28] sm:$0xff]  }
   0x4   :  { %v2055_v3 = vld [vmem:[%s2956_s1 + $0xb8] sm:$0xff]   ;;  %1733 = vmatpush3.bf16.msra.mxu0 %v2054_v2  ;;  %v2059_v7 = vld [vmem:[%s2956_s1 + $0xb0] sm:$0xff]   ;;  %v2063_v11 = vld [vmem:[%s2956_s1 + $0xa8] sm:$0xff]  }
   0x5   :  { %1797 = vmatpush3.bf16.msra.mxu1 %v2055_v3  ;;  %1734 = vmatprep.subr.bf16.mxu0 %v2056_v4  ;;  %v2064_v12 = vld [vmem:[%s2956_s1 + $0x60] sm:$0xff]   ;;  %v2068_v16 = vld [vmem:[%s2956_s1 + $0x58] sm:$0xff]   ;;  %v2072_v20 = vld [vmem:[%s2956_s1 + $0x50] sm:$0xff]  }
   0x6   :  { %1798 = vmatprep.subr.bf16.mxu1 %v2057_v5  ;;  %v2065_v13 = vld [vmem:[%s2956_s1 + $0xe0] sm:$0xff]   ;;  %v2069_v17 = vld [vmem:[%s2956_s1 + $0xd8] sm:$0xff]   ;;  %v2073_v21 = vld [vmem:[%s2956_s1 + $0xd0] sm:$0xff]  }
   0x7   :  { %v2066_v14 = vld [vmem:[%s2956_s1 + $0x20] sm:$0xff]   ;;  %v2070_v18 = vld [vmem:[%s2956_s1 + $0x18] sm:$0xff]   ;;  %v2074_v22 = vld [vmem:[%s2956_s1 + $0x10] sm:$0xff]  }
   0x8   :  { %1735 = vmatpush3.bf16.msra.mxu0 %v2058_v6  ;;  %v2067_v15 = vld [vmem:[%s2956_s1 + $0xa0] sm:$0xff]   ;;  %v2071_v19 = vld [vmem:[%s2956_s1 + $0x98] sm:$0xff]   ;;  %v2075_v23 = vld [vmem:[%s2956_s1 + $0x90] sm:$0xff]  }
   0x9   :  { %1799 = vmatpush3.bf16.msra.mxu1 %v2059_v7  ;;  %1736 = vmatprep.subr.bf16.mxu0 %v2060_v8  ;;  %v2076_v24 = vld [vmem:[%s2956_s1 + $0x48] sm:$0xff]   ;;  %v2080_v28 = vld [vmem:[%s2956_s1 + $0x40] sm:$0xff]   ;;  %v2090_v36 = vld [vmem:[%s2956_s1 + $0x178] sm:$0xff]  }
   0xa   :  { %1800 = vmatprep.subr.bf16.mxu1 %v2061_v9  ;;  %v2077_v25 = vld [vmem:[%s2956_s1 + $0xc8] sm:$0xff]   ;;  %v2081_v29 = vld [vmem:[%s2956_s1 + $0xc0] sm:$0xff]   ;;  %v2091_v37 = vld [vmem:[%s2956_s1 + $0x1f8] sm:$0xff]  }
   0xb   :  { %v2078_v26 = vld [vmem:[%s2956_s1 + $0x8] sm:$0xff]   ;;  %v2082_v30 = vld [vmem:[%s2956_s1] sm:$0xff]   ;;  %v2092_v38 = vld [vmem:[%s2956_s1 + $0x138] sm:$0xff]  }
   0xc   :  { %1737 = vmatpush3.bf16.msra.mxu0 %v2062_v10  ;;  %v2079_v27 = vld [vmem:[%s2956_s1 + $0x88] sm:$0xff]   ;;  %v2083_v31 = vld [vmem:[%s2956_s1 + $0x80] sm:$0xff]   ;;  %v2093_v39 = vld [vmem:[%s2956_s1 + $0x1b8] sm:$0xff]  }
   0xd   :  { %1801 = vmatpush3.bf16.msra.mxu1 %v2063_v11  ;;  %1738 = vmatprep.subr.bf16.mxu0 %v2064_v12  ;;  %v2084_v32 = vld [vmem:[%s2957_s0] ss:$36 sps:$4 sm:$0xff]   ;;  %v2087_v34 = vld [vmem:[%s2957_s0 + $0x8] ss:$36 sps:$4 sm:$0xff]   ;;  %v2096_v41 = vld [vmem:[%s2957_s0 + $0x54] ss:$36 sps:$4 sm:$0xff]  }
   0xe   :  { %1802 = vmatprep.subr.bf16.mxu1 %v2065_v13  ;;  %v2086_v33 = vld [vmem:[%s2957_s0 + $0x4] ss:$36 sps:$4 sm:$0xff]   ;;  %v2089_v35 = vld [vmem:[%s2957_s0 + $0xc] ss:$36 sps:$4 sm:$0xff]   ;;  %v2104_v48 = vld [vmem:[%s2957_s0 + $0x94] ss:$36 sps:$4 sm:$0xff]  }
   0xf   :  { %1081 = vmatprep.mubr.bf16.mxu0 %v2086_v33  ;;  %1178 = vmatprep.mubr.bf16.mxu1 %v2089_v35  ;;  %v2094_v40 = vld [vmem:[%s2957_s0 + $0x4c] ss:$36 sps:$4 sm:$0xff]   ;;  %v2106_v49 = vld [vmem:[%s2957_s0 + $0x9c] ss:$36 sps:$4 sm:$0xff]   ;;  %v2116_v57 = vld [vmem:[%s2957_s0 + $0xe4] ss:$36 sps:$4 sm:$0xff]  }
  0x10   :  { %1739 = vmatpush3.bf16.msra.mxu0 %v2066_v14  ;;  %v2098_v42 = vld [vmem:[%s2957_s0 + $0x48] ss:$36 sps:$4 sm:$0xff]   ;;  %v2099_v43 = vld [vmem:[%s2957_s0 + $0x50] ss:$36 sps:$4 sm:$0xff]   ;;  %v2109_v51 = vld [vmem:[%s2957_s0 + $0x98] ss:$36 sps:$4 sm:$0xff]  }
  0x11   :  { %1803 = vmatpush3.bf16.msra.mxu1 %v2067_v15  ;;  %1740 = vmatprep.subr.bf16.mxu0 %v2068_v16  ;;  %v2100_v44 = vld [vmem:[%s2956_s1 + $0x170] sm:$0xff]   ;;  %v2110_v52 = vld [vmem:[%s2956_s1 + $0x168] sm:$0xff]   ;;  %v2114_v56 = vld [vmem:[%s2957_s0 + $0xdc] ss:$36 sps:$4 sm:$0xff]  }
  0x12   :  { %1804 = vmatprep.subr.bf16.mxu1 %v2069_v17  ;;  %v2101_v45 = vld [vmem:[%s2956_s1 + $0x1f0] sm:$0xff]   ;;  %v2111_v53 = vld [vmem:[%s2956_s1 + $0x1e8] sm:$0xff]   ;;  %v2118_v58 = vld [vmem:[%s2957_s0 + $0xd8] ss:$36 sps:$4 sm:$0xff]  }
  0x13   :  { %v2102_v46 = vld [vmem:[%s2956_s1 + $0x130] sm:$0xff]   ;;  %v2112_v54 = vld [vmem:[%s2956_s1 + $0x128] sm:$0xff]   ;;  %v2119_v59 = vld [vmem:[%s2957_s0 + $0xe0] ss:$36 sps:$4 sm:$0xff]  }
  0x14   :  { %1741 = vmatpush3.bf16.msra.mxu0 %v2070_v18  ;;  %v2103_v47 = vld [vmem:[%s2956_s1 + $0x1b0] sm:$0xff]   ;;  %v2113_v55 = vld [vmem:[%s2956_s1 + $0x1a8] sm:$0xff]   ;;  %v2120_v60 = vld [vmem:[%s2956_s1 + $0x160] sm:$0xff]  }
  0x15   :  { %1805 = vmatpush3.bf16.msra.mxu1 %v2071_v19  ;;  %1742 = vmatprep.subr.bf16.mxu0 %v2072_v20  ;;  %v2108_v50 = vld [vmem:[%s2957_s0 + $0x90] ss:$36 sps:$4 sm:$0xff]   ;;  %v2121_v61 = vld [vmem:[%s2956_s1 + $0x1e0] sm:$0xff]   ;;  %v2130_v3 = vld [vmem:[%s2956_s1 + $0x158] sm:$0xff]  }
  0x16   :  { %1806 = vmatprep.subr.bf16.mxu1 %v2073_v21  ;;  %v2122_v62 = vld [vmem:[%s2956_s1 + $0x120] sm:$0xff]   ;;  %v2126_v1 = vld [vmem:[%s2957_s0 + $0x12c] ss:$36 sps:$4 sm:$0xff]   ;;  %v2131_v5 = vld [vmem:[%s2956_s1 + $0x1d8] sm:$0xff]  }
  0x17   :  { %v2123_v63 = vld [vmem:[%s2956_s1 + $0x1a0] sm:$0xff]   ;;  %v2129_v4 = vld [vmem:[%s2957_s0 + $0x128] ss:$36 sps:$4 sm:$0xff]   ;;  %v2132_v6 = vld [vmem:[%s2956_s1 + $0x118] sm:$0xff]  }
  0x18   :  { %1743 = vmatpush3.bf16.msra.mxu0 %v2074_v22  ;;  %v2124_v0 = vld [vmem:[%s2957_s0 + $0x124] ss:$36 sps:$4 sm:$0xff]   ;;  %v2133_v7 = vld [vmem:[%s2956_s1 + $0x198] sm:$0xff]   ;;  %v2134_v8 = vld [vmem:[%s2957_s0 + $0x16c] ss:$36 sps:$4 sm:$0xff]  }
  0x19   :  { %1807 = vmatpush3.bf16.msra.mxu1 %v2075_v23  ;;  %1744 = vmatprep.subr.bf16.mxu0 %v2076_v24  ;;  %v2128_v2 = vld [vmem:[%s2957_s0 + $0x120] ss:$36 sps:$4 sm:$0xff]   ;;  %v2136_v9 = vld [vmem:[%s2957_s0 + $0x174] ss:$36 sps:$4 sm:$0xff]   ;;  %v2138_v12 = vld [vmem:[%s2957_s0 + $0x168] ss:$36 sps:$4 sm:$0xff]  }
  0x1a   :  { %1808 = vmatprep.subr.bf16.mxu1 %v2077_v25  ;;  %v2140_v10 = vld [vmem:[%s2956_s1 + $0x150] sm:$0xff]   ;;  %v2146_v17 = vld [vmem:[%s2957_s0 + $0x1bc] ss:$36 sps:$4 sm:$0xff]   ;;  %v2150_v18 = vld [vmem:[%s2956_s1 + $0x148] sm:$0xff]  }
  0x1b   :  { %v2141_v11 = vld [vmem:[%s2956_s1 + $0x1d0] sm:$0xff]   ;;  %v2151_v19 = vld [vmem:[%s2956_s1 + $0x1c8] sm:$0xff]   ;;  %v2149_v23 = vld [vmem:[%s2957_s0 + $0x1b8] ss:$36 sps:$4 sm:$0xff]  }
  0x1c   :  { %1745 = vmatpush3.bf16.msra.mxu0 %v2078_v26  ;;  %v2142_v13 = vld [vmem:[%s2956_s1 + $0x110] sm:$0xff]   ;;  %v2152_v20 = vld [vmem:[%s2956_s1 + $0x108] sm:$0xff]   ;;  %v2154_v24 = vld [vmem:[%s2957_s0 + $0x1fc] ss:$36 sps:$4 sm:$0xff]  }
  0x1d   :  { %1809 = vmatpush3.bf16.msra.mxu1 %v2079_v27  ;;  %1746 = vmatprep.subr.bf16.mxu0 %v2080_v28  ;;  %v2143_v14 = vld [vmem:[%s2956_s1 + $0x190] sm:$0xff]   ;;  %v2153_v21 = vld [vmem:[%s2956_s1 + $0x188] sm:$0xff]   ;;  %v2160_v26 = vld [vmem:[%s2956_s1 + $0x140] sm:$0xff]  }
  0x1e   :  { %1810 = vmatprep.subr.bf16.mxu1 %v2081_v29  ;;  %v2139_v15 = vld [vmem:[%s2957_s0 + $0x170] ss:$36 sps:$4 sm:$0xff]   ;;  %v2156_v25 = vld [vmem:[%s2957_s0 + $0x204] ss:$36 sps:$4 sm:$0xff]  }
  0x1f   :  { %v2144_v16 = vld [vmem:[%s2957_s0 + $0x1b4] ss:$36 sps:$4 sm:$0xff]   ;;  %v2161_v27 = vld [vmem:[%s2956_s1 + $0x1c0] sm:$0xff]  }
  0x20   :  { %1747 = vmatpush3.bf16.msra.mxu0 %v2082_v30  ;;  %v2148_v22 = vld [vmem:[%s2957_s0 + $0x1b0] ss:$36 sps:$4 sm:$0xff]   ;;  %v2162_v28 = vld [vmem:[%s2956_s1 + $0x100] sm:$0xff]   ;;  %v2158_v30 = vld [vmem:[%s2957_s0 + $0x1f8] ss:$36 sps:$4 sm:$0xff]  }
  0x21   :  { %1811 = vmatpush3.bf16.msra.mxu1 %v2083_v31  ;;  %1860 = vmatprep.subr.bf16.mxu0 %v2090_v36  ;;  %v2163_v29 = vld [vmem:[%s2956_s1 + $0x180] sm:$0xff]   ;;  %v2166_v33 = vld [vmem:[%s2957_s0 + $0x14] ss:$36 sps:$4 sm:$0xff]  }
  0x22   :  { %1924 = vmatprep.subr.bf16.mxu1 %v2091_v37  ;;  %v2159_v31 = vld [vmem:[%s2957_s0 + $0x200] ss:$36 sps:$4 sm:$0xff]   ;;  %v2164_v35 = vld [vmem:[%s2957_s0 + $0x10] ss:$36 sps:$4 sm:$0xff]   ;;  %v2167_v36 = vld [vmem:[%s2957_s0 + $0x18] ss:$36 sps:$4 sm:$0xff]  }
  0x23   :  { %1082 = vmatmul.mubr.bf16.vlgmr.msra.gmra.mxu0 %v2084_v32  ;;  %v2170_v32 = vld [vmem:[%s2956_s1 + $0x238] sm:$0xff]  }
  0x24   :  { %1179 = vmatmul.mubr.bf16.vlgmr.msra.gmra.mxu1 %v2087_v34  ;;  %1861 = vmatpush3.bf16.msra.mxu0 %v2092_v38  ;;  %v2169_v34 = vld [vmem:[%s2957_s0 + $0x1c] ss:$36 sps:$4 sm:$0xff]   ;;  %v2173_v38 = vld [vmem:[%s2957_s0 + $0x64] ss:$36 sps:$4 sm:$0xff]  }
  0x25   :  { %1925 = vmatpush3.bf16.msra.mxu1 %v2093_v39  ;;  %1089 = vmatprep.mubr.bf16.mxu0 %v2094_v40  ;;  %v2171_v37 = vld [vmem:[%s2957_s0 + $0x5c] ss:$36 sps:$4 sm:$0xff]   ;;  %v2177_v39 = vld [vmem:[%s2956_s1 + $0x230] sm:$0xff]   ;;  %v2184_v40 = vld [vmem:[%s2956_s1 + $0x228] sm:$0xff]  }
  0x26   :  { %1186 = vmatprep.mubr.bf16.mxu1 %v2096_v41  ;;  %1862 = vmatprep.subr.bf16.mxu0 %v2100_v44  ;;  %v2175_v41 = vld [vmem:[%s2957_s0 + $0x58] ss:$36 sps:$4 sm:$0xff]   ;;  %v2180_v44 = vld [vmem:[%s2957_s0 + $0xac] ss:$36 sps:$4 sm:$0xff]  }
  0x27   :  { %1926 = vmatprep.subr.bf16.mxu1 %v2101_v45  ;;  %v2191_v45 = vld [vmem:[%s2956_s1 + $0x220] sm:$0xff]  }
  0x28   :  { %1863 = vmatpush3.bf16.msra.mxu0 %v2102_v46  ;;  %v2198_v46 = vld [vmem:[%s2956_s1 + $0x218] sm:$0xff]  }
  0x29   :  { %1927 = vmatpush3.bf16.msra.mxu1 %v2103_v47  ;;  %1864 = vmatprep.subr.bf16.mxu0 %v2110_v52  ;;  %v2182_v47 = vld [vmem:[%s2957_s0 + $0xa0] ss:$36 sps:$4 sm:$0xff]   ;;  %v2189_v52 = vld [vmem:[%s2957_s0 + $0xe8] ss:$36 sps:$4 sm:$0xff]  }
  0x2a   :  { %1928 = vmatprep.subr.bf16.mxu1 %v2111_v53  ;;  %v2212_v53 = vld [vmem:[%s2956_s1 + $0x208] sm:$0xff]  }
  0x2b   :  { %1090 = vmatmul.mubr.bf16.gmra.mxu0 %v2098_v42  ;;  %v2176_v42 = vld [vmem:[%s2957_s0 + $0x60] ss:$36 sps:$4 sm:$0xff]  }
  0x2c   :  { %1187 = vmatmul.mubr.bf16.gmra.mxu1 %v2099_v43  ;;  %1097 = vmatprep.mubr.bf16.mxu0 %v2104_v48  ;;  %v2178_v43 = vld [vmem:[%s2957_s0 + $0xa4] ss:$36 sps:$4 sm:$0xff]  }
  0x2d   :  { %1194 = vmatprep.mubr.bf16.mxu1 %v2106_v49  ;;  %1865 = vmatpush3.bf16.msra.mxu0 %v2112_v54  ;;  %v2183_v48 = vld [vmem:[%s2957_s0 + $0xa8] ss:$36 sps:$4 sm:$0xff]   ;;  %v2190_v54 = vld [vmem:[%s2957_s0 + $0xf0] ss:$36 sps:$4 sm:$0xff]  }
  0x2e   :  { %1929 = vmatpush3.bf16.msra.mxu1 %v2113_v55  ;;  %1866 = vmatprep.subr.bf16.mxu0 %v2120_v60  ;;  %v2185_v49 = vld [vmem:[%s2957_s0 + $0xec] ss:$36 sps:$4 sm:$0xff]   ;;  %v2192_v55 = vld [vmem:[%s2957_s0 + $0x134] ss:$36 sps:$4 sm:$0xff]   ;;  %v2199_v60 = vld [vmem:[%s2957_s0 + $0x17c] ss:$36 sps:$4 sm:$0xff]  }
  0x2f   :  { %1930 = vmatprep.subr.bf16.mxu1 %v2121_v61  ;;  %v2201_v61 = vld [vmem:[%s2957_s0 + $0x184] ss:$36 sps:$4 sm:$0xff]  }
  0x31   :  { %1867 = vmatpush3.bf16.msra.mxu0 %v2122_v62  ;;  %v2203_v62 = vld [vmem:[%s2957_s0 + $0x178] ss:$36 sps:$4 sm:$0xff]  }
  0x32   :  { %1931 = vmatpush3.bf16.msra.mxu1 %v2123_v63  ;;  %1868 = vmatprep.subr.bf16.mxu0 %v2130_v3  ;;  %v2204_v63 = vld [vmem:[%s2957_s0 + $0x180] ss:$36 sps:$4 sm:$0xff]   ;;  %v2211_v3 = vld [vmem:[%s2957_s0 + $0x1c8] ss:$36 sps:$4 sm:$0xff]  }
  0x33   :  { %1098 = vmatmul.mubr.bf16.gmra.mxu0 %v2108_v50  ;;  %1932 = vmatprep.subr.bf16.mxu1 %v2131_v5  ;;  %v2187_v50 = vld [vmem:[%s2957_s0 + $0xf4] ss:$36 sps:$4 sm:$0xff]  }
  0x34   :  { %1195 = vmatmul.mubr.bf16.gmra.mxu1 %v2109_v51  ;;  %1105 = vmatprep.mubr.bf16.mxu0 %v2114_v56  ;;  %v2205_v51 = vld [vmem:[%s2956_s1 + $0x210] sm:$0xff]   ;;  %v2194_v56 = vld [vmem:[%s2957_s0 + $0x13c] ss:$36 sps:$4 sm:$0xff]  }
  0x35   :  { %1202 = vmatprep.mubr.bf16.mxu1 %v2116_v57  ;;  %1869 = vmatpush3.bf16.msra.mxu0 %v2132_v6  ;;  %v2219_v57 = vld [vmem:[%s2956_s1 + $0x200] sm:$0xff]   ;;  %v2215_v5 = vld [vmem:[%s2957_s0 + $0x214] ss:$36 sps:$4 sm:$0xff]   ;;  %v2217_v6 = vld [vmem:[%s2957_s0 + $0x208] ss:$36 sps:$4 sm:$0xff]  }
  0x36   :  { %1933 = vmatpush3.bf16.msra.mxu1 %v2133_v7  ;;  %1870 = vmatprep.subr.bf16.mxu0 %v2140_v10  ;;  %v2218_v7 = vld [vmem:[%s2957_s0 + $0x210] ss:$36 sps:$4 sm:$0xff]   ;;  %v2222_v10 = vld [vmem:[%s2957_s0 + $0x68] ss:$36 sps:$4 sm:$0xff]  }
  0x37   :  { %1934 = vmatprep.subr.bf16.mxu1 %v2141_v11  ;;  %v2223_v11 = vld [vmem:[%s2957_s0 + $0x188] ss:$36 sps:$4 sm:$0xff]  }
  0x39   :  { %1871 = vmatpush3.bf16.msra.mxu0 %v2142_v13  ;;  %v2225_v13 = vld [vmem:[%s2957_s0 + $0x1d0] ss:$36 sps:$4 sm:$0xff]  }
  0x3a   :  { %1935 = vmatpush3.bf16.msra.mxu1 %v2143_v14  ;;  %1872 = vmatprep.subr.bf16.mxu0 %v2150_v18  ;;  %v2226_v14 = vld [vmem:[%s2957_s0 + $0xf8] ss:$36 sps:$4 sm:$0xff]   ;;  %v2688_v18 = vld [vmem:[%s2958_s2] ss:$0 sm:$0xff] }
  0x3b   :  { %1106 = vmatmul.mubr.bf16.gmra.mxu0 %v2118_v58  ;;  %1936 = vmatprep.subr.bf16.mxu1 %v2151_v19  ;;  %v2196_v58 = vld [vmem:[%s2957_s0 + $0x130] ss:$36 sps:$4 sm:$0xff]  }
  0x3c   :  { %1203 = vmatmul.mubr.bf16.gmra.mxu1 %v2119_v59  ;;  %1113 = vmatprep.mubr.bf16.mxu0 %v2124_v0  ;;  %v2197_v59 = vld [vmem:[%s2957_s0 + $0x138] ss:$36 sps:$4 sm:$0xff]   ;;  %v2206_v0 = vld [vmem:[%s2957_s0 + $0x1c4] ss:$36 sps:$4 sm:$0xff]  }
  0x3d   :  { %1210 = vmatprep.mubr.bf16.mxu1 %v2126_v1  ;;  %1873 = vmatpush3.bf16.msra.mxu0 %v2152_v20  ;;  %v2208_v1 = vld [vmem:[%s2957_s0 + $0x1cc] ss:$36 sps:$4 sm:$0xff]  }
  0x3e   :  { %1937 = vmatpush3.bf16.msra.mxu1 %v2153_v21  ;;  %1874 = vmatprep.subr.bf16.mxu0 %v2160_v26 }
  0x3f   :  { %1938 = vmatprep.subr.bf16.mxu1 %v2161_v27 }
  0x41   :  { %1875 = vmatpush3.bf16.msra.mxu0 %v2162_v28 }
  0x42   :  { %1939 = vmatpush3.bf16.msra.mxu1 %v2163_v29  ;;  %2004 = vmatprep.subr.bf16.mxu0 %v2170_v32 }
  0x43   :  { %1114 = vmatmul.mubr.bf16.gmra.mxu0 %v2128_v2  ;;  %2036 = vmatprep.subr.bf16.mxu1 %v2170_v32  ;;  %v2210_v2 = vld [vmem:[%s2957_s0 + $0x1c0] ss:$36 sps:$4 sm:$0xff]  }
  0x44   :  { %1211 = vmatmul.mubr.bf16.gmra.mxu1 %v2129_v4  ;;  %1121 = vmatprep.mubr.bf16.mxu0 %v2134_v8  ;;  %v2213_v4 = vld [vmem:[%s2957_s0 + $0x20c] ss:$36 sps:$4 sm:$0xff]   ;;  %v2220_v8 = vld [vmem:[%s2957_s0 + $0x20] ss:$36 sps:$4 sm:$0xff]  }
  0x45   :  { %1218 = vmatprep.mubr.bf16.mxu1 %v2136_v9  ;;  %v2221_v9 = vld [vmem:[%s2957_s0 + $0x140] ss:$36 sps:$4 sm:$0xff]  }
  0x4b   :  { %1122 = vmatmul.mubr.bf16.gmra.mxu0 %v2138_v12  ;;  %v2224_v12 = vld [vmem:[%s2957_s0 + $0xb0] ss:$36 sps:$4 sm:$0xff]  }
  0x4c   :  { %1219 = vmatmul.mubr.bf16.gmra.mxu1 %v2139_v15  ;;  %1129 = vmatprep.mubr.bf16.mxu0 %v2144_v16  ;;  %v2227_v15 = vld [vmem:[%s2957_s0 + $0x218] ss:$36 sps:$4 sm:$0xff]  }
  0x4d   :  { %1226 = vmatprep.mubr.bf16.mxu1 %v2146_v17 }
  0x53   :  { %1130 = vmatmul.mubr.bf16.gmra.mxu0 %v2148_v22 }
  0x54   :  { %1227 = vmatmul.mubr.bf16.gmra.mxu1 %v2149_v23  ;;  %1137 = vmatprep.mubr.bf16.mxu0 %v2154_v24 }
  0x55   :  { %1234 = vmatprep.mubr.bf16.mxu1 %v2156_v25 }
  0x5b   :  { %1138 = vmatmul.mubr.bf16.gmra.mxu0 %v2158_v30 }
  0x5c   :  { %1235 = vmatmul.mubr.bf16.gmra.mxu1 %v2159_v31  ;;  %1275 = vmatprep.mubr.bf16.mxu0 %v2166_v33 }
  0x5d   :  { %1372 = vmatprep.mubr.bf16.mxu1 %v2169_v34 }
  0x63   :  { %1276 = vmatmul.mubr.bf16.vlgmr.msra.gmra.mxu0 %v2164_v35 }
  0x64   :  { %1373 = vmatmul.mubr.bf16.vlgmr.msra.gmra.mxu1 %v2167_v36  ;;  %2005 = vmatpush3.bf16.msra.mxu0 %v2170_v32 }
  0x65   :  { %2044 = vmatpush3.bf16.msra.mxu1 %v2170_v32  ;;  %1283 = vmatprep.mubr.bf16.mxu0 %v2171_v37 }
  0x66   :  { %1380 = vmatprep.mubr.bf16.mxu1 %v2173_v38  ;;  %2006 = vmatprep.subr.bf16.mxu0 %v2177_v39 }
  0x67   :  { %2037 = vmatprep.subr.bf16.mxu1 %v2177_v39 }
  0x68   :  { %2007 = vmatpush3.bf16.msra.mxu0 %v2177_v39 }
  0x69   :  { %2045 = vmatpush3.bf16.msra.mxu1 %v2177_v39  ;;  %2008 = vmatprep.subr.bf16.mxu0 %v2184_v40 }
  0x6a   :  { %2038 = vmatprep.subr.bf16.mxu1 %v2184_v40 }
  0x6b   :  { %1284 = vmatmul.mubr.bf16.gmra.mxu0 %v2175_v41 }
  0x6c   :  { %1381 = vmatmul.mubr.bf16.gmra.mxu1 %v2176_v42  ;;  %1291 = vmatprep.mubr.bf16.mxu0 %v2178_v43 }
  0x6d   :  { %1388 = vmatprep.mubr.bf16.mxu1 %v2180_v44  ;;  %2009 = vmatpush3.bf16.msra.mxu0 %v2184_v40 }
  0x6e   :  { %2046 = vmatpush3.bf16.msra.mxu1 %v2184_v40  ;;  %2010 = vmatprep.subr.bf16.mxu0 %v2191_v45 }
  0x6f   :  { %2039 = vmatprep.subr.bf16.mxu1 %v2191_v45 }
  0x71   :  { %2011 = vmatpush3.bf16.msra.mxu0 %v2191_v45 }
  0x72   :  { %2047 = vmatpush3.bf16.msra.mxu1 %v2191_v45  ;;  %2012 = vmatprep.subr.bf16.mxu0 %v2198_v46 }
  0x73   :  { %1292 = vmatmul.mubr.bf16.gmra.mxu0 %v2182_v47  ;;  %2040 = vmatprep.subr.bf16.mxu1 %v2198_v46 }
  0x74   :  { %1389 = vmatmul.mubr.bf16.gmra.mxu1 %v2183_v48  ;;  %1299 = vmatprep.mubr.bf16.mxu0 %v2185_v49 }
  0x75   :  { %1396 = vmatprep.mubr.bf16.mxu1 %v2187_v50  ;;  %2013 = vmatpush3.bf16.msra.mxu0 %v2198_v46 }
  0x76   :  { %2048 = vmatpush3.bf16.msra.mxu1 %v2198_v46  ;;  %2014 = vmatprep.subr.bf16.mxu0 %v2205_v51 }
  0x77   :  { %2041 = vmatprep.subr.bf16.mxu1 %v2205_v51 }
  0x79   :  { %2015 = vmatpush3.bf16.msra.mxu0 %v2205_v51 }
  0x7a   :  { %2049 = vmatpush3.bf16.msra.mxu1 %v2205_v51  ;;  %2016 = vmatprep.subr.bf16.mxu0 %v2212_v53 }
  0x7b   :  { %1300 = vmatmul.mubr.bf16.gmra.mxu0 %v2189_v52  ;;  %2042 = vmatprep.subr.bf16.mxu1 %v2212_v53 }
  0x7c   :  { %1397 = vmatmul.mubr.bf16.gmra.mxu1 %v2190_v54  ;;  %1307 = vmatprep.mubr.bf16.mxu0 %v2192_v55 }
  0x7d   :  { %1404 = vmatprep.mubr.bf16.mxu1 %v2194_v56  ;;  %2017 = vmatpush3.bf16.msra.mxu0 %v2212_v53 }
  0x7e   :  { %2050 = vmatpush3.bf16.msra.mxu1 %v2212_v53  ;;  %2018 = vmatprep.subr.bf16.mxu0 %v2219_v57 }
  0x7f   :  { %2043 = vmatprep.subr.bf16.mxu1 %v2219_v57 }
  0x81   :  { %2019 = vmatpush3.bf16.msra.mxu0 %v2219_v57 }
  0x82   :  { %2051 = vmatpush3.bf16.msra.mxu1 %v2219_v57 }
  0x83   :  { %1308 = vmatmul.mubr.bf16.gmra.mxu0 %v2196_v58 }
  0x84   :  { %1405 = vmatmul.mubr.bf16.gmra.mxu1 %v2197_v59  ;;  %1315 = vmatprep.mubr.bf16.mxu0 %v2199_v60 }
  0x85   :  { %1412 = vmatprep.mubr.bf16.mxu1 %v2201_v61 }
  0x8b   :  { %1316 = vmatmul.mubr.bf16.gmra.mxu0 %v2203_v62 }
  0x8c   :  { %1413 = vmatmul.mubr.bf16.gmra.mxu1 %v2204_v63  ;;  %1323 = vmatprep.mubr.bf16.mxu0 %v2206_v0 }
  0x8d   :  { %1420 = vmatprep.mubr.bf16.mxu1 %v2208_v1 }
  0x93   :  { %1324 = vmatmul.mubr.bf16.gmra.mxu0 %v2210_v2 }
  0x94   :  { %1421 = vmatmul.mubr.bf16.gmra.mxu1 %v2211_v3  ;;  %1331 = vmatprep.mubr.bf16.mxu0 %v2213_v4 }
  0x95   :  { %1428 = vmatprep.mubr.bf16.mxu1 %v2215_v5 }
  0x9b   :  { %1332 = vmatmul.mubr.bf16.gmra.mxu0 %v2217_v6 }
  0x9c   :  { %1429 = vmatmul.mubr.bf16.gmra.mxu1 %v2218_v7  ;;  %2020 = vmatprep.mubr.bf16.mxu0 %v2220_v8 }
  0x9d   :  { %2028 = vmatprep.mubr.bf16.mxu1 %v2221_v9 }
  0xa3   :  { %2021 = vmatmul.mubr.bf16.vlgmr.msra.gmra.mxu0 %v2222_v10 }
  0xa4   :  { %2029 = vmatmul.mubr.bf16.vlgmr.msra.gmra.mxu1 %v2223_v11  ;;  %2024 = vmatprep.mubr.bf16.mxu0 %v2224_v12 }
  0xa5   :  { %2032 = vmatprep.mubr.bf16.mxu1 %v2225_v13 }
  0xab   :  { %2025 = vmatmul.mubr.bf16.gmra.mxu0 %v2226_v14 }
  0xac   :  { %2033 = vmatmul.mubr.bf16.gmra.mxu1 %v2227_v15 }
  0xe3   :  { %v1748_v16 = vpop.f32.mrf.mxu0 }
  0xe4   :  { %v1812_v17 = vpop.f32.mrf.mxu1 }
  0xe5   :  { %v1749_v19 = vpop.f32.mrf.mxu0 }
  0xe6   :  { %v1750_v20 = vadd.f32 %v1749_v19, %v1748_v16  ;;  %v1813_v21 = vpop.f32.mrf.mxu1 }
  0xe7   :  { %v1814_v22 = vadd.f32 %v1813_v21, %v1812_v17  ;;  %v1751_v23 = vpop.f32.mrf.mxu0 }
  0xe8   :  { %v1084_v24 = vadd.f32 %v1750_v20, %v2688_v18  ;;  %v1815_v25 = vpop.f32.mrf.mxu1 }
  0xe9   :  { %v1752_v26 = vpop.f32.mrf.mxu0 }
  0xea   :  { %v2691_v27 = vadd.f32 %v1814_v22, %v1084_v24  ;;  %v1753_v28 = vadd.f32 %v1752_v26, %v1751_v23  ;;  %v1816_v29 = vpop.f32.mrf.mxu1 }
  0xeb   :  { %v1817_v30 = vadd.f32 %v1816_v29, %v1815_v25  ;;  %v1754_v31 = vpop.f32.mrf.mxu0 }
  0xec   :  { %v1087_v32 = vadd.f32 %v1753_v28, %v2688_v18  ;;  %v1818_v33 = vpop.f32.mrf.mxu1 }
  0xed   :  { %v1755_v34 = vpop.f32.mrf.mxu0 }
  0xee   :  { %v2694_v35 = vadd.f32 %v1817_v30, %v1087_v32  ;;  %v1756_v36 = vadd.f32 %v1755_v34, %v1754_v31  ;;  %v1819_v37 = vpop.f32.mrf.mxu1 }
  0xef   :  { %v1820_v38 = vadd.f32 %v1819_v37, %v1818_v33  ;;  %v1757_v39 = vpop.f32.mrf.mxu0 }
  0xf0   :  { %v1092_v40 = vadd.f32 %v1756_v36, %v2688_v18  ;;  %v1821_v41 = vpop.f32.mrf.mxu1 }
  0xf1   :  { %v1758_v42 = vpop.f32.mrf.mxu0 }
  0xf2   :  { %v2697_v43 = vadd.f32 %v1820_v38, %v1092_v40  ;;  %v1759_v44 = vadd.f32 %v1758_v42, %v1757_v39  ;;  %v1822_v45 = vpop.f32.mrf.mxu1 }
  0xf3   :  { %v1823_v46 = vadd.f32 %v1822_v45, %v1821_v41  ;;  %v1760_v47 = vpop.f32.mrf.mxu0 }
  0xf4   :  { %v1095_v48 = vadd.f32 %v1759_v44, %v2688_v18  ;;  %v1824_v49 = vpop.f32.mrf.mxu1 }
  0xf5   :  { %v1761_v50 = vpop.f32.mrf.mxu0 }
  0xf6   :  { %v2700_v51 = vadd.f32 %v1823_v46, %v1095_v48  ;;  %v1762_v52 = vadd.f32 %v1761_v50, %v1760_v47  ;;  %v1825_v53 = vpop.f32.mrf.mxu1 }
  0xf7   :  { %v1826_v54 = vadd.f32 %v1825_v53, %v1824_v49  ;;  %v1763_v55 = vpop.f32.mrf.mxu0 }
  0xf8   :  { %v1100_v56 = vadd.f32 %v1762_v52, %v2688_v18  ;;  %v1827_v57 = vpop.f32.mrf.mxu1 }
  0xf9   :  { %v1764_v58 = vpop.f32.mrf.mxu0 }
  0xfa   :  { %v2703_v59 = vadd.f32 %v1826_v54, %v1100_v56  ;;  %v1765_v60 = vadd.f32 %v1764_v58, %v1763_v55  ;;  %v1828_v61 = vpop.f32.mrf.mxu1 }
  0xfb   :  { %v1829_v62 = vadd.f32 %v1828_v61, %v1827_v57  ;;  %v1766_v63 = vpop.f32.mrf.mxu0 }
  0xfc   :  { %v1103_v0 = vadd.f32 %v1765_v60, %v2688_v18  ;;  %v1830_v1 = vpop.f32.mrf.mxu1 }
  0xfd   :  { %v1767_v2 = vpop.f32.mrf.mxu0 }
  0xfe   :  { %v2706_v3 = vadd.f32 %v1829_v62, %v1103_v0  ;;  %v1768_v4 = vadd.f32 %v1767_v2, %v1766_v63  ;;  %v1831_v5 = vpop.f32.mrf.mxu1 }
  0xff   :  { %v1832_v6 = vadd.f32 %v1831_v5, %v1830_v1  ;;  %v1769_v7 = vpop.f32.mrf.mxu0 }
 0x100   :  { %v1108_v8 = vadd.f32 %v1768_v4, %v2688_v18  ;;  %v1833_v9 = vpop.f32.mrf.mxu1 }
 0x101   :  { %v1770_v10 = vpop.f32.mrf.mxu0 }
 0x102   :  { %v2709_v11 = vadd.f32 %v1832_v6, %v1108_v8  ;;  %v1771_v12 = vadd.f32 %v1770_v10, %v1769_v7  ;;  %v1834_v13 = vpop.f32.mrf.mxu1 }
 0x103   :  { %v1835_v14 = vadd.f32 %v1834_v13, %v1833_v9  ;;  %v1772_v15 = vpop.f32.mrf.mxu0 }
 0x104   :  { %v1111_v16 = vadd.f32 %v1771_v12, %v2688_v18  ;;  %v1836_v17 = vpop.f32.mrf.mxu1 }
 0x105   :  { %v1773_v19 = vpop.f32.mrf.mxu0 }
 0x106   :  { %v2712_v20 = vadd.f32 %v1835_v14, %v1111_v16  ;;  %v1774_v21 = vadd.f32 %v1773_v19, %v1772_v15  ;;  %v1837_v22 = vpop.f32.mrf.mxu1 }
 0x107   :  { %v1838_v23 = vadd.f32 %v1837_v22, %v1836_v17  ;;  %v1775_v24 = vpop.f32.mrf.mxu0 }
 0x108   :  { %2961 = vst [vmem:[#allocation2_spill] sm:$0xff] %v2712_v20  ;;  %v1116_v25 = vadd.f32 %v1774_v21, %v2688_v18  ;;  %v1839_v26 = vpop.f32.mrf.mxu1 }
 0x109   :  { %v1776_v28 = vpop.f32.mrf.mxu0 }
 0x10a   :  { %v2715_v29 = vadd.f32 %v1838_v23, %v1116_v25  ;;  %v1777_v30 = vadd.f32 %v1776_v28, %v1775_v24  ;;  %v1840_v31 = vpop.f32.mrf.mxu1 }
 0x10b   :  { %v1841_v32 = vadd.f32 %v1840_v31, %v1839_v26  ;;  %v1778_v33 = vpop.f32.mrf.mxu0 }
 0x10c   :  { %v1119_v34 = vadd.f32 %v1777_v30, %v2688_v18  ;;  %v1842_v36 = vpop.f32.mrf.mxu1 }
 0x10d   :  { %v1779_v37 = vpop.f32.mrf.mxu0 }
 0x10e   :  { %v2718_v38 = vadd.f32 %v1841_v32, %v1119_v34  ;;  %v1780_v39 = vadd.f32 %v1779_v37, %v1778_v33  ;;  %v1843_v40 = vpop.f32.mrf.mxu1 }
 0x10f   :  { %v1844_v41 = vadd.f32 %v1843_v40, %v1842_v36  ;;  %v1781_v42 = vpop.f32.mrf.mxu0 }
 0x110   :  { %2962 = vst [vmem:[#allocation3_spill] sm:$0xff] %v2718_v38  ;;  %v1124_v44 = vadd.f32 %v1780_v39, %v2688_v18  ;;  %v1845_v45 = vpop.f32.mrf.mxu1 }
 0x111   :  { %v1782_v46 = vpop.f32.mrf.mxu0 }
 0x112   :  { %v2721_v47 = vadd.f32 %v1844_v41, %v1124_v44  ;;  %v1783_v48 = vadd.f32 %v1782_v46, %v1781_v42  ;;  %v1846_v49 = vpop.f32.mrf.mxu1 }
 0x113   :  { %v1847_v50 = vadd.f32 %v1846_v49, %v1845_v45  ;;  %v1784_v52 = vpop.f32.mrf.mxu0 }
 0x114   :  { %v1127_v53 = vadd.f32 %v1783_v48, %v2688_v18  ;;  %v1848_v54 = vpop.f32.mrf.mxu1 }
 0x115   :  { %v1785_v55 = vpop.f32.mrf.mxu0 }
 0x116   :  { %v2724_v56 = vadd.f32 %v1847_v50, %v1127_v53  ;;  %v1786_v57 = vadd.f32 %v1785_v55, %v1784_v52  ;;  %v1849_v58 = vpop.f32.mrf.mxu1 }
 0x117   :  { %v1850_v60 = vadd.f32 %v1849_v58, %v1848_v54  ;;  %v1787_v61 = vpop.f32.mrf.mxu0 }
 0x118   :  { %v1132_v62 = vadd.f32 %v1786_v57, %v2688_v18  ;;  %v1851_v63 = vpop.f32.mrf.mxu1 }
 0x119   :  { %v1788_v0 = vpop.f32.mrf.mxu0 }
 0x11a   :  { %v2727_v1 = vadd.f32 %v1850_v60, %v1132_v62  ;;  %v1789_v2 = vadd.f32 %v1788_v0, %v1787_v61  ;;  %v1852_v4 = vpop.f32.mrf.mxu1 }
 0x11b   :  { %v1853_v5 = vadd.f32 %v1852_v4, %v1851_v63  ;;  %v1790_v6 = vpop.f32.mrf.mxu0 }
 0x11c   :  { %2963 = vst [vmem:[#allocation4_spill] sm:$0xff] %v2727_v1  ;;  %v1135_v7 = vadd.f32 %v1789_v2, %v2688_v18  ;;  %v1854_v8 = vpop.f32.mrf.mxu1 }
 0x11d   :  { %v1791_v9 = vpop.f32.mrf.mxu0 }
 0x11e   :  { %v2730_v10 = vadd.f32 %v1853_v5, %v1135_v7  ;;  %v1792_v12 = vadd.f32 %v1791_v9, %v1790_v6  ;;  %v1855_v13 = vpop.f32.mrf.mxu1 }
 0x11f   :  { %v1856_v14 = vadd.f32 %v1855_v13, %v1854_v8  ;;  %v1793_v15 = vpop.f32.mrf.mxu0 }
 0x120   :  { %2964 = vst [vmem:[#allocation5_spill] sm:$0xff] %v2730_v10  ;;  %v1140_v16 = vadd.f32 %v1792_v12, %v2688_v18  ;;  %v1857_v17 = vpop.f32.mrf.mxu1 }
 0x121   :  { %v1794_v19 = vpop.f32.mrf.mxu0 }
 0x122   :  { %v2733_v21 = vadd.f32 %v1856_v14, %v1140_v16  ;;  %v1795_v22 = vadd.f32 %v1794_v19, %v1793_v15  ;;  %v1858_v23 = vpop.f32.mrf.mxu1 }
 0x123   :  { %v1859_v24 = vadd.f32 %v1858_v23, %v1857_v17  ;;  %v1876_v25 = vpop.f32.mrf.mxu0 }
 0x124   :  { %2965 = vst [vmem:[#allocation6_spill] sm:$0xff] %v2733_v21  ;;  %v1143_v26 = vadd.f32 %v1795_v22, %v2688_v18  ;;  %v2736_v28 = vpop.f32.mrf.mxu1 }
 0x125   :  { %v1877_v30 = vpop.f32.mrf.mxu0 }
 0x126   :  { %v2738_v31 = vadd.f32 %v1859_v24, %v1143_v26  ;;  %v1941_v32 = vpop.f32.mrf.mxu1 }
 0x127   :  { %v1879_v33 = vpop.f32.mrf.mxu0 }
 0x128   :  { %2966 = vst [vmem:[#allocation7_spill] sm:$0xff] %v2738_v31  ;;  %v1943_v34 = vpop.f32.mrf.mxu1 }
 0x129   :  { %v1880_v36 = vpop.f32.mrf.mxu0 }
 0x12a   :  { %v1944_v37 = vpop.f32.mrf.mxu1  ;;  %v1881_v20 = vadd.f32 %v1880_v36, %v1879_v33 }
 0x12b   :  { %v1882_v39 = vpop.f32.mrf.mxu0  ;;  %v1945_v33 = vadd.f32 %v1944_v37, %v1943_v34 }
 0x12c   :  { %v2740_v40 = vpop.f32.mrf.mxu1 }
 0x12d   :  { %v1883_v41 = vpop.f32.mrf.mxu0 }
 0x12e   :  { %v2742_v42 = vpop.f32.mrf.mxu1  ;;  %v1884_v21 = vadd.f32 %v1883_v41, %v1882_v39 }
 0x12f   :  { %v1885_v44 = vpop.f32.mrf.mxu0 }
 0x130   :  { %v2744_v45 = vpop.f32.mrf.mxu1  ;;  %v1286_v36 = vadd.f32 %v1884_v21, %v2697_v43 }
 0x131   :  { %v1886_v18 = vpop.f32.mrf.mxu0 }
 0x132   :  { %v2746_v46 = vpop.f32.mrf.mxu1 }
 0x133   :  { %v1888_v48 = vpop.f32.mrf.mxu0  ;;  %v1951_v43 = vadd.f32 %v2746_v46, %v2744_v45 }
 0x134   :  { %v2748_v49 = vpop.f32.mrf.mxu1 }
 0x135   :  { %v1889_v50 = vpop.f32.mrf.mxu0 }
 0x136   :  { %v2750_v52 = vpop.f32.mrf.mxu1 }
 0x137   :  { %v1891_v53 = vpop.f32.mrf.mxu0  ;;  %v1954_v21 = vadd.f32 %v2750_v52, %v2748_v49 }
 0x138   :  { %v2752_v54 = vpop.f32.mrf.mxu1 }
 0x139   :  { %2967 = vst [vmem:[#allocation8_spill] sm:$0xff] %v2752_v54  ;;  %v1892_v55 = vpop.f32.mrf.mxu0 }
 0x13a   :  { %v2754_v57 = vpop.f32.mrf.mxu1 }
 0x13b   :  { %2968 = vst [vmem:[#allocation9_spill] sm:$0xff] %v2754_v57  ;;  %v1894_v58 = vpop.f32.mrf.mxu0 }
 0x13c   :  { %v2756_v60 = vpop.f32.mrf.mxu1 }
 0x13d   :  { %v1895_v61 = vpop.f32.mrf.mxu0 }
 0x13e   :  { %v2758_v62 = vpop.f32.mrf.mxu1  ;;  %v1896_v39 = vadd.f32 %v1895_v61, %v1894_v58 }
 0x13f   :  { %v2760_v63 = vpop.f32.mrf.mxu0  ;;  %v1960_v52 = vadd.f32 %v2758_v62, %v2756_v60  ;;  %v1544_v60 = vld [vmem:[%s2959_s3 + $0x50] sm:$0xff] }
 0x140   :  { %2969 = vst [vmem:[#allocation10_spill] sm:$0xff] %v2760_v63  ;;  %v2762_v0 = vpop.f32.mrf.mxu1  ;;  %v1302_v37 = vadd.f32 %v1896_v39, %v2709_v11 }
 0x141   :  { %2970 = vst [vmem:[#allocation11_spill] sm:$0xff] %v2762_v0  ;;  %v2764_v2 = vpop.f32.mrf.mxu0  ;;  %v1878_v0 = vadd.f32 %v1877_v30, %v1876_v25  ;;  %v1281_v25 = vadd.f32 %v1881_v20, %v2694_v35 }
 0x142   :  { %2971 = vst [vmem:[#allocation12_spill] sm:$0xff] %v2764_v2  ;;  %v2766_v4 = vpop.f32.mrf.mxu1  ;;  %v1890_v2 = vadd.f32 %v1889_v50, %v1888_v48  ;;  %v1893_v48 = vadd.f32 %v1892_v55, %v1891_v53 }
 0x143   :  { %2972 = vst [vmem:[#allocation13_spill] sm:$0xff] %v2766_v4  ;;  %v1900_v5 = vpop.f32.mrf.mxu0  ;;  %v1278_v38 = vadd.f32 %v1878_v0, %v2691_v27 }
 0x144   :  { %v2768_v6 = vpop.f32.mrf.mxu1  ;;  %v2808_v55 = vadd.f32 %v1893_v48, %v2706_v3  ;;  %v1536_v3 = vld [vmem:[%s2959_s3 + $0x10] sm:$0xff]  ;;  %v1537_v48 = vld [vmem:[%s2959_s3 + $0x18] sm:$0xff] }
 0x145   :  { %2973 = vst [vmem:[#allocation14_spill] sm:$0xff] %v2768_v6  ;;  %v1901_v7 = vpop.f32.mrf.mxu0  ;;  %v1942_v6 = vadd.f32 %v1941_v32, %v2736_v28  ;;  %v1948_v28 = vadd.f32 %v2742_v42, %v2740_v40 }
 0x146   :  { %v2770_v8 = vpop.f32.mrf.mxu1  ;;  %v1902_v41 = vadd.f32 %v1901_v7, %v1900_v5  ;;  %v2981_v5 = vld [vmem:[#allocation3_spill] sm:$0xff] }
 0x147   :  { %2974 = vst [vmem:[#allocation15_spill] sm:$0xff] %v2770_v8  ;;  %v1903_v9 = vpop.f32.mrf.mxu0  ;;  %v1375_v32 = vadd.f32 %v1942_v6, %v1278_v38  ;;  %v2982_v62 = vld [vmem:[#allocation10_spill] sm:$0xff] }
 0x148   :  { %v2772_v12 = vpop.f32.mrf.mxu1  ;;  %v1310_v53 = vadd.f32 %v1902_v41, %v2715_v29 }
 0x149   :  { %2975 = vst [vmem:[#allocation16_spill] sm:$0xff] %v2772_v12  ;;  %v1904_v13 = vpop.f32.mrf.mxu0  ;;  %v1887_v12 = vadd.f32 %v1886_v18, %v1885_v44  ;;  %v1294_v18 = vadd.f32 %v1890_v2, %v2703_v59  ;;  %v1378_v59 = vadd.f32 %v1945_v33, %v1281_v25  ;;  %v2986_v33 = vld [vmem:[#allocation6_spill] sm:$0xff] }
 0x14a   :  { %v2774_v14 = vpop.f32.mrf.mxu1 }
 0x14b   :  { %2976 = vst [vmem:[#allocation17_spill] sm:$0xff] %v2774_v14  ;;  %v1906_v15 = vpop.f32.mrf.mxu0  ;;  %v1289_v44 = vadd.f32 %v1887_v12, %v2700_v51  ;;  %v1905_v51 = vadd.f32 %v1904_v13, %v1903_v9  ;;  %v2813_v49 = vadd.f32 %v1954_v21, %v1294_v18  ;;  %v2983_v12 = vld [vmem:[#allocation12_spill] sm:$0xff] }
 0x14c   :  { %v1970_v16 = vpop.f32.mrf.mxu1  ;;  %v2979_v58 = vld [vmem:[#allocation14_spill] sm:$0xff]  ;;  %v1899_v13 = vadd.f32 %v2983_v12, %v2982_v62  ;;  %v2993_v62 = vld [vmem:[#allocation5_spill] sm:$0xff] }
 0x14d   :  { %v1907_v17 = vpop.f32.mrf.mxu0  ;;  %v1386_v46 = vadd.f32 %v1951_v43, %v1289_v44 }
 0x14e   :  { %v1971_v19 = vpop.f32.mrf.mxu1  ;;  %v1908_v8 = vadd.f32 %v1907_v17, %v1906_v15  ;;  %v2980_v11 = vld [vmem:[#allocation15_spill] sm:$0xff]  ;;  %v1534_v15 = vld [vmem:[%s2959_s3] sm:$0xff]  ;;  %v1399_v17 = vadd.f32 %v1960_v52, %v1302_v37 }
 0x14f   :  { %v1909_v22 = vpop.f32.mrf.mxu0  ;;  %v1972_v40 = vadd.f32 %v1971_v19, %v1970_v16  ;;  %v1966_v61 = vadd.f32 %v2980_v11, %v2979_v58  ;;  %v2990_v11 = vld [vmem:[#allocation7_spill] sm:$0xff] }
 0x150   :  { %v1973_v23 = vpop.f32.mrf.mxu1  ;;  %v1318_v35 = vadd.f32 %v1908_v8, %v2721_v47  ;;  %v1383_v47 = vadd.f32 %v1948_v28, %v1286_v36  ;;  %v2984_v19 = vld [vmem:[#allocation16_spill] sm:$0xff] }
 0x151   :  { %v1910_v24 = vpop.f32.mrf.mxu0  ;;  %v1407_v16 = vadd.f32 %v1966_v61, %v1310_v53 }
 0x152   :  { %v1974_v26 = vpop.f32.mrf.mxu1  ;;  %v1911_v27 = vadd.f32 %v1910_v24, %v1909_v22  ;;  %v1415_v2 = vadd.f32 %v1972_v40, %v1318_v35  ;;  %v2985_v22 = vld [vmem:[#allocation17_spill] sm:$0xff] }
 0x153   :  { %v1912_v57 = vpop.f32.mrf.mxu0  ;;  %v1975_v6 = vadd.f32 %v1974_v26, %v1973_v23  ;;  %v1542_v26 = vld [vmem:[%s2959_s3 + $0x40] sm:$0xff] }
 0x154   :  { %v2776_v54 = vpop.f32.mrf.mxu1  ;;  %v1321_v38 = vadd.f32 %v1911_v27, %v2724_v56  ;;  %v1313_v56 = vadd.f32 %v1905_v51, %v2981_v5  ;;  %v2987_v27 = vld [vmem:[#allocation4_spill] sm:$0xff]  ;;  %v2992_v5 = vld [vmem:[#allocation13_spill] sm:$0xff] }
 0x155   :  { %2977 = vst [vmem:[#allocation18_spill] sm:$0xff] %v2776_v54  ;;  %v1913_v10 = vpop.f32.mrf.mxu0 }
 0x156   :  { %v2778_v4 = vpop.f32.mrf.mxu1  ;;  %v1914_v7 = vadd.f32 %v1913_v10, %v1912_v57  ;;  %v1969_v10 = vadd.f32 %v2985_v22, %v2984_v19  ;;  %v1418_v25 = vadd.f32 %v1975_v6, %v1321_v38  ;;  %v2988_v38 = vld [vmem:[#allocation2_spill] sm:$0xff]  ;;  %v2995_v19 = vld [vmem:[#allocation9_spill] sm:$0xff] }
 0x157   :  { %v2780_v31 = vpop.f32.mrf.mxu0 }
 0x158   :  { %v2782_v1 = vpop.f32.mrf.mxu1  ;;  %v1326_v28 = vadd.f32 %v1914_v7, %v2987_v27  ;;  %v1410_v21 = vadd.f32 %v1969_v10, %v1313_v56 }
 0x159   :  { %2978 = vst [vmem:[#allocation19_spill] sm:$0xff] %v2782_v1  ;;  %v2784_v14 = vpop.f32.mrf.mxu0 }
 0x15a   :  { %v2786_v63 = vpop.f32.mrf.mxu1  ;;  %v1917_v51 = vadd.f32 %v2784_v14, %v2780_v31 }
 0x15b   :  { %v1918_v54 = vpop.f32.mrf.mxu0 }
 0x15c   :  { %v2791_v30 = vpop.f32.mrf.mxu1  ;;  %v2989_v52 = vld [vmem:[#allocation18_spill] sm:$0xff]  ;;  %v1329_v12 = vadd.f32 %v1917_v51, %v2993_v62  ;;  %v1547_v51 = vld [vmem:[%s2959_s3 + $0x68] sm:$0xff] }
 0x15d   :  { %v1919_v1 = vpop.f32.mrf.mxu0  ;;  %v1978_v58 = vadd.f32 %v2778_v4, %v2989_v52 }
 0x15e   :  { %v1983_v50 = vpop.f32.mrf.mxu1  ;;  %v1920_v29 = vadd.f32 %v1919_v1, %v1918_v54 }
 0x15f   :  { %v1921_v20 = vpop.f32.mrf.mxu0  ;;  %v1984_v37 = vadd.f32 %v1983_v50, %v2791_v30  ;;  %v1543_v50 = vld [vmem:[%s2959_s3 + $0x48] sm:$0xff] }
 0x160   :  { %v2803_v34 = vpop.f32.mrf.mxu1  ;;  %v1334_v36 = vadd.f32 %v1920_v29, %v2986_v33 }
 0x161   :  { %v1922_v42 = vpop.f32.mrf.mxu0 }
 0x162   :  { %v2811_v45 = vpop.f32.mrf.mxu1  ;;  %v1923_v39 = vadd.f32 %v1922_v42, %v1921_v20  ;;  %v1545_v20 = vld [vmem:[%s2959_s3 + $0x58] sm:$0xff] }
 0x163   :  { %v2022_v0 = vpop.f32.mrf.mxu0 }
 0x164   :  { %v1480_v8 = vadd.f32 %v2022_v0, %v1383_v47  ;;  %v2030_v9 = vpop.f32.mrf.mxu1  ;;  %v1535_v47 = vld [vmem:[%s2959_s3 + $0x8] sm:$0xff]  ;;  %v1337_v61 = vadd.f32 %v1923_v39, %v2990_v11 }
 0x165   :  { %v1512_v1 = vadd.f32 %v2030_v9, %v1415_v2  ;;  %v1471_v54 = vpop.f32.mrf.mxu0  ;;  %v2991_v2 = vld [vmem:[#allocation11_spill] sm:$0xff]  ;;  %v1548_v9 = vld [vmem:[%s2959_s3 + $0x70] sm:$0xff] }
 0x166   :  { %v1552_v57 = vadd.f32 %v1536_v3, %v1480_v8  ;;  %v1472_v23 = vadd.f32 %v1471_v54, %v1375_v32  ;;  %v1503_v24 = vpop.f32.mrf.mxu1  ;;  %v1540_v3 = vld [vmem:[%s2959_s3 + $0x30] sm:$0xff]  ;;  %v1963_v56 = vadd.f32 %v2992_v5, %v2991_v2 }
 0x167   :  { %v1560_v41 = vadd.f32 %v1544_v60, %v1512_v1  ;;  %v1504_v44 = vadd.f32 %v1503_v24, %v1407_v16  ;;  %v2023_v18 = vpop.f32.mrf.mxu0  ;;  %v1423_v60 = vadd.f32 %v1978_v58, %v1326_v28  ;;  %v1538_v16 = vld [vmem:[%s2959_s3 + $0x20] sm:$0xff]  ;;  %v2996_v24 = vld [vmem:[#allocation19_spill] sm:$0xff] }
 0x168   :  { %1569 = vst.msk [vmem:[%s2960_s4 + $0x10] sm:$0xff] %vm1566_vm0, %v1552_v57  ;;  %v1550_v35 = vadd.f32 %v1534_v15, %v1472_v23  ;;  %v1483_v32 = vadd.f32 %v2023_v18, %v1386_v46  ;;  %v2031_v43 = vpop.f32.mrf.mxu1  ;;  %v1305_v46 = vadd.f32 %v1899_v13, %v2988_v38  ;;  %v1987_v13 = vadd.f32 %v2811_v45, %v2803_v34  ;;  %v1546_v57 = vld [vmem:[%s2959_s3 + $0x60] sm:$0xff]  ;;  %v1549_v18 = vld [vmem:[%s2959_s3 + $0x78] sm:$0xff] }
 0x169   :  { %1577 = vst.msk [vmem:[%s2960_s4 + $0x50] sm:$0xff] %vm1566_vm0, %v1560_v41  ;;  %v1558_v53 = vadd.f32 %v1542_v26, %v1504_v44  ;;  %v1515_v40 = vadd.f32 %v2031_v43, %v1418_v25  ;;  %v1474_v42 = vpop.f32.mrf.mxu0  ;;  %v1981_v26 = vadd.f32 %v2786_v63, %v2996_v24 }
 0x16a   :  { %1567 = vst.msk [vmem:[%s2960_s4] sm:$0xff] %vm1566_vm0, %v1550_v35  ;;  %v1553_v31 = vadd.f32 %v1537_v48, %v1483_v32  ;;  %v1475_v14 = vadd.f32 %v1474_v42, %v1378_v59  ;;  %v1506_v30 = vpop.f32.mrf.mxu1  ;;  %v1431_v59 = vadd.f32 %v1984_v37, %v1334_v36  ;;  %v1402_v23 = vadd.f32 %v1963_v56, %v1305_v46  ;;  %v1539_v32 = vld [vmem:[%s2959_s3 + $0x28] sm:$0xff] }
 0x16b   :  { %1575 = vst.msk [vmem:[%s2960_s4 + $0x40] sm:$0xff] %vm1566_vm0, %v1558_v53  ;;  %v1561_v4 = vadd.f32 %v1545_v20, %v1515_v40  ;;  %v1507_v29 = vadd.f32 %v1506_v30, %v1410_v21  ;;  %v2026_v0 = vpop.f32.mrf.mxu0  ;;  %v1434_v39 = vadd.f32 %v1987_v13, %v1337_v61  ;;  %v1426_v43 = vadd.f32 %v1981_v26, %v1329_v12 }
 0x16c   :  { %1570 = vst.msk [vmem:[%s2960_s4 + $0x18] sm:$0xff] %vm1566_vm0, %v1553_v31  ;;  %v1551_v6 = vadd.f32 %v1535_v47, %v1475_v14  ;;  %v1496_v7 = vadd.f32 %v2026_v0, %v1399_v17  ;;  %v2034_v8 = vpop.f32.mrf.mxu1  ;;  %v2994_v17 = vld [vmem:[#allocation8_spill] sm:$0xff] }
 0x16d   :  { %1578 = vst.msk [vmem:[%s2960_s4 + $0x58] sm:$0xff] %vm1566_vm0, %v1561_v4  ;;  %v1559_v1 = vadd.f32 %v1543_v50, %v1507_v29  ;;  %v1528_v54 = vadd.f32 %v2034_v8, %v1431_v59  ;;  %v1487_v15 = vpop.f32.mrf.mxu0  ;;  %v1957_v22 = vadd.f32 %v2995_v19, %v2994_v17 }
 0x16e   :  { %1568 = vst.msk [vmem:[%s2960_s4 + $0x8] sm:$0xff] %vm1566_vm0, %v1551_v6  ;;  %v1556_v34 = vadd.f32 %v1540_v3, %v1496_v7  ;;  %v1488_v45 = vadd.f32 %v1487_v15, %v2813_v49  ;;  %v1519_v10 = vpop.f32.mrf.mxu1  ;;  %v1541_v49 = vld [vmem:[%s2959_s3 + $0x38] sm:$0xff] }
 0x16f   :  { %1576 = vst.msk [vmem:[%s2960_s4 + $0x48] sm:$0xff] %vm1566_vm0, %v1559_v1  ;;  %v1564_v25 = vadd.f32 %v1548_v9, %v1528_v54  ;;  %v1520_v33 = vadd.f32 %v1519_v10, %v1423_v60  ;;  %v2027_v36 = vpop.f32.mrf.mxu0  ;;  %v1394_v48 = vadd.f32 %v1957_v22, %v2808_v55 }
 0x170   :  { %1573 = vst.msk [vmem:[%s2960_s4 + $0x30] sm:$0xff] %vm1566_vm0, %v1556_v34  ;;  %v1554_v41 = vadd.f32 %v1538_v16, %v1488_v45  ;;  %v1499_v63 = vadd.f32 %v2027_v36, %v1402_v23  ;;  %v2035_v44 = vpop.f32.mrf.mxu1 }
 0x171   :  { %1581 = vst.msk [vmem:[%s2960_s4 + $0x70] sm:$0xff] %vm1566_vm0, %v1564_v25  ;;  %v1562_v27 = vadd.f32 %v1546_v57, %v1520_v33  ;;  %v1531_v28 = vadd.f32 %v2035_v44, %v1434_v39  ;;  %v1490_v35 = vpop.f32.mrf.mxu0 }
 0x172   :  { %1571 = vst.msk [vmem:[%s2960_s4 + $0x20] sm:$0xff] %vm1566_vm0, %v1554_v41  ;;  %v1557_v20 = vadd.f32 %v1541_v49, %v1499_v63  ;;  %v1491_v55 = vadd.f32 %v1490_v35, %v1394_v48  ;;  %v1522_v21 = vpop.f32.mrf.mxu1 }
 0x173   :  { %1579 = vst.msk [vmem:[%s2960_s4 + $0x60] sm:$0xff] %vm1566_vm0, %v1562_v27  ;;  %v1565_v37 = vadd.f32 %v1549_v18, %v1531_v28  ;;  %v1523_v53 = vadd.f32 %v1522_v21, %v1426_v43 }
 0x174   :  { %1574 = vst.msk [vmem:[%s2960_s4 + $0x38] sm:$0xff] %vm1566_vm0, %v1557_v20  ;;  %v1555_v40 = vadd.f32 %v1539_v32, %v1491_v55 }
 0x175   :  { %1582 = vst.msk [vmem:[%s2960_s4 + $0x78] sm:$0xff] %vm1566_vm0, %v1565_v37  ;;  %v1563_v42 = vadd.f32 %v1547_v51, %v1523_v53 }
 0x176   :  { %1572 = vst.msk [vmem:[%s2960_s4 + $0x28] sm:$0xff] %vm1566_vm0, %v1555_v40 }
 0x177   :  { %1580 = vst.msk [vmem:[%s2960_s4 + $0x68] sm:$0xff] %vm1566_vm0, %v1563_v42 }

</bundles_post_ra>
